<compile_context>
chip_gen: v6e
topology: v6e:2x2x1
jax: 0.10.0
libtpu: 0.0.40
codegen_flags: <defaults>
</compile_context>

<pallas_src>
import functools

import jax
import jax.numpy as jnp
from jax.experimental import pallas as pl
from jax.experimental.pallas import tpu as pltpu


# ----------------------------------------------------------------------------
# small helpers
# ----------------------------------------------------------------------------
def _round_up(x, m):
    return ((x + m - 1) // m) * m


def _lrelu(x):
    return jnp.where(x >= 0, x, 0.1 * x)


_TAPS = [(dy, dx) for dy in range(3) for dx in range(3)]  # dy-major == HWIO flatten order
_BF = jnp.bfloat16


# ----------------------------------------------------------------------------
# fused BasicBlock kernel
# ----------------------------------------------------------------------------
def _make_block_kernel(B, H, W, Cp, stride, equal_in_out, act_before_res):
    """Builds the fused kernel for one BasicBlock with static shape/config."""
    Ho = (H - 1) // stride + 1
    Wo = (W - 1) // stride + 1
    R = B * Ho * Wo
    has_sc = not equal_in_out

    if stride == 1:
        Hp1, Wp1 = H + 2, _round_up(W + 2, 8)      # conv1 zero-padded input buffer
    else:
        Hp1, Wp1 = Ho + 1, _round_up(Wo + 1, 8)    # per-parity padded buffers
    Hp2, Wp2 = Ho + 2, _round_up(Wo + 2, 8)        # conv2 zero-padded input buffer

    def kernel(*refs):
        it = iter(refs)
        x_ref = next(it)
        s1_ref, b1_ref, w1_ref = next(it), next(it), next(it)
        s2_ref, b2_ref, w2_ref = next(it), next(it), next(it)
        wsc_ref = next(it) if has_sc else None
        out_ref = next(it)
        pad1_ref = next(it)      # f32 VMEM: conv1 padded input (or 4 parity buffers)
        pad2_ref = next(it)      # f32 VMEM: conv2 padded input
        col_ref = next(it)       # bf16 VMEM: shared (R, 9*Cp) im2col staging buffer

        def bn1_act(v):          # fused BN1 + LeakyReLU(0.1), computed in f32
            return _lrelu(v * s1_ref[...] + b1_ref[...])

        # ---- zero only the 1-pixel halo ring (interior is fully overwritten below) ----
        if stride == 1:
            pad1_ref[:, 0:1, :, :] = jnp.zeros((B, 1, Wp1, Cp), jnp.float32)
            pad1_ref[:, H + 1:H + 2, :, :] = jnp.zeros((B, 1, Wp1, Cp), jnp.float32)
            pad1_ref[:, :, 0:1, :] = jnp.zeros((B, Hp1, 1, Cp), jnp.float32)
            pad1_ref[:, :, W + 1:W + 2, :] = jnp.zeros((B, Hp1, 1, Cp), jnp.float32)
        else:
            # odd-row parity slots (2, 3) need a zero top row; odd-col slots (1, 3) a
            # zero left column.  Everything else is written (or never read) each step.
            pad1_ref[2, :, 0:1, :, :] = jnp.zeros((B, 1, Wp1, Cp), jnp.float32)
            pad1_ref[3, :, 0:1, :, :] = jnp.zeros((B, 1, Wp1, Cp), jnp.float32)
            pad1_ref[1, :, :, 0:1, :] = jnp.zeros((B, Hp1, 1, Cp), jnp.float32)
            pad1_ref[3, :, :, 0:1, :] = jnp.zeros((B, Hp1, 1, Cp), jnp.float32)
        pad2_ref[:, 0:1, :, :] = jnp.zeros((B, 1, Wp2, Cp), jnp.float32)
        pad2_ref[:, Ho + 1:Ho + 2, :, :] = jnp.zeros((B, 1, Wp2, Cp), jnp.float32)
        pad2_ref[:, :, 0:1, :] = jnp.zeros((B, Hp2, 1, Cp), jnp.float32)
        pad2_ref[:, :, Wo + 1:Wo + 2, :] = jnp.zeros((B, Hp2, 1, Cp), jnp.float32)

        # ---- conv1 / shortcut source.  TorchSSL quirk: raw x when (!equalInOut && !abr)
        sc_rows = None
        xv = None
        if stride == 1:
            xv = x_ref[...]                                     # (B, H, W, Cp) f32
            src = bn1_act(xv) if (equal_in_out or act_before_res) else xv
            pad1_ref[:, 1:H + 1, 1:W + 1, :] = src
            if has_sc:
                sc_rows = src.reshape(R, Cp).astype(_BF)
        else:
            # input arrives pre-split into 4 (row-parity, col-parity) planes, so every
            # access below is a unit-stride slice (no gather matmul, no strided loads).
            for hp in (0, 1):
                for wp in (0, 1):
                    pi = 2 * hp + wp
                    xp = x_ref[pi]                              # (B, Ho, Wo, Cp) f32
                    sp = bn1_act(xp) if (equal_in_out or act_before_res) else xp
                    pad1_ref[pi, :, hp:hp + Ho, wp:wp + Wo, :] = sp
                    if pi == 0:              # (even,even) plane == 1x1 stride-2 input
                        sc_rows = sp.reshape(R, Cp).astype(_BF)

        # ---- conv1: build one (R, 9*Cp) im2col buffer, single K = 9*Cp MXU matmul ----
        for t, (dy, dx) in enumerate(_TAPS):
            if stride == 1:
                win = pad1_ref[:, dy:dy + Ho, dx:dx + Wo, :]
            else:
                hp = 0 if dy == 1 else 1
                wp = 0 if dx == 1 else 1
                ro = 1 if dy == 2 else 0
                co = 1 if dx == 2 else 0
                win = pad1_ref[2 * hp + wp, :, ro:ro + Ho, co:co + Wo, :]
            col_ref[:, t * Cp:(t + 1) * Cp] = win.reshape(R, Cp).astype(_BF)
        acc = jnp.dot(col_ref[...], w1_ref[...], preferred_element_type=jnp.float32)

        # ---- BN2 + LeakyReLU fused on the conv1 accumulator ------------------------
        # TODO(synk): F.dropout for drop_rate > 0 not implemented (identity here).
        mid = _lrelu(acc * s2_ref[...] + b2_ref[...])
        pad2_ref[:, 1:Ho + 1, 1:Wo + 1, :] = mid.reshape(B, Ho, Wo, Cp)

        # ---- conv2 im2col + residual added to the single-dot result ----------------
        for t, (dy, dx) in enumerate(_TAPS):
            win = pad2_ref[:, dy:dy + Ho, dx:dx + Wo, :]
            col_ref[:, t * Cp:(t + 1) * Cp] = win.reshape(R, Cp).astype(_BF)
        if equal_in_out:
            res = xv.reshape(R, Cp)                             # identity shortcut (f32)
        else:
            res = jnp.dot(sc_rows, wsc_ref[...], preferred_element_type=jnp.float32)
        out = res + jnp.dot(col_ref[...], w2_ref[...], preferred_element_type=jnp.float32)
        out_ref[...] = out.reshape(B, Ho, Wo, Cp).astype(out_ref.dtype)

    return kernel, (Ho, Wo, Hp1, Wp1, Hp2, Wp2, R)


def _pick_batch_tile(n):
    """Images per grid step: amortize per-step overhead, keep >= 2 steps for megacore."""
    for b in (8, 4, 2):
        if n % b == 0 and n // b >= 2:
            return b
    return 1


def basic_block_pallas(x, p, stride, act_before_res):
    """One fused BasicBlock.  x: (N, H, W, Cp) channel-padded NHWC; p: prepped params."""
    N, H, W, Cp = x.shape
    equal = "wsc" not in p
    if stride not in (1, 2):
        raise NotImplementedError("only stride 1 or 2 supported")
    if equal and stride != 1:
        raise NotImplementedError("identity shortcut with stride != 1")
    if stride == 2 and (H % 2 or W % 2):
        raise NotImplementedError("stride-2 block needs even spatial dims")
    if Cp % 128:
        raise NotImplementedError("channel axis must be padded to the 128-lane width")

    B = _pick_batch_tile(N)
    kernel, (Ho, Wo, Hp1, Wp1, Hp2, Wp2, R) = _make_block_kernel(
        B, H, W, Cp, stride, equal, act_before_res)

    vec_spec = pl.BlockSpec((1, Cp), lambda n: (0, 0))
    w_spec = pl.BlockSpec((9 * Cp, Cp), lambda n: (0, 0))

    if stride == 1:
        x_in = x
        x_spec = pl.BlockSpec((B, H, W, Cp), lambda n: (n, 0, 0, 0))
        pad1 = pltpu.VMEM((B, Hp1, Wp1, Cp), jnp.float32)
    else:
        # 4-way (row, col) parity split done ONCE in XLA; replaces the old 0/1 gather
        # matmul so the strided conv does zero wasted MXU work inside the kernel.
        x_in = jnp.stack([x[:, hp::2, wp::2, :] for hp in (0, 1) for wp in (0, 1)],
                         axis=0)                                  # (4, N, Ho, Wo, Cp)
        x_spec = pl.BlockSpec((4, B, Ho, Wo, Cp), lambda n: (0, n, 0, 0, 0))
        pad1 = pltpu.VMEM((4, B, Hp1, Wp1, Cp), jnp.float32)

    in_specs = [x_spec, vec_spec, vec_spec, w_spec, vec_spec, vec_spec, w_spec]
    inputs = [x_in, p["s1"], p["b1"], p["w1"], p["s2"], p["b2"], p["w2"]]
    if not equal:
        in_specs.append(pl.BlockSpec((Cp, Cp), lambda n: (0, 0)))
        inputs.append(p["wsc"])

    return pl.pallas_call(
        kernel,
        out_shape=jax.ShapeDtypeStruct((N, Ho, Wo, Cp), x.dtype),
        grid=(N // B,),
        in_specs=in_specs,
        out_specs=pl.BlockSpec((B, Ho, Wo, Cp), lambda n: (n, 0, 0, 0)),
        scratch_shapes=[
            pad1,
            pltpu.VMEM((B, Hp2, Wp2, Cp), jnp.float32),
            pltpu.VMEM((R, 9 * Cp), jnp.bfloat16),
        ],
        compiler_params=pltpu.CompilerParams(dimension_semantics=("parallel",)),
    )(*inputs)


# ----------------------------------------------------------------------------
# parameter prep (BN folding + one-time channel padding + bf16 weight layout)
# ----------------------------------------------------------------------------
def _fold_bn(bn, eps=1e-5):
    scale = bn["gamma"] / jnp.sqrt(bn["var"] + eps)
    bias = bn["beta"] - bn["mean"] * scale
    return scale, bias


def _pad_vec(v, Cp):
    return jnp.pad(v, (0, Cp - v.shape[0])).reshape(1, Cp)


def _prep_block_params(p, Cp):
    s1, b1 = _fold_bn(p["bn1"])
    s2, b2 = _fold_bn(p["bn2"])
    cin = p["conv1_w"].shape[2]
    cout = p["conv1_w"].shape[3]
    w1 = jnp.pad(p["conv1_w"], ((0, 0), (0, 0), (0, Cp - cin), (0, Cp - cout)))
    w2 = jnp.pad(p["conv2_w"], ((0, 0), (0, 0), (0, Cp - cout), (0, Cp - cout)))
    out = dict(
        s1=_pad_vec(s1, Cp), b1=_pad_vec(b1, Cp),
        s2=_pad_vec(s2, Cp), b2=_pad_vec(b2, Cp),
        # HWIO flattened to (9*Cp, Cp) for the im2col matmul; stored bf16 (MXU-native,
        # half the weight DMA / VMEM footprint).
        w1=w1.reshape(9 * Cp, Cp).astype(_BF),
        w2=w2.reshape(9 * Cp, Cp).astype(_BF),
    )
    if "shortcut_w" in p:
        out["wsc"] = jnp.pad(p["shortcut_w"],
                             ((0, Cp - cin), (0, Cp - cout))).astype(_BF)
    return out


def network_block_pallas(x_nchw, layer_params, stride, act_before_res, lane=128):
    # layout: NCHW -> NHWC + channel pad ONCE; slice / transpose back ONCE at the end.
    x = jnp.transpose(x_nchw, (0, 2, 3, 1))
    c_max = max(max(p["conv1_w"].shape[2], p["conv1_w"].shape[3]) for p in layer_params)
    Cp = _round_up(c_max, lane)
    x = jnp.pad(x, ((0, 0), (0, 0), (0, 0), (0, Cp - x.shape[-1])))
    for i, p in enumerate(layer_params):
        x = basic_block_pallas(x, _prep_block_params(p, Cp),
                               stride if i == 0 else 1, act_before_res)
    cout = layer_params[-1]["conv2_w"].shape[3]
    return jnp.transpose(x[..., :cout], (0, 3, 1, 2))   # back to PyTorch NCHW


# ----------------------------------------------------------------------------
# pure-JAX reference (correctness check only; identical control flow).
# operand_dtype=None -> full-f32 math; operand_dtype=bf16 -> same matmul-operand
# precision as the kernel (f32 accumulation), for a tight structural check.
# ----------------------------------------------------------------------------
def _ref_bn_act(x, scale, bias):
    y = x * scale + bias
    return jnp.where(y >= 0, y, 0.1 * y)


def _ref_conv(x, w, stride, pad, operand_dtype):
    if operand_dtype is not None:
        x = x.astype(operand_dtype)
        w = w.astype(operand_dtype)
    return jax.lax.conv_general_dilated(
        x, w, (stride, stride), ((pad, pad), (pad, pad)),
        dimension_numbers=("NHWC", "HWIO", "NHWC"),
        preferred_element_type=jnp.float32,
        precision=jax.lax.Precision.HIGHEST)


def _basic_block_ref(x, p, stride, act_before_res, operand_dtype):
    equal = "shortcut_w" not in p
    s1, b1 = _fold_bn(p["bn1"])
    act1 = _ref_bn_act(x, s1, b1)
    h = _ref_conv(act1 if (equal or act_before_res) else x,
                  p["conv1_w"], stride, 1, operand_dtype)
    s2, b2 = _fold_bn(p["bn2"])
    h = _ref_bn_act(h, s2, b2)
    h = _ref_conv(h, p["conv2_w"], 1, 1, operand_dtype)   # drop_rate == 0 -> identity
    if equal:
        res = x
    else:
        sc_in = act1 if act_before_res else x
        wsc = p["shortcut_w"].reshape(1, 1, *p["shortcut_w"].shape)
        res = _ref_conv(sc_in, wsc, stride, 0, operand_dtype)
    return res + h


def network_block_ref(x_nchw, layer_params, stride, act_before_res, operand_dtype=None):
    x = jnp.transpose(x_nchw, (0, 2, 3, 1))
    for i, p in enumerate(layer_params):
        x = _basic_block_ref(x, p, stride if i == 0 else 1, act_before_res, operand_dtype)
    return jnp.transpose(x, (0, 3, 1, 2))


# ----------------------------------------------------------------------------
# deterministic parameter init (synthetic, matches the PyTorch module's shapes)
# ----------------------------------------------------------------------------
def _init_bn(key, c):
    k1, k2, k3, k4 = jax.random.split(key, 4)
    return dict(
        gamma=1.0 + 0.1 * jax.random.normal(k1, (c,), jnp.float32),
        beta=0.1 * jax.random.normal(k2, (c,), jnp.float32),
        mean=0.1 * jax.random.normal(k3, (c,), jnp.float32),
        var=1.0 + 0.1 * jax.random.uniform(k4, (c,), jnp.float32),
    )


def init_network_block_params(key, nb_layers, in_planes, out_planes):
    layers = []
    for i in range(nb_layers):
        cin = in_planes if i == 0 else out_planes
        cout = out_planes
        key, k1, k2, k3, k4, k5 = jax.random.split(key, 6)
        p = dict(
            bn1=_init_bn(k1, cin),
            conv1_w=jax.random.normal(k2, (3, 3, cin, cout), jnp.float32)
            * (2.0 / (9 * cin)) ** 0.5,
            bn2=_init_bn(k3, cout),
            conv2_w=jax.random.normal(k4, (3, 3, cout, cout), jnp.float32)
            * (2.0 / (9 * cout)) ** 0.5,
        )
        if cin != cout:
            p["shortcut_w"] = (
                jax.random.normal(k5, (cin, cout), jnp.float32) * (2.0 / cin) ** 0.5
            )
        layers.append(p)
    return layers


# ----------------------------------------------------------------------------
# main
# ----------------------------------------------------------------------------
if __name__ == "__main__":
    # NetworkBlock(nb_layers=2, in_planes=4, out_planes=8, block=BasicBlock,
    #              stride=2, drop_rate=0.0, activate_before_residual=True)
    nb_layers, in_planes, out_planes, stride = 2, 4, 8, 2
    activate_before_residual = True

    key = jax.random.PRNGKey(0)
    kx, kp = jax.random.split(key)

    N, H, W = 2, 16, 16
    x_nchw = jax.random.normal(kx, (N, in_planes, H, W), jnp.float32)  # PyTorch layout
    params = init_network_block_params(kp, nb_layers, in_planes, out_planes)

    fwd = jax.jit(functools.partial(network_block_pallas, stride=stride,
                                    act_before_res=activate_before_residual))
    y = jax.block_until_ready(fwd(x_nchw, params))
    assert y.shape == (N, out_planes, H // stride, W // stride), y.shape

    # Tight structural check: reference with the same (bf16-operand, f32-accumulate)
    # matmul precision as the kernel.
    y_ref_bf = jax.block_until_ready(
        network_block_ref(x_nchw, params, stride, activate_before_residual,
                          operand_dtype=jnp.bfloat16))
    err_bf = float(jnp.max(jnp.abs(y - y_ref_bf)))
    assert jnp.allclose(y, y_ref_bf, atol=1e-2, rtol=1e-2), err_bf

    # Loose semantic check vs. the full-f32 PyTorch-equivalent reference (bf16 MXU
    # operands introduce ~1e-2-scale deviations, hence the wider tolerance).
    y_ref32 = jax.block_until_ready(
        network_block_ref(x_nchw, params, stride, activate_before_residual))
    err_32 = float(jnp.max(jnp.abs(y - y_ref32)))
    assert err_32 < 0.25, err_32

    print("KERNEL_OK")
</pallas_src>

<mosaic_0001>
module attributes {stable_mosaic.version = 11 : i64} {
  func.func @kernel(%arg0: i32, %arg1: memref<1x8x8x128xf32, #tpu.memory_space<vmem>>, %arg2: memref<1x128xf32, #tpu.memory_space<vmem>>, %arg3: memref<1x128xf32, #tpu.memory_space<vmem>>, %arg4: memref<1152x128xbf16, #tpu.memory_space<vmem>>, %arg5: memref<1x128xf32, #tpu.memory_space<vmem>>, %arg6: memref<1x128xf32, #tpu.memory_space<vmem>>, %arg7: memref<1152x128xbf16, #tpu.memory_space<vmem>>, %arg8: memref<1x8x8x128xf32, #tpu.memory_space<vmem>>, %arg9: memref<1x10x16x128xf32, #tpu.memory_space<vmem>>, %arg10: memref<1x10x16x128xf32, #tpu.memory_space<vmem>>, %arg11: memref<64x1152xbf16, #tpu.memory_space<vmem>>) attributes {dimension_semantics = [#tpu.dimension_semantics<parallel>], iteration_bounds = array<i64: 2>, scalar_prefetch = 0 : i64, scratch_operands = 3 : i64, tpu.core_type = #tpu.core_type<tc>, window_params = [{transform_indices = @transform_0, window_bounds = array<i64: 1, 8, 8, 128>}, {pipeline_mode = #tpu.pipeline_mode<synchronous>, transform_indices = @transform_1, window_bounds = array<i64: 1, 128>}, {pipeline_mode = #tpu.pipeline_mode<synchronous>, transform_indices = @transform_2, window_bounds = array<i64: 1, 128>}, {pipeline_mode = #tpu.pipeline_mode<synchronous>, transform_indices = @transform_3, window_bounds = array<i64: 1152, 128>}, {pipeline_mode = #tpu.pipeline_mode<synchronous>, transform_indices = @transform_4, window_bounds = array<i64: 1, 128>}, {pipeline_mode = #tpu.pipeline_mode<synchronous>, transform_indices = @transform_5, window_bounds = array<i64: 1, 128>}, {pipeline_mode = #tpu.pipeline_mode<synchronous>, transform_indices = @transform_6, window_bounds = array<i64: 1152, 128>}, {transform_indices = @transform_7, window_bounds = array<i64: 1, 8, 8, 128>}]} {
    %cst = arith.constant 0.000000e+00 : f32
    %0 = vector.broadcast %cst : f32 to vector<1x1x16x128xf32>
    %c0 = arith.constant 0 : index
    %c0_0 = arith.constant 0 : index
    %c0_1 = arith.constant 0 : index
    %c0_2 = arith.constant 0 : index
    %1 = vector.load %arg9[%c0, %c0_0, %c0_1, %c0_2] : memref<1x10x16x128xf32, #tpu.memory_space<vmem>>, vector<1x1x16x128xf32>
    tpu.vector_store %arg9[%c0, %c0_0, %c0_1, %c0_2], %0 {strides = array<i32>} : memref<1x10x16x128xf32, #tpu.memory_space<vmem>>, vector<1x1x16x128xf32>,
    %cst_3 = arith.constant 0.000000e+00 : f32
    %2 = vector.broadcast %cst_3 : f32 to vector<1x1x16x128xf32>
    %c0_4 = arith.constant 0 : index
    %c9 = arith.constant 9 : index
    %c0_5 = arith.constant 0 : index
    %c0_6 = arith.constant 0 : index
    %3 = vector.load %arg9[%c0_4, %c9, %c0_5, %c0_6] : memref<1x10x16x128xf32, #tpu.memory_space<vmem>>, vector<1x1x16x128xf32>
    tpu.vector_store %arg9[%c0_4, %c9, %c0_5, %c0_6], %2 {strides = array<i32>} : memref<1x10x16x128xf32, #tpu.memory_space<vmem>>, vector<1x1x16x128xf32>,
    %cst_7 = arith.constant 0.000000e+00 : f32
    %4 = vector.broadcast %cst_7 : f32 to vector<1x10x1x128xf32>
    %c0_8 = arith.constant 0 : index
    %c0_9 = arith.constant 0 : index
    %c0_10 = arith.constant 0 : index
    %c0_11 = arith.constant 0 : index
    %5 = vector.load %arg9[%c0_8, %c0_9, %c0_10, %c0_11] : memref<1x10x16x128xf32, #tpu.memory_space<vmem>>, vector<1x10x1x128xf32>
    tpu.vector_store %arg9[%c0_8, %c0_9, %c0_10, %c0_11], %4 {strides = array<i32>} : memref<1x10x16x128xf32, #tpu.memory_space<vmem>>, vector<1x10x1x128xf32>,
    %cst_12 = arith.constant 0.000000e+00 : f32
    %6 = vector.broadcast %cst_12 : f32 to vector<1x10x1x128xf32>
    %c0_13 = arith.constant 0 : index
    %c0_14 = arith.constant 0 : index
    %c9_15 = arith.constant 9 : index
    %c0_16 = arith.constant 0 : index
    %7 = vector.load %arg9[%c0_13, %c0_14, %c9_15, %c0_16] : memref<1x10x16x128xf32, #tpu.memory_space<vmem>>, vector<1x10x1x128xf32>
    tpu.vector_store %arg9[%c0_13, %c0_14, %c9_15, %c0_16], %6 {strides = array<i32>} : memref<1x10x16x128xf32, #tpu.memory_space<vmem>>, vector<1x10x1x128xf32>,
    %cst_17 = arith.constant 0.000000e+00 : f32
    %8 = vector.broadcast %cst_17 : f32 to vector<1x1x16x128xf32>
    %c0_18 = arith.constant 0 : index
    %c0_19 = arith.constant 0 : index
    %c0_20 = arith.constant 0 : index
    %c0_21 = arith.constant 0 : index
    %9 = vector.load %arg10[%c0_18, %c0_19, %c0_20, %c0_21] : memref<1x10x16x128xf32, #tpu.memory_space<vmem>>, vector<1x1x16x128xf32>
    tpu.vector_store %arg10[%c0_18, %c0_19, %c0_20, %c0_21], %8 {strides = array<i32>} : memref<1x10x16x128xf32, #tpu.memory_space<vmem>>, vector<1x1x16x128xf32>,
    %cst_22 = arith.constant 0.000000e+00 : f32
    %10 = vector.broadcast %cst_22 : f32 to vector<1x1x16x128xf32>
    %c0_23 = arith.constant 0 : index
    %c9_24 = arith.constant 9 : index
    %c0_25 = arith.constant 0 : index
    %c0_26 = arith.constant 0 : index
    %11 = vector.load %arg10[%c0_23, %c9_24, %c0_25, %c0_26] : memref<1x10x16x128xf32, #tpu.memory_space<vmem>>, vector<1x1x16x128xf32>
    tpu.vector_store %arg10[%c0_23, %c9_24, %c0_25, %c0_26], %10 {strides = array<i32>} : memref<1x10x16x128xf32, #tpu.memory_space<vmem>>, vector<1x1x16x128xf32>,
    %cst_27 = arith.constant 0.000000e+00 : f32
    %12 = vector.broadcast %cst_27 : f32 to vector<1x10x1x128xf32>
    %c0_28 = arith.constant 0 : index
    %c0_29 = arith.constant 0 : index
    %c0_30 = arith.constant 0 : index
    %c0_31 = arith.constant 0 : index
    %13 = vector.load %arg10[%c0_28, %c0_29, %c0_30, %c0_31] : memref<1x10x16x128xf32, #tpu.memory_space<vmem>>, vector<1x10x1x128xf32>
    tpu.vector_store %arg10[%c0_28, %c0_29, %c0_30, %c0_31], %12 {strides = array<i32>} : memref<1x10x16x128xf32, #tpu.memory_space<vmem>>, vector<1x10x1x128xf32>,
    %cst_32 = arith.constant 0.000000e+00 : f32
    %14 = vector.broadcast %cst_32 : f32 to vector<1x10x1x128xf32>
    %c0_33 = arith.constant 0 : index
    %c0_34 = arith.constant 0 : index
    %c9_35 = arith.constant 9 : index
    %c0_36 = arith.constant 0 : index
    %15 = vector.load %arg10[%c0_33, %c0_34, %c9_35, %c0_36] : memref<1x10x16x128xf32, #tpu.memory_space<vmem>>, vector<1x10x1x128xf32>
    tpu.vector_store %arg10[%c0_33, %c0_34, %c9_35, %c0_36], %14 {strides = array<i32>} : memref<1x10x16x128xf32, #tpu.memory_space<vmem>>, vector<1x10x1x128xf32>,
    %c0_37 = arith.constant 0 : index
    %c0_38 = arith.constant 0 : index
    %c0_39 = arith.constant 0 : index
    %c0_40 = arith.constant 0 : index
    %16 = vector.load %arg1[%c0_37, %c0_38, %c0_39, %c0_40] : memref<1x8x8x128xf32, #tpu.memory_space<vmem>>, vector<1x8x8x128xf32>
    %c0_41 = arith.constant 0 : index
    %c0_42 = arith.constant 0 : index
    %17 = vector.load %arg2[%c0_41, %c0_42] : memref<1x128xf32, #tpu.memory_space<vmem>>, vector<1x128xf32>
    %18 = vector.shape_cast %17 : vector<1x128xf32> to vector<1x1x1x128xf32>
    %19 = vector.broadcast %18 : vector<1x1x1x128xf32> to vector<1x8x8x128xf32>
    %20 = arith.mulf %16, %19 : vector<1x8x8x128xf32>
    %c0_43 = arith.constant 0 : index
    %c0_44 = arith.constant 0 : index
    %21 = vector.load %arg3[%c0_43, %c0_44] : memref<1x128xf32, #tpu.memory_space<vmem>>, vector<1x128xf32>
    %22 = vector.shape_cast %21 : vector<1x128xf32> to vector<1x1x1x128xf32>
    %23 = vector.broadcast %22 : vector<1x1x1x128xf32> to vector<1x8x8x128xf32>
    %24 = arith.addf %20, %23 : vector<1x8x8x128xf32>
    %cst_45 = arith.constant 0.000000e+00 : f32
    %25 = vector.broadcast %cst_45 : f32 to vector<1x8x8x128xf32>
    %26 = arith.cmpf oge, %24, %25 : vector<1x8x8x128xf32>
    %cst_46 = arith.constant 1.000000e-01 : f32
    %27 = vector.broadcast %cst_46 : f32 to vector<1x8x8x128xf32>
    %28 = arith.mulf %27, %24 : vector<1x8x8x128xf32>
    %29 = arith.select %26, %24, %28 : vector<1x8x8x128xi1>, vector<1x8x8x128xf32>
    %c0_47 = arith.constant 0 : index
    %c1 = arith.constant 1 : index
    %c1_48 = arith.constant 1 : index
    %c0_49 = arith.constant 0 : index
    %30 = vector.load %arg9[%c0_47, %c1, %c1_48, %c0_49] : memref<1x10x16x128xf32, #tpu.memory_space<vmem>>, vector<1x8x8x128xf32>
    tpu.vector_store %arg9[%c0_47, %c1, %c1_48, %c0_49], %29 {strides = array<i32>} : memref<1x10x16x128xf32, #tpu.memory_space<vmem>>, vector<1x8x8x128xf32>,
    %c0_50 = arith.constant 0 : index
    %c0_51 = arith.constant 0 : index
    %c0_52 = arith.constant 0 : index
    %c0_53 = arith.constant 0 : index
    %31 = vector.load %arg9[%c0_50, %c0_51, %c0_52, %c0_53] : memref<1x10x16x128xf32, #tpu.memory_space<vmem>>, vector<1x8x8x128xf32>
    %32 = vector.shape_cast %31 : vector<1x8x8x128xf32> to vector<64x128xf32>
    %33 = arith.truncf %32 : vector<64x128xf32> to vector<64x128xbf16>
    %c0_54 = arith.constant 0 : index
    %c0_55 = arith.constant 0 : index
    %34 = vector.load %arg11[%c0_54, %c0_55] : memref<64x1152xbf16, #tpu.memory_space<vmem>>, vector<64x128xbf16>
    tpu.vector_store %arg11[%c0_54, %c0_55], %33 {strides = array<i32>} : memref<64x1152xbf16, #tpu.memory_space<vmem>>, vector<64x128xbf16>,
    %c0_56 = arith.constant 0 : index
    %c0_57 = arith.constant 0 : index
    %c1_58 = arith.constant 1 : index
    %c0_59 = arith.constant 0 : index
    %35 = vector.load %arg9[%c0_56, %c0_57, %c1_58, %c0_59] : memref<1x10x16x128xf32, #tpu.memory_space<vmem>>, vector<1x8x8x128xf32>
    %36 = vector.shape_cast %35 : vector<1x8x8x128xf32> to vector<64x128xf32>
    %37 = arith.truncf %36 : vector<64x128xf32> to vector<64x128xbf16>
    %c0_60 = arith.constant 0 : index
    %c128 = arith.constant 128 : index
    %38 = vector.load %arg11[%c0_60, %c128] : memref<64x1152xbf16, #tpu.memory_space<vmem>>, vector<64x128xbf16>
    tpu.vector_store %arg11[%c0_60, %c128], %37 {strides = array<i32>} : memref<64x1152xbf16, #tpu.memory_space<vmem>>, vector<64x128xbf16>,
    %c0_61 = arith.constant 0 : index
    %c0_62 = arith.constant 0 : index
    %c2 = arith.constant 2 : index
    %c0_63 = arith.constant 0 : index
    %39 = vector.load %arg9[%c0_61, %c0_62, %c2, %c0_63] : memref<1x10x16x128xf32, #tpu.memory_space<vmem>>, vector<1x8x8x128xf32>
    %40 = vector.shape_cast %39 : vector<1x8x8x128xf32> to vector<64x128xf32>
    %41 = arith.truncf %40 : vector<64x128xf32> to vector<64x128xbf16>
    %c0_64 = arith.constant 0 : index
    %c256 = arith.constant 256 : index
    %42 = vector.load %arg11[%c0_64, %c256] : memref<64x1152xbf16, #tpu.memory_space<vmem>>, vector<64x128xbf16>
    tpu.vector_store %arg11[%c0_64, %c256], %41 {strides = array<i32>} : memref<64x1152xbf16, #tpu.memory_space<vmem>>, vector<64x128xbf16>,
    %c0_65 = arith.constant 0 : index
    %c1_66 = arith.constant 1 : index
    %c0_67 = arith.constant 0 : index
    %c0_68 = arith.constant 0 : index
    %43 = vector.load %arg9[%c0_65, %c1_66, %c0_67, %c0_68] : memref<1x10x16x128xf32, #tpu.memory_space<vmem>>, vector<1x8x8x128xf32>
    %44 = vector.shape_cast %43 : vector<1x8x8x128xf32> to vector<64x128xf32>
    %45 = arith.truncf %44 : vector<64x128xf32> to vector<64x128xbf16>
    %c0_69 = arith.constant 0 : index
    %c384 = arith.constant 384 : index
    %46 = vector.load %arg11[%c0_69, %c384] : memref<64x1152xbf16, #tpu.memory_space<vmem>>, vector<64x128xbf16>
    tpu.vector_store %arg11[%c0_69, %c384], %45 {strides = array<i32>} : memref<64x1152xbf16, #tpu.memory_space<vmem>>, vector<64x128xbf16>,
    %c0_70 = arith.constant 0 : index
    %c1_71 = arith.constant 1 : index
    %c1_72 = arith.constant 1 : index
    %c0_73 = arith.constant 0 : index
    %47 = vector.load %arg9[%c0_70, %c1_71, %c1_72, %c0_73] : memref<1x10x16x128xf32, #tpu.memory_space<vmem>>, vector<1x8x8x128xf32>
    %48 = vector.shape_cast %47 : vector<1x8x8x128xf32> to vector<64x128xf32>
    %49 = arith.truncf %48 : vector<64x128xf32> to vector<64x128xbf16>
    %c0_74 = arith.constant 0 : index
    %c512 = arith.constant 512 : index
    %50 = vector.load %arg11[%c0_74, %c512] : memref<64x1152xbf16, #tpu.memory_space<vmem>>, vector<64x128xbf16>
    tpu.vector_store %arg11[%c0_74, %c512], %49 {strides = array<i32>} : memref<64x1152xbf16, #tpu.memory_space<vmem>>, vector<64x128xbf16>,
    %c0_75 = arith.constant 0 : index
    %c1_76 = arith.constant 1 : index
    %c2_77 = arith.constant 2 : index
    %c0_78 = arith.constant 0 : index
    %51 = vector.load %arg9[%c0_75, %c1_76, %c2_77, %c0_78] : memref<1x10x16x128xf32, #tpu.memory_space<vmem>>, vector<1x8x8x128xf32>
    %52 = vector.shape_cast %51 : vector<1x8x8x128xf32> to vector<64x128xf32>
    %53 = arith.truncf %52 : vector<64x128xf32> to vector<64x128xbf16>
    %c0_79 = arith.constant 0 : index
    %c640 = arith.constant 640 : index
    %54 = vector.load %arg11[%c0_79, %c640] : memref<64x1152xbf16, #tpu.memory_space<vmem>>, vector<64x128xbf16>
    tpu.vector_store %arg11[%c0_79, %c640], %53 {strides = array<i32>} : memref<64x1152xbf16, #tpu.memory_space<vmem>>, vector<64x128xbf16>,
    %c0_80 = arith.constant 0 : index
    %c2_81 = arith.constant 2 : index
    %c0_82 = arith.constant 0 : index
    %c0_83 = arith.constant 0 : index
    %55 = vector.load %arg9[%c0_80, %c2_81, %c0_82, %c0_83] : memref<1x10x16x128xf32, #tpu.memory_space<vmem>>, vector<1x8x8x128xf32>
    %56 = vector.shape_cast %55 : vector<1x8x8x128xf32> to vector<64x128xf32>
    %57 = arith.truncf %56 : vector<64x128xf32> to vector<64x128xbf16>
    %c0_84 = arith.constant 0 : index
    %c768 = arith.constant 768 : index
    %58 = vector.load %arg11[%c0_84, %c768] : memref<64x1152xbf16, #tpu.memory_space<vmem>>, vector<64x128xbf16>
    tpu.vector_store %arg11[%c0_84, %c768], %57 {strides = array<i32>} : memref<64x1152xbf16, #tpu.memory_space<vmem>>, vector<64x128xbf16>,
    %c0_85 = arith.constant 0 : index
    %c2_86 = arith.constant 2 : index
    %c1_87 = arith.constant 1 : index
    %c0_88 = arith.constant 0 : index
    %59 = vector.load %arg9[%c0_85, %c2_86, %c1_87, %c0_88] : memref<1x10x16x128xf32, #tpu.memory_space<vmem>>, vector<1x8x8x128xf32>
    %60 = vector.shape_cast %59 : vector<1x8x8x128xf32> to vector<64x128xf32>
    %61 = arith.truncf %60 : vector<64x128xf32> to vector<64x128xbf16>
    %c0_89 = arith.constant 0 : index
    %c896 = arith.constant 896 : index
    %62 = vector.load %arg11[%c0_89, %c896] : memref<64x1152xbf16, #tpu.memory_space<vmem>>, vector<64x128xbf16>
    tpu.vector_store %arg11[%c0_89, %c896], %61 {strides = array<i32>} : memref<64x1152xbf16, #tpu.memory_space<vmem>>, vector<64x128xbf16>,
    %c0_90 = arith.constant 0 : index
    %c2_91 = arith.constant 2 : index
    %c2_92 = arith.constant 2 : index
    %c0_93 = arith.constant 0 : index
    %63 = vector.load %arg9[%c0_90, %c2_91, %c2_92, %c0_93] : memref<1x10x16x128xf32, #tpu.memory_space<vmem>>, vector<1x8x8x128xf32>
    %64 = vector.shape_cast %63 : vector<1x8x8x128xf32> to vector<64x128xf32>
    %65 = arith.truncf %64 : vector<64x128xf32> to vector<64x128xbf16>
    %c0_94 = arith.constant 0 : index
    %c1024 = arith.constant 1024 : index
    %66 = vector.load %arg11[%c0_94, %c1024] : memref<64x1152xbf16, #tpu.memory_space<vmem>>, vector<64x128xbf16>
    tpu.vector_store %arg11[%c0_94, %c1024], %65 {strides = array<i32>} : memref<64x1152xbf16, #tpu.memory_space<vmem>>, vector<64x128xbf16>,
    %c0_95 = arith.constant 0 : index
    %c0_96 = arith.constant 0 : index
    %67 = vector.load %arg11[%c0_95, %c0_96] : memref<64x1152xbf16, #tpu.memory_space<vmem>>, vector<64x1152xbf16>
    %c0_97 = arith.constant 0 : index
    %c0_98 = arith.constant 0 : index
    %68 = vector.load %arg4[%c0_97, %c0_98] : memref<1152x128xbf16, #tpu.memory_space<vmem>>, vector<1152x128xbf16>
    %cst_99 = arith.constant dense<0.000000e+00> : vector<64x128xf32>
    %69 = tpu.matmul %67, %68, %cst_99 {dimension_numbers = #tpu.dot_dimension_numbers<[1], [0], [0], [1], [0, 0, 1, 1], [], []>} : vector<64x1152xbf16>, vector<1152x128xbf16>, vector<64x128xf32> -> vector<64x128xf32>
    %c0_100 = arith.constant 0 : index
    %c0_101 = arith.constant 0 : index
    %70 = vector.load %arg5[%c0_100, %c0_101] : memref<1x128xf32, #tpu.memory_space<vmem>>, vector<1x128xf32>
    %71 = vector.broadcast %70 : vector<1x128xf32> to vector<64x128xf32>
    %72 = arith.mulf %69, %71 : vector<64x128xf32>
    %c0_102 = arith.constant 0 : index
    %c0_103 = arith.constant 0 : index
    %73 = vector.load %arg6[%c0_102, %c0_103] : memref<1x128xf32, #tpu.memory_space<vmem>>, vector<1x128xf32>
    %74 = vector.broadcast %73 : vector<1x128xf32> to vector<64x128xf32>
    %75 = arith.addf %72, %74 : vector<64x128xf32>
    %cst_104 = arith.constant 0.000000e+00 : f32
    %76 = vector.broadcast %cst_104 : f32 to vector<64x128xf32>
    %77 = arith.cmpf oge, %75, %76 : vector<64x128xf32>
    %cst_105 = arith.constant 1.000000e-01 : f32
    %78 = vector.broadcast %cst_105 : f32 to vector<64x128xf32>
    %79 = arith.mulf %78, %75 : vector<64x128xf32>
    %80 = arith.select %77, %75, %79 : vector<64x128xi1>, vector<64x128xf32>
    %81 = vector.shape_cast %80 : vector<64x128xf32> to vector<1x8x8x128xf32>
    %c0_106 = arith.constant 0 : index
    %c1_107 = arith.constant 1 : index
    %c1_108 = arith.constant 1 : index
    %c0_109 = arith.constant 0 : index
    %82 = vector.load %arg10[%c0_106, %c1_107, %c1_108, %c0_109] : memref<1x10x16x128xf32, #tpu.memory_space<vmem>>, vector<1x8x8x128xf32>
    tpu.vector_store %arg10[%c0_106, %c1_107, %c1_108, %c0_109], %81 {strides = array<i32>} : memref<1x10x16x128xf32, #tpu.memory_space<vmem>>, vector<1x8x8x128xf32>,
    %c0_110 = arith.constant 0 : index
    %c0_111 = arith.constant 0 : index
    %c0_112 = arith.constant 0 : index
    %c0_113 = arith.constant 0 : index
    %83 = vector.load %arg10[%c0_110, %c0_111, %c0_112, %c0_113] : memref<1x10x16x128xf32, #tpu.memory_space<vmem>>, vector<1x8x8x128xf32>
    %84 = vector.shape_cast %83 : vector<1x8x8x128xf32> to vector<64x128xf32>
    %85 = arith.truncf %84 : vector<64x128xf32> to vector<64x128xbf16>
    %c0_114 = arith.constant 0 : index
    %c0_115 = arith.constant 0 : index
    %86 = vector.load %arg11[%c0_114, %c0_115] : memref<64x1152xbf16, #tpu.memory_space<vmem>>, vector<64x128xbf16>
    tpu.vector_store %arg11[%c0_114, %c0_115], %85 {strides = array<i32>} : memref<64x1152xbf16, #tpu.memory_space<vmem>>, vector<64x128xbf16>,
    %c0_116 = arith.constant 0 : index
    %c0_117 = arith.constant 0 : index
    %c1_118 = arith.constant 1 : index
    %c0_119 = arith.constant 0 : index
    %87 = vector.load %arg10[%c0_116, %c0_117, %c1_118, %c0_119] : memref<1x10x16x128xf32, #tpu.memory_space<vmem>>, vector<1x8x8x128xf32>
    %88 = vector.shape_cast %87 : vector<1x8x8x128xf32> to vector<64x128xf32>
    %89 = arith.truncf %88 : vector<64x128xf32> to vector<64x128xbf16>
    %c0_120 = arith.constant 0 : index
    %c128_121 = arith.constant 128 : index
    %90 = vector.load %arg11[%c0_120, %c128_121] : memref<64x1152xbf16, #tpu.memory_space<vmem>>, vector<64x128xbf16>
    tpu.vector_store %arg11[%c0_120, %c128_121], %89 {strides = array<i32>} : memref<64x1152xbf16, #tpu.memory_space<vmem>>, vector<64x128xbf16>,
    %c0_122 = arith.constant 0 : index
    %c0_123 = arith.constant 0 : index
    %c2_124 = arith.constant 2 : index
    %c0_125 = arith.constant 0 : index
    %91 = vector.load %arg10[%c0_122, %c0_123, %c2_124, %c0_125] : memref<1x10x16x128xf32, #tpu.memory_space<vmem>>, vector<1x8x8x128xf32>
    %92 = vector.shape_cast %91 : vector<1x8x8x128xf32> to vector<64x128xf32>
    %93 = arith.truncf %92 : vector<64x128xf32> to vector<64x128xbf16>
    %c0_126 = arith.constant 0 : index
    %c256_127 = arith.constant 256 : index
    %94 = vector.load %arg11[%c0_126, %c256_127] : memref<64x1152xbf16, #tpu.memory_space<vmem>>, vector<64x128xbf16>
    tpu.vector_store %arg11[%c0_126, %c256_127], %93 {strides = array<i32>} : memref<64x1152xbf16, #tpu.memory_space<vmem>>, vector<64x128xbf16>,
    %c0_128 = arith.constant 0 : index
    %c1_129 = arith.constant 1 : index
    %c0_130 = arith.constant 0 : index
    %c0_131 = arith.constant 0 : index
    %95 = vector.load %arg10[%c0_128, %c1_129, %c0_130, %c0_131] : memref<1x10x16x128xf32, #tpu.memory_space<vmem>>, vector<1x8x8x128xf32>
    %96 = vector.shape_cast %95 : vector<1x8x8x128xf32> to vector<64x128xf32>
    %97 = arith.truncf %96 : vector<64x128xf32> to vector<64x128xbf16>
    %c0_132 = arith.constant 0 : index
    %c384_133 = arith.constant 384 : index
    %98 = vector.load %arg11[%c0_132, %c384_133] : memref<64x1152xbf16, #tpu.memory_space<vmem>>, vector<64x128xbf16>
    tpu.vector_store %arg11[%c0_132, %c384_133], %97 {strides = array<i32>} : memref<64x1152xbf16, #tpu.memory_space<vmem>>, vector<64x128xbf16>,
    %c0_134 = arith.constant 0 : index
    %c1_135 = arith.constant 1 : index
    %c1_136 = arith.constant 1 : index
    %c0_137 = arith.constant 0 : index
    %99 = vector.load %arg10[%c0_134, %c1_135, %c1_136, %c0_137] : memref<1x10x16x128xf32, #tpu.memory_space<vmem>>, vector<1x8x8x128xf32>
    %100 = vector.shape_cast %99 : vector<1x8x8x128xf32> to vector<64x128xf32>
    %101 = arith.truncf %100 : vector<64x128xf32> to vector<64x128xbf16>
    %c0_138 = arith.constant 0 : index
    %c512_139 = arith.constant 512 : index
    %102 = vector.load %arg11[%c0_138, %c512_139] : memref<64x1152xbf16, #tpu.memory_space<vmem>>, vector<64x128xbf16>
    tpu.vector_store %arg11[%c0_138, %c512_139], %101 {strides = array<i32>} : memref<64x1152xbf16, #tpu.memory_space<vmem>>, vector<64x128xbf16>,
    %c0_140 = arith.constant 0 : index
    %c1_141 = arith.constant 1 : index
    %c2_142 = arith.constant 2 : index
    %c0_143 = arith.constant 0 : index
    %103 = vector.load %arg10[%c0_140, %c1_141, %c2_142, %c0_143] : memref<1x10x16x128xf32, #tpu.memory_space<vmem>>, vector<1x8x8x128xf32>
    %104 = vector.shape_cast %103 : vector<1x8x8x128xf32> to vector<64x128xf32>
    %105 = arith.truncf %104 : vector<64x128xf32> to vector<64x128xbf16>
    %c0_144 = arith.constant 0 : index
    %c640_145 = arith.constant 640 : index
    %106 = vector.load %arg11[%c0_144, %c640_145] : memref<64x1152xbf16, #tpu.memory_space<vmem>>, vector<64x128xbf16>
    tpu.vector_store %arg11[%c0_144, %c640_145], %105 {strides = array<i32>} : memref<64x1152xbf16, #tpu.memory_space<vmem>>, vector<64x128xbf16>,
    %c0_146 = arith.constant 0 : index
    %c2_147 = arith.constant 2 : index
    %c0_148 = arith.constant 0 : index
    %c0_149 = arith.constant 0 : index
    %107 = vector.load %arg10[%c0_146, %c2_147, %c0_148, %c0_149] : memref<1x10x16x128xf32, #tpu.memory_space<vmem>>, vector<1x8x8x128xf32>
    %108 = vector.shape_cast %107 : vector<1x8x8x128xf32> to vector<64x128xf32>
    %109 = arith.truncf %108 : vector<64x128xf32> to vector<64x128xbf16>
    %c0_150 = arith.constant 0 : index
    %c768_151 = arith.constant 768 : index
    %110 = vector.load %arg11[%c0_150, %c768_151] : memref<64x1152xbf16, #tpu.memory_space<vmem>>, vector<64x128xbf16>
    tpu.vector_store %arg11[%c0_150, %c768_151], %109 {strides = array<i32>} : memref<64x1152xbf16, #tpu.memory_space<vmem>>, vector<64x128xbf16>,
    %c0_152 = arith.constant 0 : index
    %c2_153 = arith.constant 2 : index
    %c1_154 = arith.constant 1 : index
    %c0_155 = arith.constant 0 : index
    %111 = vector.load %arg10[%c0_152, %c2_153, %c1_154, %c0_155] : memref<1x10x16x128xf32, #tpu.memory_space<vmem>>, vector<1x8x8x128xf32>
    %112 = vector.shape_cast %111 : vector<1x8x8x128xf32> to vector<64x128xf32>
    %113 = arith.truncf %112 : vector<64x128xf32> to vector<64x128xbf16>
    %c0_156 = arith.constant 0 : index
    %c896_157 = arith.constant 896 : index
    %114 = vector.load %arg11[%c0_156, %c896_157] : memref<64x1152xbf16, #tpu.memory_space<vmem>>, vector<64x128xbf16>
    tpu.vector_store %arg11[%c0_156, %c896_157], %113 {strides = array<i32>} : memref<64x1152xbf16, #tpu.memory_space<vmem>>, vector<64x128xbf16>,
    %c0_158 = arith.constant 0 : index
    %c2_159 = arith.constant 2 : index
    %c2_160 = arith.constant 2 : index
    %c0_161 = arith.constant 0 : index
    %115 = vector.load %arg10[%c0_158, %c2_159, %c2_160, %c0_161] : memref<1x10x16x128xf32, #tpu.memory_space<vmem>>, vector<1x8x8x128xf32>
    %116 = vector.shape_cast %115 : vector<1x8x8x128xf32> to vector<64x128xf32>
    %117 = arith.truncf %116 : vector<64x128xf32> to vector<64x128xbf16>
    %c0_162 = arith.constant 0 : index
    %c1024_163 = arith.constant 1024 : index
    %118 = vector.load %arg11[%c0_162, %c1024_163] : memref<64x1152xbf16, #tpu.memory_space<vmem>>, vector<64x128xbf16>
    tpu.vector_store %arg11[%c0_162, %c1024_163], %117 {strides = array<i32>} : memref<64x1152xbf16, #tpu.memory_space<vmem>>, vector<64x128xbf16>,
    %119 = vector.shape_cast %16 : vector<1x8x8x128xf32> to vector<64x128xf32>
    %c0_164 = arith.constant 0 : index
    %c0_165 = arith.constant 0 : index
    %120 = vector.load %arg11[%c0_164, %c0_165] : memref<64x1152xbf16, #tpu.memory_space<vmem>>, vector<64x1152xbf16>
    %c0_166 = arith.constant 0 : index
    %c0_167 = arith.constant 0 : index
    %121 = vector.load %arg7[%c0_166, %c0_167] : memref<1152x128xbf16, #tpu.memory_space<vmem>>, vector<1152x128xbf16>
    %cst_168 = arith.constant dense<0.000000e+00> : vector<64x128xf32>
    %122 = tpu.matmul %120, %121, %cst_168 {dimension_numbers = #tpu.dot_dimension_numbers<[1], [0], [0], [1], [0, 0, 1, 1], [], []>} : vector<64x1152xbf16>, vector<1152x128xbf16>, vector<64x128xf32> -> vector<64x128xf32>
    %123 = arith.addf %119, %122 : vector<64x128xf32>
    %124 = vector.shape_cast %123 : vector<64x128xf32> to vector<1x8x8x128xf32>
    %c0_169 = arith.constant 0 : index
    %c0_170 = arith.constant 0 : index
    %c0_171 = arith.constant 0 : index
    %c0_172 = arith.constant 0 : index
    %125 = vector.load %arg8[%c0_169, %c0_170, %c0_171, %c0_172] : memref<1x8x8x128xf32, #tpu.memory_space<vmem>>, vector<1x8x8x128xf32>
    tpu.vector_store %arg8[%c0_169, %c0_170, %c0_171, %c0_172], %124 {strides = array<i32>} : memref<1x8x8x128xf32, #tpu.memory_space<vmem>>, vector<1x8x8x128xf32>,
    return
  }
  func.func @transform_0(%arg0: i32) -> (i32, i32, i32, i32) {
    %c0_i32 = arith.constant 0 : i32
    %c0_i32_0 = arith.constant 0 : i32
    %c0_i32_1 = arith.constant 0 : i32
    %c0_i32_2 = arith.constant 0 : i32
    return %arg0, %c0_i32, %c0_i32_0, %c0_i32_1 : i32, i32, i32, i32
  }
  func.func @transform_1(%arg0: i32) -> (i32, i32) {
    %c0_i32 = arith.constant 0 : i32
    %c0_i32_0 = arith.constant 0 : i32
    %c0_i32_1 = arith.constant 0 : i32
    return %c0_i32, %c0_i32_0 : i32, i32
  }
  func.func @transform_2(%arg0: i32) -> (i32, i32) {
    %c0_i32 = arith.constant 0 : i32
    %c0_i32_0 = arith.constant 0 : i32
    %c0_i32_1 = arith.constant 0 : i32
    return %c0_i32, %c0_i32_0 : i32, i32
  }
  func.func @transform_3(%arg0: i32) -> (i32, i32) {
    %c0_i32 = arith.constant 0 : i32
    %c0_i32_0 = arith.constant 0 : i32
    %c0_i32_1 = arith.constant 0 : i32
    return %c0_i32, %c0_i32_0 : i32, i32
  }
  func.func @transform_4(%arg0: i32) -> (i32, i32) {
    %c0_i32 = arith.constant 0 : i32
    %c0_i32_0 = arith.constant 0 : i32
    %c0_i32_1 = arith.constant 0 : i32
    return %c0_i32, %c0_i32_0 : i32, i32
  }
  func.func @transform_5(%arg0: i32) -> (i32, i32) {
    %c0_i32 = arith.constant 0 : i32
    %c0_i32_0 = arith.constant 0 : i32
    %c0_i32_1 = arith.constant 0 : i32
    return %c0_i32, %c0_i32_0 : i32, i32
  }
  func.func @transform_6(%arg0: i32) -> (i32, i32) {
    %c0_i32 = arith.constant 0 : i32
    %c0_i32_0 = arith.constant 0 : i32
    %c0_i32_1 = arith.constant 0 : i32
    return %c0_i32, %c0_i32_0 : i32, i32
  }
  func.func @transform_7(%arg0: i32) -> (i32, i32, i32, i32) {
    %c0_i32 = arith.constant 0 : i32
    %c0_i32_0 = arith.constant 0 : i32
    %c0_i32_1 = arith.constant 0 : i32
    %c0_i32_2 = arith.constant 0 : i32
    return %arg0, %c0_i32, %c0_i32_0, %c0_i32_1 : i32, i32, i32, i32
  }
}

module attributes {stable_mosaic.version = 11 : i64} {
  func.func @kernel(%arg0: i32, %arg1: memref<4x1x8x8x128xf32, #tpu.memory_space<vmem>>, %arg2: memref<1x128xf32, #tpu.memory_space<vmem>>, %arg3: memref<1x128xf32, #tpu.memory_space<vmem>>, %arg4: memref<1152x128xbf16, #tpu.memory_space<vmem>>, %arg5: memref<1x128xf32, #tpu.memory_space<vmem>>, %arg6: memref<1x128xf32, #tpu.memory_space<vmem>>, %arg7: memref<1152x128xbf16, #tpu.memory_space<vmem>>, %arg8: memref<128x128xbf16, #tpu.memory_space<vmem>>, %arg9: memref<1x8x8x128xf32, #tpu.memory_space<vmem>>, %arg10: memref<4x1x9x16x128xf32, #tpu.memory_space<vmem>>, %arg11: memref<1x10x16x128xf32, #tpu.memory_space<vmem>>, %arg12: memref<64x1152xbf16, #tpu.memory_space<vmem>>) attributes {dimension_semantics = [#tpu.dimension_semantics<parallel>], iteration_bounds = array<i64: 2>, scalar_prefetch = 0 : i64, scratch_operands = 3 : i64, tpu.core_type = #tpu.core_type<tc>, window_params = [{transform_indices = @transform_0, window_bounds = array<i64: 4, 1, 8, 8, 128>}, {pipeline_mode = #tpu.pipeline_mode<synchronous>, transform_indices = @transform_1, window_bounds = array<i64: 1, 128>}, {pipeline_mode = #tpu.pipeline_mode<synchronous>, transform_indices = @transform_2, window_bounds = array<i64: 1, 128>}, {pipeline_mode = #tpu.pipeline_mode<synchronous>, transform_indices = @transform_3, window_bounds = array<i64: 1152, 128>}, {pipeline_mode = #tpu.pipeline_mode<synchronous>, transform_indices = @transform_4, window_bounds = array<i64: 1, 128>}, {pipeline_mode = #tpu.pipeline_mode<synchronous>, transform_indices = @transform_5, window_bounds = array<i64: 1, 128>}, {pipeline_mode = #tpu.pipeline_mode<synchronous>, transform_indices = @transform_6, window_bounds = array<i64: 1152, 128>}, {pipeline_mode = #tpu.pipeline_mode<synchronous>, transform_indices = @transform_7, window_bounds = array<i64: 128, 128>}, {transform_indices = @transform_8, window_bounds = array<i64: 1, 8, 8, 128>}]} {
    %cst = arith.constant 0.000000e+00 : f32
    %0 = vector.broadcast %cst : f32 to vector<1x1x16x128xf32>
    %c2 = arith.constant 2 : index
    %c0 = arith.constant 0 : index
    %c0_0 = arith.constant 0 : index
    %c0_1 = arith.constant 0 : index
    %c0_2 = arith.constant 0 : index
    %1 = vector.load %arg10[%c2, %c0, %c0_0, %c0_1, %c0_2] : memref<4x1x9x16x128xf32, #tpu.memory_space<vmem>>, vector<1x1x1x16x128xf32>
    %2 = vector.shape_cast %1 : vector<1x1x1x16x128xf32> to vector<1x1x16x128xf32>
    %3 = vector.shape_cast %0 : vector<1x1x16x128xf32> to vector<1x1x1x16x128xf32>
    tpu.vector_store %arg10[%c2, %c0, %c0_0, %c0_1, %c0_2], %3 {strides = array<i32>} : memref<4x1x9x16x128xf32, #tpu.memory_space<vmem>>, vector<1x1x1x16x128xf32>,
    %cst_3 = arith.constant 0.000000e+00 : f32
    %4 = vector.broadcast %cst_3 : f32 to vector<1x1x16x128xf32>
    %c3 = arith.constant 3 : index
    %c0_4 = arith.constant 0 : index
    %c0_5 = arith.constant 0 : index
    %c0_6 = arith.constant 0 : index
    %c0_7 = arith.constant 0 : index
    %5 = vector.load %arg10[%c3, %c0_4, %c0_5, %c0_6, %c0_7] : memref<4x1x9x16x128xf32, #tpu.memory_space<vmem>>, vector<1x1x1x16x128xf32>
    %6 = vector.shape_cast %5 : vector<1x1x1x16x128xf32> to vector<1x1x16x128xf32>
    %7 = vector.shape_cast %4 : vector<1x1x16x128xf32> to vector<1x1x1x16x128xf32>
    tpu.vector_store %arg10[%c3, %c0_4, %c0_5, %c0_6, %c0_7], %7 {strides = array<i32>} : memref<4x1x9x16x128xf32, #tpu.memory_space<vmem>>, vector<1x1x1x16x128xf32>,
    %cst_8 = arith.constant 0.000000e+00 : f32
    %8 = vector.broadcast %cst_8 : f32 to vector<1x9x1x128xf32>
    %c1 = arith.constant 1 : index
    %c0_9 = arith.constant 0 : index
    %c0_10 = arith.constant 0 : index
    %c0_11 = arith.constant 0 : index
    %c0_12 = arith.constant 0 : index
    %9 = vector.load %arg10[%c1, %c0_9, %c0_10, %c0_11, %c0_12] : memref<4x1x9x16x128xf32, #tpu.memory_space<vmem>>, vector<1x1x9x1x128xf32>
    %10 = vector.shape_cast %9 : vector<1x1x9x1x128xf32> to vector<1x9x1x128xf32>
    %11 = vector.shape_cast %8 : vector<1x9x1x128xf32> to vector<1x1x9x1x128xf32>
    tpu.vector_store %arg10[%c1, %c0_9, %c0_10, %c0_11, %c0_12], %11 {strides = array<i32>} : memref<4x1x9x16x128xf32, #tpu.memory_space<vmem>>, vector<1x1x9x1x128xf32>,
    %cst_13 = arith.constant 0.000000e+00 : f32
    %12 = vector.broadcast %cst_13 : f32 to vector<1x9x1x128xf32>
    %c3_14 = arith.constant 3 : index
    %c0_15 = arith.constant 0 : index
    %c0_16 = arith.constant 0 : index
    %c0_17 = arith.constant 0 : index
    %c0_18 = arith.constant 0 : index
    %13 = vector.load %arg10[%c3_14, %c0_15, %c0_16, %c0_17, %c0_18] : memref<4x1x9x16x128xf32, #tpu.memory_space<vmem>>, vector<1x1x9x1x128xf32>
    %14 = vector.shape_cast %13 : vector<1x1x9x1x128xf32> to vector<1x9x1x128xf32>
    %15 = vector.shape_cast %12 : vector<1x9x1x128xf32> to vector<1x1x9x1x128xf32>
    tpu.vector_store %arg10[%c3_14, %c0_15, %c0_16, %c0_17, %c0_18], %15 {strides = array<i32>} : memref<4x1x9x16x128xf32, #tpu.memory_space<vmem>>, vector<1x1x9x1x128xf32>,
    %cst_19 = arith.constant 0.000000e+00 : f32
    %16 = vector.broadcast %cst_19 : f32 to vector<1x1x16x128xf32>
    %c0_20 = arith.constant 0 : index
    %c0_21 = arith.constant 0 : index
    %c0_22 = arith.constant 0 : index
    %c0_23 = arith.constant 0 : index
    %17 = vector.load %arg11[%c0_20, %c0_21, %c0_22, %c0_23] : memref<1x10x16x128xf32, #tpu.memory_space<vmem>>, vector<1x1x16x128xf32>
    tpu.vector_store %arg11[%c0_20, %c0_21, %c0_22, %c0_23], %16 {strides = array<i32>} : memref<1x10x16x128xf32, #tpu.memory_space<vmem>>, vector<1x1x16x128xf32>,
    %cst_24 = arith.constant 0.000000e+00 : f32
    %18 = vector.broadcast %cst_24 : f32 to vector<1x1x16x128xf32>
    %c0_25 = arith.constant 0 : index
    %c9 = arith.constant 9 : index
    %c0_26 = arith.constant 0 : index
    %c0_27 = arith.constant 0 : index
    %19 = vector.load %arg11[%c0_25, %c9, %c0_26, %c0_27] : memref<1x10x16x128xf32, #tpu.memory_space<vmem>>, vector<1x1x16x128xf32>
    tpu.vector_store %arg11[%c0_25, %c9, %c0_26, %c0_27], %18 {strides = array<i32>} : memref<1x10x16x128xf32, #tpu.memory_space<vmem>>, vector<1x1x16x128xf32>,
    %cst_28 = arith.constant 0.000000e+00 : f32
    %20 = vector.broadcast %cst_28 : f32 to vector<1x10x1x128xf32>
    %c0_29 = arith.constant 0 : index
    %c0_30 = arith.constant 0 : index
    %c0_31 = arith.constant 0 : index
    %c0_32 = arith.constant 0 : index
    %21 = vector.load %arg11[%c0_29, %c0_30, %c0_31, %c0_32] : memref<1x10x16x128xf32, #tpu.memory_space<vmem>>, vector<1x10x1x128xf32>
    tpu.vector_store %arg11[%c0_29, %c0_30, %c0_31, %c0_32], %20 {strides = array<i32>} : memref<1x10x16x128xf32, #tpu.memory_space<vmem>>, vector<1x10x1x128xf32>,
    %cst_33 = arith.constant 0.000000e+00 : f32
    %22 = vector.broadcast %cst_33 : f32 to vector<1x10x1x128xf32>
    %c0_34 = arith.constant 0 : index
    %c0_35 = arith.constant 0 : index
    %c9_36 = arith.constant 9 : index
    %c0_37 = arith.constant 0 : index
    %23 = vector.load %arg11[%c0_34, %c0_35, %c9_36, %c0_37] : memref<1x10x16x128xf32, #tpu.memory_space<vmem>>, vector<1x10x1x128xf32>
    tpu.vector_store %arg11[%c0_34, %c0_35, %c9_36, %c0_37], %22 {strides = array<i32>} : memref<1x10x16x128xf32, #tpu.memory_space<vmem>>, vector<1x10x1x128xf32>,
    %c0_38 = arith.constant 0 : index
    %c0_39 = arith.constant 0 : index
    %c0_40 = arith.constant 0 : index
    %c0_41 = arith.constant 0 : index
    %c0_42 = arith.constant 0 : index
    %24 = vector.load %arg1[%c0_38, %c0_39, %c0_40, %c0_41, %c0_42] : memref<4x1x8x8x128xf32, #tpu.memory_space<vmem>>, vector<1x1x8x8x128xf32>
    %25 = vector.shape_cast %24 : vector<1x1x8x8x128xf32> to vector<1x8x8x128xf32>
    %c0_43 = arith.constant 0 : index
    %c0_44 = arith.constant 0 : index
    %26 = vector.load %arg2[%c0_43, %c0_44] : memref<1x128xf32, #tpu.memory_space<vmem>>, vector<1x128xf32>
    %27 = vector.shape_cast %26 : vector<1x128xf32> to vector<1x1x1x128xf32>
    %28 = vector.broadcast %27 : vector<1x1x1x128xf32> to vector<1x8x8x128xf32>
    %29 = arith.mulf %25, %28 : vector<1x8x8x128xf32>
    %c0_45 = arith.constant 0 : index
    %c0_46 = arith.constant 0 : index
    %30 = vector.load %arg3[%c0_45, %c0_46] : memref<1x128xf32, #tpu.memory_space<vmem>>, vector<1x128xf32>
    %31 = vector.shape_cast %30 : vector<1x128xf32> to vector<1x1x1x128xf32>
    %32 = vector.broadcast %31 : vector<1x1x1x128xf32> to vector<1x8x8x128xf32>
    %33 = arith.addf %29, %32 : vector<1x8x8x128xf32>
    %cst_47 = arith.constant 0.000000e+00 : f32
    %34 = vector.broadcast %cst_47 : f32 to vector<1x8x8x128xf32>
    %35 = arith.cmpf oge, %33, %34 : vector<1x8x8x128xf32>
    %cst_48 = arith.constant 1.000000e-01 : f32
    %36 = vector.broadcast %cst_48 : f32 to vector<1x8x8x128xf32>
    %37 = arith.mulf %36, %33 : vector<1x8x8x128xf32>
    %38 = arith.select %35, %33, %37 : vector<1x8x8x128xi1>, vector<1x8x8x128xf32>
    %c0_49 = arith.constant 0 : index
    %c0_50 = arith.constant 0 : index
    %c0_51 = arith.constant 0 : index
    %c0_52 = arith.constant 0 : index
    %c0_53 = arith.constant 0 : index
    %39 = vector.load %arg10[%c0_49, %c0_50, %c0_51, %c0_52, %c0_53] : memref<4x1x9x16x128xf32, #tpu.memory_space<vmem>>, vector<1x1x8x8x128xf32>
    %40 = vector.shape_cast %39 : vector<1x1x8x8x128xf32> to vector<1x8x8x128xf32>
    %41 = vector.shape_cast %38 : vector<1x8x8x128xf32> to vector<1x1x8x8x128xf32>
    tpu.vector_store %arg10[%c0_49, %c0_50, %c0_51, %c0_52, %c0_53], %41 {strides = array<i32>} : memref<4x1x9x16x128xf32, #tpu.memory_space<vmem>>, vector<1x1x8x8x128xf32>,
    %42 = vector.shape_cast %38 : vector<1x8x8x128xf32> to vector<64x128xf32>
    %43 = arith.truncf %42 : vector<64x128xf32> to vector<64x128xbf16>
    %c1_54 = arith.constant 1 : index
    %c0_55 = arith.constant 0 : index
    %c0_56 = arith.constant 0 : index
    %c0_57 = arith.constant 0 : index
    %c0_58 = arith.constant 0 : index
    %44 = vector.load %arg1[%c1_54, %c0_55, %c0_56, %c0_57, %c0_58] : memref<4x1x8x8x128xf32, #tpu.memory_space<vmem>>, vector<1x1x8x8x128xf32>
    %45 = vector.shape_cast %44 : vector<1x1x8x8x128xf32> to vector<1x8x8x128xf32>
    %c0_59 = arith.constant 0 : index
    %c0_60 = arith.constant 0 : index
    %46 = vector.load %arg2[%c0_59, %c0_60] : memref<1x128xf32, #tpu.memory_space<vmem>>, vector<1x128xf32>
    %47 = vector.shape_cast %46 : vector<1x128xf32> to vector<1x1x1x128xf32>
    %48 = vector.broadcast %47 : vector<1x1x1x128xf32> to vector<1x8x8x128xf32>
    %49 = arith.mulf %45, %48 : vector<1x8x8x128xf32>
    %c0_61 = arith.constant 0 : index
    %c0_62 = arith.constant 0 : index
    %50 = vector.load %arg3[%c0_61, %c0_62] : memref<1x128xf32, #tpu.memory_space<vmem>>, vector<1x128xf32>
    %51 = vector.shape_cast %50 : vector<1x128xf32> to vector<1x1x1x128xf32>
    %52 = vector.broadcast %51 : vector<1x1x1x128xf32> to vector<1x8x8x128xf32>
    %53 = arith.addf %49, %52 : vector<1x8x8x128xf32>
    %cst_63 = arith.constant 0.000000e+00 : f32
    %54 = vector.broadcast %cst_63 : f32 to vector<1x8x8x128xf32>
    %55 = arith.cmpf oge, %53, %54 : vector<1x8x8x128xf32>
    %cst_64 = arith.constant 1.000000e-01 : f32
    %56 = vector.broadcast %cst_64 : f32 to vector<1x8x8x128xf32>
    %57 = arith.mulf %56, %53 : vector<1x8x8x128xf32>
    %58 = arith.select %55, %53, %57 : vector<1x8x8x128xi1>, vector<1x8x8x128xf32>
    %c1_65 = arith.constant 1 : index
    %c0_66 = arith.constant 0 : index
    %c0_67 = arith.constant 0 : index
    %c1_68 = arith.constant 1 : index
    %c0_69 = arith.constant 0 : index
    %59 = vector.load %arg10[%c1_65, %c0_66, %c0_67, %c1_68, %c0_69] : memref<4x1x9x16x128xf32, #tpu.memory_space<vmem>>, vector<1x1x8x8x128xf32>
    %60 = vector.shape_cast %59 : vector<1x1x8x8x128xf32> to vector<1x8x8x128xf32>
    %61 = vector.shape_cast %58 : vector<1x8x8x128xf32> to vector<1x1x8x8x128xf32>
    tpu.vector_store %arg10[%c1_65, %c0_66, %c0_67, %c1_68, %c0_69], %61 {strides = array<i32>} : memref<4x1x9x16x128xf32, #tpu.memory_space<vmem>>, vector<1x1x8x8x128xf32>,
    %c2_70 = arith.constant 2 : index
    %c0_71 = arith.constant 0 : index
    %c0_72 = arith.constant 0 : index
    %c0_73 = arith.constant 0 : index
    %c0_74 = arith.constant 0 : index
    %62 = vector.load %arg1[%c2_70, %c0_71, %c0_72, %c0_73, %c0_74] : memref<4x1x8x8x128xf32, #tpu.memory_space<vmem>>, vector<1x1x8x8x128xf32>
    %63 = vector.shape_cast %62 : vector<1x1x8x8x128xf32> to vector<1x8x8x128xf32>
    %c0_75 = arith.constant 0 : index
    %c0_76 = arith.constant 0 : index
    %64 = vector.load %arg2[%c0_75, %c0_76] : memref<1x128xf32, #tpu.memory_space<vmem>>, vector<1x128xf32>
    %65 = vector.shape_cast %64 : vector<1x128xf32> to vector<1x1x1x128xf32>
    %66 = vector.broadcast %65 : vector<1x1x1x128xf32> to vector<1x8x8x128xf32>
    %67 = arith.mulf %63, %66 : vector<1x8x8x128xf32>
    %c0_77 = arith.constant 0 : index
    %c0_78 = arith.constant 0 : index
    %68 = vector.load %arg3[%c0_77, %c0_78] : memref<1x128xf32, #tpu.memory_space<vmem>>, vector<1x128xf32>
    %69 = vector.shape_cast %68 : vector<1x128xf32> to vector<1x1x1x128xf32>
    %70 = vector.broadcast %69 : vector<1x1x1x128xf32> to vector<1x8x8x128xf32>
    %71 = arith.addf %67, %70 : vector<1x8x8x128xf32>
    %cst_79 = arith.constant 0.000000e+00 : f32
    %72 = vector.broadcast %cst_79 : f32 to vector<1x8x8x128xf32>
    %73 = arith.cmpf oge, %71, %72 : vector<1x8x8x128xf32>
    %cst_80 = arith.constant 1.000000e-01 : f32
    %74 = vector.broadcast %cst_80 : f32 to vector<1x8x8x128xf32>
    %75 = arith.mulf %74, %71 : vector<1x8x8x128xf32>
    %76 = arith.select %73, %71, %75 : vector<1x8x8x128xi1>, vector<1x8x8x128xf32>
    %c2_81 = arith.constant 2 : index
    %c0_82 = arith.constant 0 : index
    %c1_83 = arith.constant 1 : index
    %c0_84 = arith.constant 0 : index
    %c0_85 = arith.constant 0 : index
    %77 = vector.load %arg10[%c2_81, %c0_82, %c1_83, %c0_84, %c0_85] : memref<4x1x9x16x128xf32, #tpu.memory_space<vmem>>, vector<1x1x8x8x128xf32>
    %78 = vector.shape_cast %77 : vector<1x1x8x8x128xf32> to vector<1x8x8x128xf32>
    %79 = vector.shape_cast %76 : vector<1x8x8x128xf32> to vector<1x1x8x8x128xf32>
    tpu.vector_store %arg10[%c2_81, %c0_82, %c1_83, %c0_84, %c0_85], %79 {strides = array<i32>} : memref<4x1x9x16x128xf32, #tpu.memory_space<vmem>>, vector<1x1x8x8x128xf32>,
    %c3_86 = arith.constant 3 : index
    %c0_87 = arith.constant 0 : index
    %c0_88 = arith.constant 0 : index
    %c0_89 = arith.constant 0 : index
    %c0_90 = arith.constant 0 : index
    %80 = vector.load %arg1[%c3_86, %c0_87, %c0_88, %c0_89, %c0_90] : memref<4x1x8x8x128xf32, #tpu.memory_space<vmem>>, vector<1x1x8x8x128xf32>
    %81 = vector.shape_cast %80 : vector<1x1x8x8x128xf32> to vector<1x8x8x128xf32>
    %c0_91 = arith.constant 0 : index
    %c0_92 = arith.constant 0 : index
    %82 = vector.load %arg2[%c0_91, %c0_92] : memref<1x128xf32, #tpu.memory_space<vmem>>, vector<1x128xf32>
    %83 = vector.shape_cast %82 : vector<1x128xf32> to vector<1x1x1x128xf32>
    %84 = vector.broadcast %83 : vector<1x1x1x128xf32> to vector<1x8x8x128xf32>
    %85 = arith.mulf %81, %84 : vector<1x8x8x128xf32>
    %c0_93 = arith.constant 0 : index
    %c0_94 = arith.constant 0 : index
    %86 = vector.load %arg3[%c0_93, %c0_94] : memref<1x128xf32, #tpu.memory_space<vmem>>, vector<1x128xf32>
    %87 = vector.shape_cast %86 : vector<1x128xf32> to vector<1x1x1x128xf32>
    %88 = vector.broadcast %87 : vector<1x1x1x128xf32> to vector<1x8x8x128xf32>
    %89 = arith.addf %85, %88 : vector<1x8x8x128xf32>
    %cst_95 = arith.constant 0.000000e+00 : f32
    %90 = vector.broadcast %cst_95 : f32 to vector<1x8x8x128xf32>
    %91 = arith.cmpf oge, %89, %90 : vector<1x8x8x128xf32>
    %cst_96 = arith.constant 1.000000e-01 : f32
    %92 = vector.broadcast %cst_96 : f32 to vector<1x8x8x128xf32>
    %93 = arith.mulf %92, %89 : vector<1x8x8x128xf32>
    %94 = arith.select %91, %89, %93 : vector<1x8x8x128xi1>, vector<1x8x8x128xf32>
    %c3_97 = arith.constant 3 : index
    %c0_98 = arith.constant 0 : index
    %c1_99 = arith.constant 1 : index
    %c1_100 = arith.constant 1 : index
    %c0_101 = arith.constant 0 : index
    %95 = vector.load %arg10[%c3_97, %c0_98, %c1_99, %c1_100, %c0_101] : memref<4x1x9x16x128xf32, #tpu.memory_space<vmem>>, vector<1x1x8x8x128xf32>
    %96 = vector.shape_cast %95 : vector<1x1x8x8x128xf32> to vector<1x8x8x128xf32>
    %97 = vector.shape_cast %94 : vector<1x8x8x128xf32> to vector<1x1x8x8x128xf32>
    tpu.vector_store %arg10[%c3_97, %c0_98, %c1_99, %c1_100, %c0_101], %97 {strides = array<i32>} : memref<4x1x9x16x128xf32, #tpu.memory_space<vmem>>, vector<1x1x8x8x128xf32>,
    %c3_102 = arith.constant 3 : index
    %c0_103 = arith.constant 0 : index
    %c0_104 = arith.constant 0 : index
    %c0_105 = arith.constant 0 : index
    %c0_106 = arith.constant 0 : index
    %98 = vector.load %arg10[%c3_102, %c0_103, %c0_104, %c0_105, %c0_106] : memref<4x1x9x16x128xf32, #tpu.memory_space<vmem>>, vector<1x1x8x8x128xf32>
    %99 = vector.shape_cast %98 : vector<1x1x8x8x128xf32> to vector<1x8x8x128xf32>
    %100 = vector.shape_cast %99 : vector<1x8x8x128xf32> to vector<64x128xf32>
    %101 = arith.truncf %100 : vector<64x128xf32> to vector<64x128xbf16>
    %c0_107 = arith.constant 0 : index
    %c0_108 = arith.constant 0 : index
    %102 = vector.load %arg12[%c0_107, %c0_108] : memref<64x1152xbf16, #tpu.memory_space<vmem>>, vector<64x128xbf16>
    tpu.vector_store %arg12[%c0_107, %c0_108], %101 {strides = array<i32>} : memref<64x1152xbf16, #tpu.memory_space<vmem>>, vector<64x128xbf16>,
    %c2_109 = arith.constant 2 : index
    %c0_110 = arith.constant 0 : index
    %c0_111 = arith.constant 0 : index
    %c0_112 = arith.constant 0 : index
    %c0_113 = arith.constant 0 : index
    %103 = vector.load %arg10[%c2_109, %c0_110, %c0_111, %c0_112, %c0_113] : memref<4x1x9x16x128xf32, #tpu.memory_space<vmem>>, vector<1x1x8x8x128xf32>
    %104 = vector.shape_cast %103 : vector<1x1x8x8x128xf32> to vector<1x8x8x128xf32>
    %105 = vector.shape_cast %104 : vector<1x8x8x128xf32> to vector<64x128xf32>
    %106 = arith.truncf %105 : vector<64x128xf32> to vector<64x128xbf16>
    %c0_114 = arith.constant 0 : index
    %c128 = arith.constant 128 : index
    %107 = vector.load %arg12[%c0_114, %c128] : memref<64x1152xbf16, #tpu.memory_space<vmem>>, vector<64x128xbf16>
    tpu.vector_store %arg12[%c0_114, %c128], %106 {strides = array<i32>} : memref<64x1152xbf16, #tpu.memory_space<vmem>>, vector<64x128xbf16>,
    %c3_115 = arith.constant 3 : index
    %c0_116 = arith.constant 0 : index
    %c0_117 = arith.constant 0 : index
    %c1_118 = arith.constant 1 : index
    %c0_119 = arith.constant 0 : index
    %108 = vector.load %arg10[%c3_115, %c0_116, %c0_117, %c1_118, %c0_119] : memref<4x1x9x16x128xf32, #tpu.memory_space<vmem>>, vector<1x1x8x8x128xf32>
    %109 = vector.shape_cast %108 : vector<1x1x8x8x128xf32> to vector<1x8x8x128xf32>
    %110 = vector.shape_cast %109 : vector<1x8x8x128xf32> to vector<64x128xf32>
    %111 = arith.truncf %110 : vector<64x128xf32> to vector<64x128xbf16>
    %c0_120 = arith.constant 0 : index
    %c256 = arith.constant 256 : index
    %112 = vector.load %arg12[%c0_120, %c256] : memref<64x1152xbf16, #tpu.memory_space<vmem>>, vector<64x128xbf16>
    tpu.vector_store %arg12[%c0_120, %c256], %111 {strides = array<i32>} : memref<64x1152xbf16, #tpu.memory_space<vmem>>, vector<64x128xbf16>,
    %c1_121 = arith.constant 1 : index
    %c0_122 = arith.constant 0 : index
    %c0_123 = arith.constant 0 : index
    %c0_124 = arith.constant 0 : index
    %c0_125 = arith.constant 0 : index
    %113 = vector.load %arg10[%c1_121, %c0_122, %c0_123, %c0_124, %c0_125] : memref<4x1x9x16x128xf32, #tpu.memory_space<vmem>>, vector<1x1x8x8x128xf32>
    %114 = vector.shape_cast %113 : vector<1x1x8x8x128xf32> to vector<1x8x8x128xf32>
    %115 = vector.shape_cast %114 : vector<1x8x8x128xf32> to vector<64x128xf32>
    %116 = arith.truncf %115 : vector<64x128xf32> to vector<64x128xbf16>
    %c0_126 = arith.constant 0 : index
    %c384 = arith.constant 384 : index
    %117 = vector.load %arg12[%c0_126, %c384] : memref<64x1152xbf16, #tpu.memory_space<vmem>>, vector<64x128xbf16>
    tpu.vector_store %arg12[%c0_126, %c384], %116 {strides = array<i32>} : memref<64x1152xbf16, #tpu.memory_space<vmem>>, vector<64x128xbf16>,
    %c0_127 = arith.constant 0 : index
    %c0_128 = arith.constant 0 : index
    %c0_129 = arith.constant 0 : index
    %c0_130 = arith.constant 0 : index
    %c0_131 = arith.constant 0 : index
    %118 = vector.load %arg10[%c0_127, %c0_128, %c0_129, %c0_130, %c0_131] : memref<4x1x9x16x128xf32, #tpu.memory_space<vmem>>, vector<1x1x8x8x128xf32>
    %119 = vector.shape_cast %118 : vector<1x1x8x8x128xf32> to vector<1x8x8x128xf32>
    %120 = vector.shape_cast %119 : vector<1x8x8x128xf32> to vector<64x128xf32>
    %121 = arith.truncf %120 : vector<64x128xf32> to vector<64x128xbf16>
    %c0_132 = arith.constant 0 : index
    %c512 = arith.constant 512 : index
    %122 = vector.load %arg12[%c0_132, %c512] : memref<64x1152xbf16, #tpu.memory_space<vmem>>, vector<64x128xbf16>
    tpu.vector_store %arg12[%c0_132, %c512], %121 {strides = array<i32>} : memref<64x1152xbf16, #tpu.memory_space<vmem>>, vector<64x128xbf16>,
    %c1_133 = arith.constant 1 : index
    %c0_134 = arith.constant 0 : index
    %c0_135 = arith.constant 0 : index
    %c1_136 = arith.constant 1 : index
    %c0_137 = arith.constant 0 : index
    %123 = vector.load %arg10[%c1_133, %c0_134, %c0_135, %c1_136, %c0_137] : memref<4x1x9x16x128xf32, #tpu.memory_space<vmem>>, vector<1x1x8x8x128xf32>
    %124 = vector.shape_cast %123 : vector<1x1x8x8x128xf32> to vector<1x8x8x128xf32>
    %125 = vector.shape_cast %124 : vector<1x8x8x128xf32> to vector<64x128xf32>
    %126 = arith.truncf %125 : vector<64x128xf32> to vector<64x128xbf16>
    %c0_138 = arith.constant 0 : index
    %c640 = arith.constant 640 : index
    %127 = vector.load %arg12[%c0_138, %c640] : memref<64x1152xbf16, #tpu.memory_space<vmem>>, vector<64x128xbf16>
    tpu.vector_store %arg12[%c0_138, %c640], %126 {strides = array<i32>} : memref<64x1152xbf16, #tpu.memory_space<vmem>>, vector<64x128xbf16>,
    %c3_139 = arith.constant 3 : index
    %c0_140 = arith.constant 0 : index
    %c1_141 = arith.constant 1 : index
    %c0_142 = arith.constant 0 : index
    %c0_143 = arith.constant 0 : index
    %128 = vector.load %arg10[%c3_139, %c0_140, %c1_141, %c0_142, %c0_143] : memref<4x1x9x16x128xf32, #tpu.memory_space<vmem>>, vector<1x1x8x8x128xf32>
    %129 = vector.shape_cast %128 : vector<1x1x8x8x128xf32> to vector<1x8x8x128xf32>
    %130 = vector.shape_cast %129 : vector<1x8x8x128xf32> to vector<64x128xf32>
    %131 = arith.truncf %130 : vector<64x128xf32> to vector<64x128xbf16>
    %c0_144 = arith.constant 0 : index
    %c768 = arith.constant 768 : index
    %132 = vector.load %arg12[%c0_144, %c768] : memref<64x1152xbf16, #tpu.memory_space<vmem>>, vector<64x128xbf16>
    tpu.vector_store %arg12[%c0_144, %c768], %131 {strides = array<i32>} : memref<64x1152xbf16, #tpu.memory_space<vmem>>, vector<64x128xbf16>,
    %c2_145 = arith.constant 2 : index
    %c0_146 = arith.constant 0 : index
    %c1_147 = arith.constant 1 : index
    %c0_148 = arith.constant 0 : index
    %c0_149 = arith.constant 0 : index
    %133 = vector.load %arg10[%c2_145, %c0_146, %c1_147, %c0_148, %c0_149] : memref<4x1x9x16x128xf32, #tpu.memory_space<vmem>>, vector<1x1x8x8x128xf32>
    %134 = vector.shape_cast %133 : vector<1x1x8x8x128xf32> to vector<1x8x8x128xf32>
    %135 = vector.shape_cast %134 : vector<1x8x8x128xf32> to vector<64x128xf32>
    %136 = arith.truncf %135 : vector<64x128xf32> to vector<64x128xbf16>
    %c0_150 = arith.constant 0 : index
    %c896 = arith.constant 896 : index
    %137 = vector.load %arg12[%c0_150, %c896] : memref<64x1152xbf16, #tpu.memory_space<vmem>>, vector<64x128xbf16>
    tpu.vector_store %arg12[%c0_150, %c896], %136 {strides = array<i32>} : memref<64x1152xbf16, #tpu.memory_space<vmem>>, vector<64x128xbf16>,
    %c3_151 = arith.constant 3 : index
    %c0_152 = arith.constant 0 : index
    %c1_153 = arith.constant 1 : index
    %c1_154 = arith.constant 1 : index
    %c0_155 = arith.constant 0 : index
    %138 = vector.load %arg10[%c3_151, %c0_152, %c1_153, %c1_154, %c0_155] : memref<4x1x9x16x128xf32, #tpu.memory_space<vmem>>, vector<1x1x8x8x128xf32>
    %139 = vector.shape_cast %138 : vector<1x1x8x8x128xf32> to vector<1x8x8x128xf32>
    %140 = vector.shape_cast %139 : vector<1x8x8x128xf32> to vector<64x128xf32>
    %141 = arith.truncf %140 : vector<64x128xf32> to vector<64x128xbf16>
    %c0_156 = arith.constant 0 : index
    %c1024 = arith.constant 1024 : index
    %142 = vector.load %arg12[%c0_156, %c1024] : memref<64x1152xbf16, #tpu.memory_space<vmem>>, vector<64x128xbf16>
    tpu.vector_store %arg12[%c0_156, %c1024], %141 {strides = array<i32>} : memref<64x1152xbf16, #tpu.memory_space<vmem>>, vector<64x128xbf16>,
    %c0_157 = arith.constant 0 : index
    %c0_158 = arith.constant 0 : index
    %143 = vector.load %arg12[%c0_157, %c0_158] : memref<64x1152xbf16, #tpu.memory_space<vmem>>, vector<64x1152xbf16>
    %c0_159 = arith.constant 0 : index
    %c0_160 = arith.constant 0 : index
    %144 = vector.load %arg4[%c0_159, %c0_160] : memref<1152x128xbf16, #tpu.memory_space<vmem>>, vector<1152x128xbf16>
    %cst_161 = arith.constant dense<0.000000e+00> : vector<64x128xf32>
    %145 = tpu.matmul %143, %144, %cst_161 {dimension_numbers = #tpu.dot_dimension_numbers<[1], [0], [0], [1], [0, 0, 1, 1], [], []>} : vector<64x1152xbf16>, vector<1152x128xbf16>, vector<64x128xf32> -> vector<64x128xf32>
    %c0_162 = arith.constant 0 : index
    %c0_163 = arith.constant 0 : index
    %146 = vector.load %arg5[%c0_162, %c0_163] : memref<1x128xf32, #tpu.memory_space<vmem>>, vector<1x128xf32>
    %147 = vector.broadcast %146 : vector<1x128xf32> to vector<64x128xf32>
    %148 = arith.mulf %145, %147 : vector<64x128xf32>
    %c0_164 = arith.constant 0 : index
    %c0_165 = arith.constant 0 : index
    %149 = vector.load %arg6[%c0_164, %c0_165] : memref<1x128xf32, #tpu.memory_space<vmem>>, vector<1x128xf32>
    %150 = vector.broadcast %149 : vector<1x128xf32> to vector<64x128xf32>
    %151 = arith.addf %148, %150 : vector<64x128xf32>
    %cst_166 = arith.constant 0.000000e+00 : f32
    %152 = vector.broadcast %cst_166 : f32 to vector<64x128xf32>
    %153 = arith.cmpf oge, %151, %152 : vector<64x128xf32>
    %cst_167 = arith.constant 1.000000e-01 : f32
    %154 = vector.broadcast %cst_167 : f32 to vector<64x128xf32>
    %155 = arith.mulf %154, %151 : vector<64x128xf32>
    %156 = arith.select %153, %151, %155 : vector<64x128xi1>, vector<64x128xf32>
    %157 = vector.shape_cast %156 : vector<64x128xf32> to vector<1x8x8x128xf32>
    %c0_168 = arith.constant 0 : index
    %c1_169 = arith.constant 1 : index
    %c1_170 = arith.constant 1 : index
    %c0_171 = arith.constant 0 : index
    %158 = vector.load %arg11[%c0_168, %c1_169, %c1_170, %c0_171] : memref<1x10x16x128xf32, #tpu.memory_space<vmem>>, vector<1x8x8x128xf32>
    tpu.vector_store %arg11[%c0_168, %c1_169, %c1_170, %c0_171], %157 {strides = array<i32>} : memref<1x10x16x128xf32, #tpu.memory_space<vmem>>, vector<1x8x8x128xf32>,
    %c0_172 = arith.constant 0 : index
    %c0_173 = arith.constant 0 : index
    %c0_174 = arith.constant 0 : index
    %c0_175 = arith.constant 0 : index
    %159 = vector.load %arg11[%c0_172, %c0_173, %c0_174, %c0_175] : memref<1x10x16x128xf32, #tpu.memory_space<vmem>>, vector<1x8x8x128xf32>
    %160 = vector.shape_cast %159 : vector<1x8x8x128xf32> to vector<64x128xf32>
    %161 = arith.truncf %160 : vector<64x128xf32> to vector<64x128xbf16>
    %c0_176 = arith.constant 0 : index
    %c0_177 = arith.constant 0 : index
    %162 = vector.load %arg12[%c0_176, %c0_177] : memref<64x1152xbf16, #tpu.memory_space<vmem>>, vector<64x128xbf16>
    tpu.vector_store %arg12[%c0_176, %c0_177], %161 {strides = array<i32>} : memref<64x1152xbf16, #tpu.memory_space<vmem>>, vector<64x128xbf16>,
    %c0_178 = arith.constant 0 : index
    %c0_179 = arith.constant 0 : index
    %c1_180 = arith.constant 1 : index
    %c0_181 = arith.constant 0 : index
    %163 = vector.load %arg11[%c0_178, %c0_179, %c1_180, %c0_181] : memref<1x10x16x128xf32, #tpu.memory_space<vmem>>, vector<1x8x8x128xf32>
    %164 = vector.shape_cast %163 : vector<1x8x8x128xf32> to vector<64x128xf32>
    %165 = arith.truncf %164 : vector<64x128xf32> to vector<64x128xbf16>
    %c0_182 = arith.constant 0 : index
    %c128_183 = arith.constant 128 : index
    %166 = vector.load %arg12[%c0_182, %c128_183] : memref<64x1152xbf16, #tpu.memory_space<vmem>>, vector<64x128xbf16>
    tpu.vector_store %arg12[%c0_182, %c128_183], %165 {strides = array<i32>} : memref<64x1152xbf16, #tpu.memory_space<vmem>>, vector<64x128xbf16>,
    %c0_184 = arith.constant 0 : index
    %c0_185 = arith.constant 0 : index
    %c2_186 = arith.constant 2 : index
    %c0_187 = arith.constant 0 : index
    %167 = vector.load %arg11[%c0_184, %c0_185, %c2_186, %c0_187] : memref<1x10x16x128xf32, #tpu.memory_space<vmem>>, vector<1x8x8x128xf32>
    %168 = vector.shape_cast %167 : vector<1x8x8x128xf32> to vector<64x128xf32>
    %169 = arith.truncf %168 : vector<64x128xf32> to vector<64x128xbf16>
    %c0_188 = arith.constant 0 : index
    %c256_189 = arith.constant 256 : index
    %170 = vector.load %arg12[%c0_188, %c256_189] : memref<64x1152xbf16, #tpu.memory_space<vmem>>, vector<64x128xbf16>
    tpu.vector_store %arg12[%c0_188, %c256_189], %169 {strides = array<i32>} : memref<64x1152xbf16, #tpu.memory_space<vmem>>, vector<64x128xbf16>,
    %c0_190 = arith.constant 0 : index
    %c1_191 = arith.constant 1 : index
    %c0_192 = arith.constant 0 : index
    %c0_193 = arith.constant 0 : index
    %171 = vector.load %arg11[%c0_190, %c1_191, %c0_192, %c0_193] : memref<1x10x16x128xf32, #tpu.memory_space<vmem>>, vector<1x8x8x128xf32>
    %172 = vector.shape_cast %171 : vector<1x8x8x128xf32> to vector<64x128xf32>
    %173 = arith.truncf %172 : vector<64x128xf32> to vector<64x128xbf16>
    %c0_194 = arith.constant 0 : index
    %c384_195 = arith.constant 384 : index
    %174 = vector.load %arg12[%c0_194, %c384_195] : memref<64x1152xbf16, #tpu.memory_space<vmem>>, vector<64x128xbf16>
    tpu.vector_store %arg12[%c0_194, %c384_195], %173 {strides = array<i32>} : memref<64x1152xbf16, #tpu.memory_space<vmem>>, vector<64x128xbf16>,
    %c0_196 = arith.constant 0 : index
    %c1_197 = arith.constant 1 : index
    %c1_198 = arith.constant 1 : index
    %c0_199 = arith.constant 0 : index
    %175 = vector.load %arg11[%c0_196, %c1_197, %c1_198, %c0_199] : memref<1x10x16x128xf32, #tpu.memory_space<vmem>>, vector<1x8x8x128xf32>
    %176 = vector.shape_cast %175 : vector<1x8x8x128xf32> to vector<64x128xf32>
    %177 = arith.truncf %176 : vector<64x128xf32> to vector<64x128xbf16>
    %c0_200 = arith.constant 0 : index
    %c512_201 = arith.constant 512 : index
    %178 = vector.load %arg12[%c0_200, %c512_201] : memref<64x1152xbf16, #tpu.memory_space<vmem>>, vector<64x128xbf16>
    tpu.vector_store %arg12[%c0_200, %c512_201], %177 {strides = array<i32>} : memref<64x1152xbf16, #tpu.memory_space<vmem>>, vector<64x128xbf16>,
    %c0_202 = arith.constant 0 : index
    %c1_203 = arith.constant 1 : index
    %c2_204 = arith.constant 2 : index
    %c0_205 = arith.constant 0 : index
    %179 = vector.load %arg11[%c0_202, %c1_203, %c2_204, %c0_205] : memref<1x10x16x128xf32, #tpu.memory_space<vmem>>, vector<1x8x8x128xf32>
    %180 = vector.shape_cast %179 : vector<1x8x8x128xf32> to vector<64x128xf32>
    %181 = arith.truncf %180 : vector<64x128xf32> to vector<64x128xbf16>
    %c0_206 = arith.constant 0 : index
    %c640_207 = arith.constant 640 : index
    %182 = vector.load %arg12[%c0_206, %c640_207] : memref<64x1152xbf16, #tpu.memory_space<vmem>>, vector<64x128xbf16>
    tpu.vector_store %arg12[%c0_206, %c640_207], %181 {strides = array<i32>} : memref<64x1152xbf16, #tpu.memory_space<vmem>>, vector<64x128xbf16>,
    %c0_208 = arith.constant 0 : index
    %c2_209 = arith.constant 2 : index
    %c0_210 = arith.constant 0 : index
    %c0_211 = arith.constant 0 : index
    %183 = vector.load %arg11[%c0_208, %c2_209, %c0_210, %c0_211] : memref<1x10x16x128xf32, #tpu.memory_space<vmem>>, vector<1x8x8x128xf32>
    %184 = vector.shape_cast %183 : vector<1x8x8x128xf32> to vector<64x128xf32>
    %185 = arith.truncf %184 : vector<64x128xf32> to vector<64x128xbf16>
    %c0_212 = arith.constant 0 : index
    %c768_213 = arith.constant 768 : index
    %186 = vector.load %arg12[%c0_212, %c768_213] : memref<64x1152xbf16, #tpu.memory_space<vmem>>, vector<64x128xbf16>
    tpu.vector_store %arg12[%c0_212, %c768_213], %185 {strides = array<i32>} : memref<64x1152xbf16, #tpu.memory_space<vmem>>, vector<64x128xbf16>,
    %c0_214 = arith.constant 0 : index
    %c2_215 = arith.constant 2 : index
    %c1_216 = arith.constant 1 : index
    %c0_217 = arith.constant 0 : index
    %187 = vector.load %arg11[%c0_214, %c2_215, %c1_216, %c0_217] : memref<1x10x16x128xf32, #tpu.memory_space<vmem>>, vector<1x8x8x128xf32>
    %188 = vector.shape_cast %187 : vector<1x8x8x128xf32> to vector<64x128xf32>
    %189 = arith.truncf %188 : vector<64x128xf32> to vector<64x128xbf16>
    %c0_218 = arith.constant 0 : index
    %c896_219 = arith.constant 896 : index
    %190 = vector.load %arg12[%c0_218, %c896_219] : memref<64x1152xbf16, #tpu.memory_space<vmem>>, vector<64x128xbf16>
    tpu.vector_store %arg12[%c0_218, %c896_219], %189 {strides = array<i32>} : memref<64x1152xbf16, #tpu.memory_space<vmem>>, vector<64x128xbf16>,
    %c0_220 = arith.constant 0 : index
    %c2_221 = arith.constant 2 : index
    %c2_222 = arith.constant 2 : index
    %c0_223 = arith.constant 0 : index
    %191 = vector.load %arg11[%c0_220, %c2_221, %c2_222, %c0_223] : memref<1x10x16x128xf32, #tpu.memory_space<vmem>>, vector<1x8x8x128xf32>
    %192 = vector.shape_cast %191 : vector<1x8x8x128xf32> to vector<64x128xf32>
    %193 = arith.truncf %192 : vector<64x128xf32> to vector<64x128xbf16>
    %c0_224 = arith.constant 0 : index
    %c1024_225 = arith.constant 1024 : index
    %194 = vector.load %arg12[%c0_224, %c1024_225] : memref<64x1152xbf16, #tpu.memory_space<vmem>>, vector<64x128xbf16>
    tpu.vector_store %arg12[%c0_224, %c1024_225], %193 {strides = array<i32>} : memref<64x1152xbf16, #tpu.memory_space<vmem>>, vector<64x128xbf16>,
    %c0_226 = arith.constant 0 : index
    %c0_227 = arith.constant 0 : index
    %195 = vector.load %arg8[%c0_226, %c0_227] : memref<128x128xbf16, #tpu.memory_space<vmem>>, vector<128x128xbf16>
    %cst_228 = arith.constant dense<0.000000e+00> : vector<64x128xf32>
    %196 = tpu.matmul %43, %195, %cst_228 {dimension_numbers = #tpu.dot_dimension_numbers<[1], [0], [0], [1], [0, 0, 1, 1], [], []>} : vector<64x128xbf16>, vector<128x128xbf16>, vector<64x128xf32> -> vector<64x128xf32>
    %c0_229 = arith.constant 0 : index
    %c0_230 = arith.constant 0 : index
    %197 = vector.load %arg12[%c0_229, %c0_230] : memref<64x1152xbf16, #tpu.memory_space<vmem>>, vector<64x1152xbf16>
    %c0_231 = arith.constant 0 : index
    %c0_232 = arith.constant 0 : index
    %198 = vector.load %arg7[%c0_231, %c0_232] : memref<1152x128xbf16, #tpu.memory_space<vmem>>, vector<1152x128xbf16>
    %cst_233 = arith.constant dense<0.000000e+00> : vector<64x128xf32>
    %199 = tpu.matmul %197, %198, %cst_233 {dimension_numbers = #tpu.dot_dimension_numbers<[1], [0], [0], [1], [0, 0, 1, 1], [], []>} : vector<64x1152xbf16>, vector<1152x128xbf16>, vector<64x128xf32> -> vector<64x128xf32>
    %200 = arith.addf %196, %199 : vector<64x128xf32>
    %201 = vector.shape_cast %200 : vector<64x128xf32> to vector<1x8x8x128xf32>
    %c0_234 = arith.constant 0 : index
    %c0_235 = arith.constant 0 : index
    %c0_236 = arith.constant 0 : index
    %c0_237 = arith.constant 0 : index
    %202 = vector.load %arg9[%c0_234, %c0_235, %c0_236, %c0_237] : memref<1x8x8x128xf32, #tpu.memory_space<vmem>>, vector<1x8x8x128xf32>
    tpu.vector_store %arg9[%c0_234, %c0_235, %c0_236, %c0_237], %201 {strides = array<i32>} : memref<1x8x8x128xf32, #tpu.memory_space<vmem>>, vector<1x8x8x128xf32>,
    return
  }
  func.func @transform_0(%arg0: i32) -> (i32, i32, i32, i32, i32) {
    %c0_i32 = arith.constant 0 : i32
    %c0_i32_0 = arith.constant 0 : i32
    %c0_i32_1 = arith.constant 0 : i32
    %c0_i32_2 = arith.constant 0 : i32
    %c0_i32_3 = arith.constant 0 : i32
    return %c0_i32, %arg0, %c0_i32_0, %c0_i32_1, %c0_i32_2 : i32, i32, i32, i32, i32
  }
  func.func @transform_1(%arg0: i32) -> (i32, i32) {
    %c0_i32 = arith.constant 0 : i32
    %c0_i32_0 = arith.constant 0 : i32
    %c0_i32_1 = arith.constant 0 : i32
    return %c0_i32, %c0_i32_0 : i32, i32
  }
  func.func @transform_2(%arg0: i32) -> (i32, i32) {
    %c0_i32 = arith.constant 0 : i32
    %c0_i32_0 = arith.constant 0 : i32
    %c0_i32_1 = arith.constant 0 : i32
    return %c0_i32, %c0_i32_0 : i32, i32
  }
  func.func @transform_3(%arg0: i32) -> (i32, i32) {
    %c0_i32 = arith.constant 0 : i32
    %c0_i32_0 = arith.constant 0 : i32
    %c0_i32_1 = arith.constant 0 : i32
    return %c0_i32, %c0_i32_0 : i32, i32
  }
  func.func @transform_4(%arg0: i32) -> (i32, i32) {
    %c0_i32 = arith.constant 0 : i32
    %c0_i32_0 = arith.constant 0 : i32
    %c0_i32_1 = arith.constant 0 : i32
    return %c0_i32, %c0_i32_0 : i32, i32
  }
  func.func @transform_5(%arg0: i32) -> (i32, i32) {
    %c0_i32 = arith.constant 0 : i32
    %c0_i32_0 = arith.constant 0 : i32
    %c0_i32_1 = arith.constant 0 : i32
    return %c0_i32, %c0_i32_0 : i32, i32
  }
  func.func @transform_6(%arg0: i32) -> (i32, i32) {
    %c0_i32 = arith.constant 0 : i32
    %c0_i32_0 = arith.constant 0 : i32
    %c0_i32_1 = arith.constant 0 : i32
    return %c0_i32, %c0_i32_0 : i32, i32
  }
  func.func @transform_7(%arg0: i32) -> (i32, i32) {
    %c0_i32 = arith.constant 0 : i32
    %c0_i32_0 = arith.constant 0 : i32
    %c0_i32_1 = arith.constant 0 : i32
    return %c0_i32, %c0_i32_0 : i32, i32
  }
  func.func @transform_8(%arg0: i32) -> (i32, i32, i32, i32) {
    %c0_i32 = arith.constant 0 : i32
    %c0_i32_0 = arith.constant 0 : i32
    %c0_i32_1 = arith.constant 0 : i32
    %c0_i32_2 = arith.constant 0 : i32
    return %arg0, %c0_i32, %c0_i32_0, %c0_i32_1 : i32, i32, i32, i32
  }
}

</mosaic_0001>

<bundles_post_ra>
// kernel: network_block_pallas.3
= control target key start
LH: loop header
LB: loop body
LE: loop exit
PB: predicated region body
PF: predicated region fallthrough
CT: control target
= control target key end

     0   :  { %s4867_s24 = smov 0   ;;  %s5502_s0 = inlined_call_operand.vmem [shape: f32[2,8,8,128], index: 0, kind: input, shape index: {}]   ;;  %s5503_s1 = inlined_call_operand.vmem [shape: f32[1,128], index: 1, kind: input, shape index: {}]   ;;  %s5504_s2 = inlined_call_operand.vmem [shape: f32[1,128], index: 2, kind: input, shape index: {}]   ;;  %s5505_s3 = inlined_call_operand.vmem [shape: bf16[1152,128], index: 3, kind: input, shape index: {}]   ;;  %s5506_s4 = inlined_call_operand.vmem [shape: f32[1,128], index: 4, kind: input, shape index: {}]   ;;  %s5507_s5 = inlined_call_operand.vmem [shape: f32[1,128], index: 5, kind: input, shape index: {}]   ;;  %s5508_s6 = inlined_call_operand.vmem [shape: bf16[1152,128], index: 6, kind: input, shape index: {}]   ;;  %s5509_s7 = inlined_call_operand.vmem [shape: f32[2,8,8,128], index: 7, kind: output, shape index: {}]  }
   0x1 LB: > { %s3651_s25 = sadd.s32 4294967295, %s4824_s24   ;;  %p3655_p0 = scmp.ge.s32.totalorder %s4824_s24, 1  ;;  %s4824_s24 = sphi %s4867_s24, %s17_s24  }
   0x2   : > { %p237_p1 = scmp.lt.s32.totalorder %s4824_s24, 3 }
   0x4   : > { %p238_p2 = pnand %p3655_p0, %p237_p1 }
   0x6   : > { %241 = sbr.rel (%p238_p2) target bundleno = 635 (0x27b), region = 48 }
   0xb   : > { %v4573_v0 = vld [vmem:[%s5505_s3 + $0x78] sm:$0xff]   ;;  %v4826_v3 = vmov 0.0   ;;  %v4577_v5 = vld [vmem:[%s5505_s3 + $0x70] sm:$0xff]   ;;  %v4581_v9 = vld [vmem:[%s5505_s3 + $0x68] sm:$0xff]   ;;  %p269_p3 = scmp.lt.s32.totalorder %s3651_s25, 1 }
   0xc   : > { %v4574_v1 = vld [vmem:[%s5505_s3 + $0xf8] sm:$0xff]   ;;  %4172 = vmatprep.subr.bf16.mxu0 %v4573_v0  ;;  %280 = vst [vmem:[#allocation2] sm:$0xff] %v4826_v3  ;;  %281 = vst [vmem:[#allocation2 + $0x8] sm:$0xff] %v4826_v3  ;;  %v4578_v6 = vld [vmem:[%s5505_s3 + $0xf0] sm:$0xff]  }
   0xd   : > { %v4575_v2 = vld [vmem:[%s5505_s3 + $0x38] sm:$0xff]   ;;  %286 = vst [vmem:[#allocation2 + $0x10] sm:$0x1] %v4826_v3  ;;  %305 = vst [vmem:[#allocation3] sm:$0xff] %v4826_v3  ;;  %4212 = vmatprep.subr.bf16.mxu1 %v4574_v1  ;;  %v4579_v7 = vld [vmem:[%s5505_s3 + $0x30] sm:$0xff]   ;;  %s5537_s25 = smov (!%p269_p3, %s3651_s25), 1 }
   0xe   : > { %306 = vst [vmem:[#allocation3 + $0x8] sm:$0xff] %v4826_v3  ;;  %283 = vst [vmem:[#allocation2 + $0x90] sm:$0xff] %v4826_v3  ;;  %v4576_v4 = vld [vmem:[%s5505_s3 + $0xb8] sm:$0xff]   ;;  %4173 = vmatpush3.bf16.msra.mxu0 %v4575_v2  ;;  %v4580_v8 = vld [vmem:[%s5505_s3 + $0xb0] sm:$0xff]   ;;  %s4026_s15 = sshll.u32 %s5537_s25, 6 }
   0xf   : > { %284 = vst [vmem:[#allocation2 + $0x98] sm:$0xff] %v4826_v3  ;;  %287 = vst [vmem:[#allocation2 + $0x20] sm:$0x1] %v4826_v3  ;;  %4213 = vmatpush3.bf16.msra.mxu1 %v4576_v4  ;;  %4174 = vmatprep.subr.bf16.mxu0 %v4577_v5  ;;  %v4582_v10 = vld [vmem:[%s5505_s3 + $0xe8] sm:$0xff]   ;;  %v4585_v13 = vld [vmem:[%s5505_s3 + $0x60] sm:$0xff]   ;;  %s4977_s26 = scalar_lea.vmem %s5502_s0, %s4026_s15  ;;  %s5471_s14 = scalar_lea.vmem %s5509_s7, %s4026_s15 }
  0x10   : > { %288 = vst [vmem:[#allocation2 + $0x30] sm:$0x1] %v4826_v3  ;;  %289 = vst [vmem:[#allocation2 + $0x40] sm:$0x1] %v4826_v3  ;;  %4214 = vmatprep.subr.bf16.mxu1 %v4578_v6  ;;  %v4583_v11 = vld [vmem:[%s5505_s3 + $0x28] sm:$0xff]   ;;  %v4586_v14 = vld [vmem:[%s5505_s3 + $0xe0] sm:$0xff]  }
  0x11   : > { %290 = vst [vmem:[#allocation2 + $0x50] sm:$0x1] %v4826_v3  ;;  %291 = vst [vmem:[#allocation2 + $0x60] sm:$0x1] %v4826_v3  ;;  %v4584_v12 = vld [vmem:[%s5505_s3 + $0xa8] sm:$0xff]   ;;  %v4587_v15 = vld [vmem:[%s5505_s3 + $0x20] sm:$0xff]  }
  0x12   : > { %292 = vst [vmem:[#allocation2 + $0x70] sm:$0x1] %v4826_v3  ;;  %293 = vst [vmem:[#allocation2 + $0x80] sm:$0x1] %v4826_v3  ;;  %4175 = vmatpush3.bf16.msra.mxu0 %v4579_v7  ;;  %v4588_v16 = vld [vmem:[%s5505_s3 + $0xa0] sm:$0xff]   ;;  %v4589_v17 = vld [vmem:[%s5505_s3 + $0x58] sm:$0xff]  }
  0x13   : > { %296 = vst [vmem:[#allocation2 + $0x19] sm:$0x1] %v4826_v3  ;;  %297 = vst [vmem:[#allocation2 + $0x29] sm:$0x1] %v4826_v3  ;;  %4215 = vmatpush3.bf16.msra.mxu1 %v4580_v8  ;;  %4176 = vmatprep.subr.bf16.mxu0 %v4581_v9  ;;  %v4590_v18 = vld [vmem:[%s5505_s3 + $0xd8] sm:$0xff]   ;;  %v4593_v21 = vld [vmem:[%s5505_s3 + $0x50] sm:$0xff]  }
  0x14   : > { %298 = vst [vmem:[#allocation2 + $0x39] sm:$0x1] %v4826_v3  ;;  %299 = vst [vmem:[#allocation2 + $0x49] sm:$0x1] %v4826_v3  ;;  %4216 = vmatprep.subr.bf16.mxu1 %v4582_v10  ;;  %v4591_v19 = vld [vmem:[%s5505_s3 + $0x18] sm:$0xff]   ;;  %v4594_v22 = vld [vmem:[%s5505_s3 + $0xd0] sm:$0xff]  }
  0x15   : > { %300 = vst [vmem:[#allocation2 + $0x59] sm:$0x1] %v4826_v3  ;;  %301 = vst [vmem:[#allocation2 + $0x69] sm:$0x1] %v4826_v3  ;;  %v4592_v20 = vld [vmem:[%s5505_s3 + $0x98] sm:$0xff]   ;;  %v4595_v23 = vld [vmem:[%s5505_s3 + $0x10] sm:$0xff]  }
  0x16   : > { %302 = vst [vmem:[#allocation2 + $0x79] sm:$0x1] %v4826_v3  ;;  %303 = vst [vmem:[#allocation2 + $0x89] sm:$0x1] %v4826_v3  ;;  %4177 = vmatpush3.bf16.msra.mxu0 %v4583_v11  ;;  %v4596_v24 = vld [vmem:[%s5505_s3 + $0x90] sm:$0xff]   ;;  %v4597_v25 = vld [vmem:[%s5505_s3 + $0x48] sm:$0xff]  }
  0x17   : > { %308 = vst [vmem:[#allocation3 + $0x90] sm:$0xff] %v4826_v3  ;;  %309 = vst [vmem:[#allocation3 + $0x98] sm:$0xff] %v4826_v3  ;;  %4217 = vmatpush3.bf16.msra.mxu1 %v4584_v12  ;;  %4178 = vmatprep.subr.bf16.mxu0 %v4585_v13  ;;  %v4598_v26 = vld [vmem:[%s5505_s3 + $0xc8] sm:$0xff]   ;;  %v4601_v29 = vld [vmem:[%s5505_s3 + $0x40] sm:$0xff]  }
  0x18   : > { %311 = vst [vmem:[#allocation3 + $0x10] sm:$0x1] %v4826_v3  ;;  %312 = vst [vmem:[#allocation3 + $0x20] sm:$0x1] %v4826_v3  ;;  %4218 = vmatprep.subr.bf16.mxu1 %v4586_v14  ;;  %v4599_v27 = vld [vmem:[%s5505_s3 + $0x8] sm:$0xff]   ;;  %v4602_v30 = vld [vmem:[%s5505_s3 + $0xc0] sm:$0xff]  }
  0x19   : > { %313 = vst [vmem:[#allocation3 + $0x30] sm:$0x1] %v4826_v3  ;;  %314 = vst [vmem:[#allocation3 + $0x40] sm:$0x1] %v4826_v3  ;;  %v4600_v28 = vld [vmem:[%s5505_s3 + $0x88] sm:$0xff]   ;;  %v4603_v31 = vld [vmem:[%s5505_s3] sm:$0xff]  }
  0x1a   : > { %315 = vst [vmem:[#allocation3 + $0x50] sm:$0x1] %v4826_v3  ;;  %316 = vst [vmem:[#allocation3 + $0x60] sm:$0x1] %v4826_v3  ;;  %4179 = vmatpush3.bf16.msra.mxu0 %v4587_v15  ;;  %v4604_v32 = vld [vmem:[%s5505_s3 + $0x80] sm:$0xff]   ;;  %v331_v41 = vld [vmem:[%s4977_s26 + $0x8] sm:$0xff] }
  0x1b   : > { %317 = vst [vmem:[#allocation3 + $0x70] sm:$0x1] %v4826_v3  ;;  %318 = vst [vmem:[#allocation3 + $0x80] sm:$0x1] %v4826_v3  ;;  %4219 = vmatpush3.bf16.msra.mxu1 %v4588_v16  ;;  %4180 = vmatprep.subr.bf16.mxu0 %v4589_v17  ;;  %v330_v33 = vld [vmem:[%s4977_s26] sm:$0xff]  ;;  %v4609_v46 = vld [vmem:[%s5505_s3 + $0x178] sm:$0xff]  }
  0x1c   : > { %321 = vst [vmem:[#allocation3 + $0x19] sm:$0x1] %v4826_v3  ;;  %322 = vst [vmem:[#allocation3 + $0x29] sm:$0x1] %v4826_v3  ;;  %4220 = vmatprep.subr.bf16.mxu1 %v4590_v18  ;;  %v4989_v34 = vld [vmem:[%s5503_s1] ss:$0 sm:$0xff] }
  0x1d   : > { %323 = vst [vmem:[#allocation3 + $0x39] sm:$0x1] %v4826_v3  ;;  %324 = vst [vmem:[#allocation3 + $0x49] sm:$0x1] %v4826_v3  ;;  %v4994_v35 = vld [vmem:[%s5504_s2] ss:$0 sm:$0xff]  ;;  %v345_v36 = vmul.f32 %v4989_v34, %v330_v33  ;;  %v346_v44 = vmul.f32 %v4989_v34, %v331_v41 }
  0x1e   : > { %325 = vst [vmem:[#allocation3 + $0x59] sm:$0x1] %v4826_v3  ;;  %326 = vst [vmem:[#allocation3 + $0x69] sm:$0x1] %v4826_v3  ;;  %4181 = vmatpush3.bf16.msra.mxu0 %v4591_v19  ;;  %v449_v38 = vld [vmem:[#allocation2 + $0x1] sm:$0xff]  ;;  %v4611_v49 = vld [vmem:[%s5505_s3 + $0x1f8] sm:$0xff]  }
  0x1f   : > { %327 = vst [vmem:[#allocation3 + $0x79] sm:$0x1] %v4826_v3  ;;  %328 = vst [vmem:[#allocation3 + $0x89] sm:$0x1] %v4826_v3  ;;  %4221 = vmatpush3.bf16.msra.mxu1 %v4592_v20  ;;  %4182 = vmatprep.subr.bf16.mxu0 %v4593_v21  ;;  %v4036_v40 = vpack.c.bf16 %v449_v38, %v449_v38  ;;  %v360_v43 = vadd.f32 %v4994_v35, %v345_v36  ;;  %v332_v55 = vld [vmem:[%s4977_s26 + $0x10] sm:$0xff]  ;;  %v333_v56 = vld [vmem:[%s4977_s26 + $0x18] sm:$0xff] }
  0x20   : > { %285 = vst [vmem:[#allocation2] sm:$0x1] %v4826_v3  ;;  %310 = vst [vmem:[#allocation3] sm:$0x1] %v4826_v3  ;;  %4222 = vmatprep.subr.bf16.mxu1 %v4594_v22  ;;  %v361_v48 = vadd.f32 %v4994_v35, %v346_v44  ;;  %v347_v57 = vmul.f32 %v4989_v34, %v332_v55  ;;  %v348_v58 = vmul.f32 %v4989_v34, %v333_v56  ;;  %v2070_v9 = vld [vmem:[#allocation3 + $0x1] sm:$0xff]  ;;  %v4610_v22 = vld [vmem:[%s5505_s3 + $0x138] sm:$0xff]  }
  0x21   : > { %295 = vst [vmem:[#allocation2 + $0x9] sm:$0x1] %v4826_v3  ;;  %320 = vst [vmem:[#allocation3 + $0x9] sm:$0x1] %v4826_v3  ;;  %vm368_vm0 = vcmp.ge.f32.partialorder %v360_v43, 0.0  ;;  %v334_v14 = vld [vmem:[%s4977_s26 + $0x20] sm:$0xff]  ;;  %v4108_v16 = vpack.c.bf16 %v2070_v9, %v2070_v9 }
  0x22   : > { %294 = vst [vmem:[#allocation2 + $0x90] sm:$0x1] %v4826_v3  ;;  %304 = vst [vmem:[#allocation2 + $0x99] sm:$0x1] %v4826_v3  ;;  %4183 = vmatpush3.bf16.msra.mxu0 %v4595_v23  ;;  %v376_v47 = vmul.f32 0.1, %v360_v43  ;;  %v362_v59 = vadd.f32 %v4994_v35, %v347_v57  ;;  %v363_v60 = vadd.f32 %v4994_v35, %v348_v58 }
  0x23   : > { %319 = vst [vmem:[#allocation3 + $0x90] sm:$0x1] %v4826_v3  ;;  %329 = vst [vmem:[#allocation3 + $0x99] sm:$0x1] %v4826_v3  ;;  %4223 = vmatpush3.bf16.msra.mxu1 %v4596_v24  ;;  %4184 = vmatprep.subr.bf16.mxu0 %v4597_v25  ;;  %vm369_vm1 = vcmp.ge.f32.partialorder %v361_v48, 0.0  ;;  %v349_v17 = vmul.f32 %v4989_v34, %v334_v14  ;;  %v335_v18 = vld [vmem:[%s4977_s26 + $0x28] sm:$0xff] }
  0x24   : > { %4224 = vmatprep.subr.bf16.mxu1 %v4598_v26  ;;  %489 = vst [vmem:[#allocation4 + $0x4] sm:$0xf] %v4036_v40  ;;  %v384_v50 = vsel %vm368_vm0, %v360_v43, %v376_v47  ;;  %v377_v51 = vmul.f32 0.1, %v361_v48  ;;  %vm370_vm2 = vcmp.ge.f32.partialorder %v362_v59, 0.0  ;;  %vm371_vm3 = vcmp.ge.f32.partialorder %v363_v60, 0.0 }
  0x25   : > { %393 = vst [vmem:[#allocation2 + $0x11] sm:$0xff] %v384_v50  ;;  %v4037_v52 = vpack.c.bf16 %v384_v50, %v384_v50  ;;  %v378_v1 = vmul.f32 0.1, %v362_v59  ;;  %v379_v4 = vmul.f32 0.1, %v363_v60  ;;  %v350_v20 = vmul.f32 %v4989_v34, %v335_v18  ;;  %v4614_v38 = vld [vmem:[%s5505_s3 + $0x130] sm:$0xff]  }
  0x26   : > { %4185 = vmatpush3.bf16.msra.mxu0 %v4599_v27  ;;  %v385_v53 = vsel %vm369_vm1, %v361_v48, %v377_v51  ;;  %v364_v23 = vadd.f32 %v4994_v35, %v349_v17  ;;  %v4612_v27 = vld [vmem:[%s5505_s3 + $0x1b8] sm:$0xff]   ;;  %v4620_v48 = vld [vmem:[%s5505_s3 + $0x1b0] sm:$0xff]   ;;  %v4622_v51 = vld [vmem:[%s5505_s3 + $0x168] sm:$0xff]  }
  0x27   : > { %4225 = vmatpush3.bf16.msra.mxu1 %v4600_v28  ;;  %4186 = vmatprep.subr.bf16.mxu0 %v4601_v29  ;;  %v401_v37 = vld [vmem:[#allocation2] sm:$0xff]  ;;  %490 = vst [vmem:[#allocation4 + $0x28] sm:$0xf] %v4037_v52  ;;  %394 = vst [vmem:[#allocation2 + $0x21] sm:$0xff] %v385_v53  ;;  %v4038_v54 = vpack.c.bf16 %v385_v53, %v385_v53  ;;  %v386_v7 = vsel %vm370_vm2, %v362_v59, %v378_v1  ;;  %v4623_v53 = vld [vmem:[%s5505_s3 + $0x128] sm:$0xff]  }
  0x28   : > { %4226 = vmatprep.subr.bf16.mxu1 %v4602_v30  ;;  %v4028_v39 = vpack.c.bf16 %v401_v37, %v401_v37  ;;  %v497_v42 = vld [vmem:[#allocation2 + $0x2] sm:$0xff]  ;;  %633 = vst [vmem:[#allocation4 + $0x10] sm:$0xf] %v4037_v52  ;;  %395 = vst [vmem:[#allocation2 + $0x31] sm:$0xff] %v386_v7  ;;  %v4039_v10 = vpack.c.bf16 %v386_v7, %v386_v7  ;;  %v387_v11 = vsel %vm371_vm3, %v363_v60, %v379_v4  ;;  %v4613_v30 = vld [vmem:[%s5505_s3 + $0x170] sm:$0xff]  }
  0x29   : > { %v4044_v45 = vpack.c.bf16 %v497_v42, %v497_v42  ;;  %491 = vst [vmem:[#allocation4 + $0x4c] sm:$0xf] %v4038_v54  ;;  %634 = vst [vmem:[#allocation4 + $0x34] sm:$0xf] %v4038_v54  ;;  %v2022_v2 = vld [vmem:[#allocation3] sm:$0xff]  ;;  %v4040_v12 = vpack.c.bf16 %v387_v11, %v387_v11  ;;  %v365_v28 = vadd.f32 %v4994_v35, %v350_v20  ;;  %vm372_vm4 = vcmp.ge.f32.partialorder %v364_v23, 0.0 }
  0x2a   : > { %4187 = vmatpush3.bf16.msra.mxu0 %v4603_v31  ;;  %441 = vst [vmem:[#allocation4] sm:$0xf] %v4028_v39  ;;  %778 = vst [vmem:[#allocation4 + $0x1c] sm:$0xf] %v4038_v54  ;;  %v2118_v13 = vld [vmem:[#allocation3 + $0x2] sm:$0xff]  ;;  %v4100_v15 = vpack.c.bf16 %v2022_v2, %v2022_v2  ;;  %v4615_v39 = vld [vmem:[%s5505_s3 + $0x1f0] sm:$0xff]  }
  0x2b   : > { %4227 = vmatpush3.bf16.msra.mxu1 %v4604_v32  ;;  %537 = vst [vmem:[#allocation4 + $0x8] sm:$0xf] %v4044_v45  ;;  %4252 = vmatprep.subr.bf16.mxu0 %v4609_v46  ;;  %396 = vst [vmem:[#allocation2 + $0x41] sm:$0xff] %v387_v11  ;;  %v4116_v21 = vpack.c.bf16 %v2118_v13, %v2118_v13  ;;  %v380_v33 = vmul.f32 0.1, %v364_v23  ;;  %vm373_vm5 = vcmp.ge.f32.partialorder %v365_v28, 0.0 }
  0x2c   : > { %4292 = vmatprep.subr.bf16.mxu1 %v4611_v49  ;;  %v402_v61 = vld [vmem:[#allocation2 + $0x10] sm:$0xff]  ;;  %492 = vst [vmem:[#allocation4 + $0x70] sm:$0xf] %v4039_v10  ;;  %779 = vst [vmem:[#allocation4 + $0x40] sm:$0xf] %v4039_v10  ;;  %v4624_v54 = vld [vmem:[%s5505_s3 + $0x1e8] sm:$0xff]  }
  0x2d   : > { %v498_v62 = vld [vmem:[#allocation2 + $0x12] sm:$0xff]  ;;  %v4029_v63 = vpack.c.bf16 %v402_v61, %v402_v61  ;;  %635 = vst [vmem:[#allocation4 + $0x58] sm:$0xf] %v4039_v10  ;;  %493 = vst [vmem:[#allocation4 + $0x94] sm:$0xf] %v4040_v12  ;;  %v388_v44 = vsel %vm372_vm4, %v364_v23, %v380_v33  ;;  %v4626_v56 = vld [vmem:[%s5505_s3 + $0x160] sm:$0xff]  }
  0x2e   : > { %v4045_v0 = vpack.c.bf16 %v498_v62, %v498_v62  ;;  %v546_v3 = vld [vmem:[#allocation2 + $0x20] sm:$0xff]  ;;  %636 = vst [vmem:[#allocation4 + $0x7c] sm:$0xf] %v4040_v12  ;;  %780 = vst [vmem:[#allocation4 + $0x64] sm:$0xf] %v4040_v12  ;;  %v4041_v49 = vpack.c.bf16 %v388_v44, %v388_v44  ;;  %v4625_v58 = vld [vmem:[%s5505_s3 + $0x1a8] sm:$0xff]  }
  0x2f   : > { %v499_v5 = vld [vmem:[#allocation2 + $0x22] sm:$0xff]  ;;  %442 = vst [vmem:[#allocation4 + $0x24] sm:$0xf] %v4029_v63  ;;  %v4053_v6 = vpack.c.bf16 %v546_v3, %v546_v3  ;;  %585 = vst [vmem:[#allocation4 + $0xc] sm:$0xf] %v4029_v63  ;;  %v404_v31 = vld [vmem:[#allocation2 + $0x30] sm:$0xff] }
  0x30   : > { %538 = vst [vmem:[#allocation4 + $0x2c] sm:$0xf] %v4045_v0  ;;  %v4046_v8 = vpack.c.bf16 %v499_v5, %v499_v5  ;;  %681 = vst [vmem:[#allocation4 + $0x14] sm:$0xf] %v4045_v0  ;;  %v4605_v25 = vld [vmem:[#allocation4 + $0x4] ss:$36 sps:$4 sm:$0xff]   ;;  %v4031_v40 = vpack.c.bf16 %v404_v31, %v404_v31 }
  0x31   : > { %586 = vst [vmem:[#allocation4 + $0x30] sm:$0xf] %v4053_v6  ;;  %443 = vst [vmem:[#allocation4 + $0x48] sm:$0xf] %v4053_v6  ;;  %v834_v19 = vld [vmem:[#allocation4] sm:$0xff]  ;;  %v500_v32 = vld [vmem:[#allocation2 + $0x32] sm:$0xff]  ;;  %1666 = vmatprep.mubr.bf16.mxu0 %v4605_v25 }
  0x32   : > { %539 = vst [vmem:[#allocation4 + $0x50] sm:$0xf] %v4046_v8  ;;  %682 = vst [vmem:[#allocation4 + $0x38] sm:$0xf] %v4046_v8  ;;  %v4047_v41 = vpack.c.bf16 %v500_v32, %v500_v32  ;;  %v548_v43 = vld [vmem:[#allocation2 + $0x40] sm:$0xff]  ;;  %v336_v59 = vld [vmem:[%s4977_s26 + $0x30] sm:$0xff] }
  0x33   : > { %730 = vst [vmem:[#allocation4 + $0x18] sm:$0xf] %v4053_v6  ;;  %826 = vst [vmem:[#allocation4 + $0x20] sm:$0xf] %v4046_v8  ;;  %v381_v45 = vmul.f32 0.1, %v365_v28  ;;  %v4055_v47 = vpack.c.bf16 %v548_v43, %v548_v43  ;;  %v351_v60 = vmul.f32 %v4989_v34, %v336_v59 }
  0x34   : > { %2062 = vst [vmem:[#allocation4] sm:$0xf] %v4100_v15  ;;  %2110 = vst [vmem:[#allocation4 + $0x4] sm:$0xf] %v4108_v16  ;;  %v501_v46 = vld [vmem:[#allocation2 + $0x42] sm:$0xff]  ;;  %v337_v61 = vld [vmem:[%s4977_s26 + $0x38] sm:$0xff] }
  0x35   : > { %444 = vst [vmem:[#allocation4 + $0x6c] sm:$0xf] %v4031_v40  ;;  %540 = vst [vmem:[#allocation4 + $0x74] sm:$0xf] %v4047_v41  ;;  %v4048_v50 = vpack.c.bf16 %v501_v46, %v501_v46  ;;  %v389_v52 = vsel %vm373_vm5, %v365_v28, %v381_v45  ;;  %v4627_v62 = vld [vmem:[%s5505_s3 + $0x120] sm:$0xff]   ;;  %v352_v0 = vmul.f32 %v4989_v34, %v337_v61  ;;  %v4635_v8 = vld [vmem:[%s5505_s3 + $0x158] sm:$0xff]  }
  0x36   : > { %v839_v24 = vld [vmem:[#allocation4 + $0x24] sm:$0xff]  ;;  %587 = vst [vmem:[#allocation4 + $0x54] sm:$0xf] %v4031_v40  ;;  %397 = vst [vmem:[#allocation2 + $0x51] sm:$0xff] %v388_v44  ;;  %v4042_v55 = vpack.c.bf16 %v389_v52, %v389_v52  ;;  %v4616_v2 = vld [vmem:[#allocation4 + $0x4c] ss:$36 sps:$4 sm:$0xff]   ;;  %v366_v3 = vadd.f32 %v4994_v35, %v351_v60 }
  0x37   : > { %v835_v26 = vld [vmem:[#allocation4 + $0x8] sm:$0xff]  ;;  %v3734_v29 = vcombine.low %v834_v19, %v839_v24  ;;  %731 = vst [vmem:[#allocation4 + $0x3c] sm:$0xf] %v4031_v40  ;;  %683 = vst [vmem:[#allocation4 + $0x5c] sm:$0xf] %v4047_v41  ;;  %v4628_v63 = vld [vmem:[%s5505_s3 + $0x1e0] sm:$0xff]   ;;  %v367_v9 = vadd.f32 %v4994_v35, %v352_v0 }
  0x38   : > { %v840_v36 = vld [vmem:[#allocation4 + $0x2c] sm:$0xff]  ;;  %2158 = vst [vmem:[#allocation4 + $0x8] sm:$0xf] %v4116_v21  ;;  %827 = vst [vmem:[#allocation4 + $0x44] sm:$0xf] %v4047_v41  ;;  %v4633_v7 = vld [vmem:[%s5505_s3 + $0x1a0] sm:$0xff]  }
  0x39   : > { %v4607_v37 = vld [vmem:[#allocation4 + $0xc] ss:$36 sps:$4 sm:$0xff]   ;;  %1667 = vmatmul.mubr.bf16.vlgmr.msra.gmra.mxu0 %v3734_v29  ;;  %v3736_v42 = vcombine.low %v835_v26, %v840_v36  ;;  %588 = vst [vmem:[#allocation4 + $0x78] sm:$0xf] %v4055_v47  ;;  %445 = vst [vmem:[#allocation4 + $0x90] sm:$0xf] %v4055_v47 }
  0x3a   : > { %1731 = vmatprep.mubr.bf16.mxu1 %v4607_v37  ;;  %4253 = vmatpush3.bf16.msra.mxu0 %v4610_v22  ;;  %494 = vst [vmem:[#allocation4 + $0xb8] sm:$0xf] %v4041_v49  ;;  %398 = vst [vmem:[#allocation2 + $0x61] sm:$0xff] %v389_v52  ;;  %v844_v57 = vld [vmem:[#allocation4 + $0x48] sm:$0xff]  ;;  %vm374_vm6 = vcmp.ge.f32.partialorder %v366_v3, 0.0  ;;  %v4636_v14 = vld [vmem:[%s5505_s3 + $0x118] sm:$0xff]  }
  0x3b   : > { %1732 = vmatmul.mubr.bf16.vlgmr.msra.gmra.mxu1 %v3736_v42  ;;  %4254 = vmatprep.subr.bf16.mxu0 %v4613_v30  ;;  %541 = vst [vmem:[#allocation4 + $0x98] sm:$0xf] %v4048_v50  ;;  %684 = vst [vmem:[#allocation4 + $0x80] sm:$0xf] %v4048_v50  ;;  %v4637_v15 = vld [vmem:[%s5505_s3 + $0x1d8] sm:$0xff]   ;;  %vm375_vm7 = vcmp.ge.f32.partialorder %v367_v9, 0.0 }
  0x3c   : > { %4293 = vmatpush3.bf16.msra.mxu1 %v4612_v27  ;;  %732 = vst [vmem:[#allocation4 + $0x60] sm:$0xf] %v4055_v47  ;;  %781 = vst [vmem:[#allocation4 + $0x88] sm:$0xf] %v4041_v49  ;;  %v849_v1 = vld [vmem:[#allocation4 + $0x6c] sm:$0xff]  ;;  %1674 = vmatprep.mubr.bf16.mxu0 %v4616_v2  ;;  %v4638_v20 = vld [vmem:[%s5505_s3 + $0x198] sm:$0xff]  }
  0x3d   : > { %637 = vst [vmem:[#allocation4 + $0xa0] sm:$0xf] %v4041_v49  ;;  %828 = vst [vmem:[#allocation4 + $0x68] sm:$0xf] %v4048_v50  ;;  %4294 = vmatprep.subr.bf16.mxu1 %v4615_v39  ;;  %v3743_v4 = vcombine.low %v844_v57, %v849_v1  ;;  %v406_v5 = vld [vmem:[#allocation2 + $0x50] sm:$0xff]  ;;  %v4648_v30 = vld [vmem:[%s5505_s3 + $0x148] sm:$0xff]  }
  0x3e   : > { %4255 = vmatpush3.bf16.msra.mxu0 %v4614_v38  ;;  %495 = vst [vmem:[#allocation4 + $0xdc] sm:$0xf] %v4042_v55  ;;  %638 = vst [vmem:[#allocation4 + $0xc4] sm:$0xf] %v4042_v55  ;;  %v502_v6 = vld [vmem:[#allocation2 + $0x52] sm:$0xff]  ;;  %v4033_v11 = vpack.c.bf16 %v406_v5, %v406_v5  ;;  %v4649_v33 = vld [vmem:[%s5505_s3 + $0x108] sm:$0xff]  }
  0x3f   : > { %782 = vst [vmem:[#allocation4 + $0xac] sm:$0xf] %v4042_v55  ;;  %4256 = vmatprep.subr.bf16.mxu0 %v4622_v51  ;;  %v4621_v10 = vld [vmem:[#allocation4 + $0x50] ss:$36 sps:$4 sm:$0xff]   ;;  %v4049_v12 = vpack.c.bf16 %v502_v6, %v502_v6  ;;  %v382_v16 = vmul.f32 0.1, %v366_v3 }
  0x40   : > { %4295 = vmatpush3.bf16.msra.mxu1 %v4620_v48  ;;  %v4618_v34 = vld [vmem:[#allocation4 + $0x54] ss:$36 sps:$4 sm:$0xff]   ;;  %446 = vst [vmem:[#allocation4 + $0xb4] sm:$0xf] %v4033_v11  ;;  %589 = vst [vmem:[#allocation4 + $0x9c] sm:$0xf] %v4033_v11 }
  0x41   : > { %4296 = vmatprep.subr.bf16.mxu1 %v4624_v54  ;;  %1675 = vmatmul.mubr.bf16.gmra.mxu0 %v3743_v4  ;;  %v550_v13 = vld [vmem:[#allocation2 + $0x60] sm:$0xff]  ;;  %542 = vst [vmem:[#allocation4 + $0xbc] sm:$0xf] %v4049_v12  ;;  %v383_v18 = vmul.f32 0.1, %v367_v9  ;;  %v390_v21 = vsel %vm374_vm6, %v366_v3, %v382_v16  ;;  %v4639_v22 = vld [vmem:[%s5505_s3 + $0x150] sm:$0xff]  }
  0x42   : > { %4257 = vmatpush3.bf16.msra.mxu0 %v4623_v53  ;;  %v503_v35 = vld [vmem:[#allocation2 + $0x62] sm:$0xff]  ;;  %1739 = vmatprep.mubr.bf16.mxu1 %v4618_v34  ;;  %v4057_v17 = vpack.c.bf16 %v550_v13, %v550_v13  ;;  %733 = vst [vmem:[#allocation4 + $0x84] sm:$0xf] %v4033_v11  ;;  %685 = vst [vmem:[#allocation4 + $0xa4] sm:$0xf] %v4049_v12  ;;  %v4043_v23 = vpack.c.bf16 %v390_v21, %v390_v21  ;;  %v4640_v25 = vld [vmem:[%s5505_s3 + $0x110] sm:$0xff]  }
  0x43   : > { %4258 = vmatprep.subr.bf16.mxu0 %v4626_v56  ;;  %v4050_v19 = vpack.c.bf16 %v503_v35, %v503_v35  ;;  %829 = vst [vmem:[#allocation4 + $0x8c] sm:$0xf] %v4049_v12  ;;  %1740 = vmatmul.mubr.bf16.gmra.mxu1 %v4621_v10  ;;  %399 = vst [vmem:[#allocation2 + $0x71] sm:$0xff] %v390_v21  ;;  %v391_v24 = vsel %vm375_vm7, %v367_v9, %v383_v18  ;;  %v4641_v27 = vld [vmem:[%s5505_s3 + $0x1d0] sm:$0xff]   ;;  %v4650_v37 = vld [vmem:[%s5505_s3 + $0x1c8] sm:$0xff]  }
  0x44   : > { %4297 = vmatpush3.bf16.msra.mxu1 %v4625_v58  ;;  %590 = vst [vmem:[#allocation4 + $0xc0] sm:$0xf] %v4057_v17  ;;  %447 = vst [vmem:[#allocation4 + $0xd8] sm:$0xf] %v4057_v17  ;;  %v4067_v26 = vpack.c.bf16 %v391_v24, %v391_v24  ;;  %v854_v28 = vld [vmem:[#allocation4 + $0x90] sm:$0xff]  ;;  %v4652_v42 = vld [vmem:[%s5505_s3 + $0x140] sm:$0xff]  }
  0x45   : > { %4298 = vmatprep.subr.bf16.mxu1 %v4628_v63  ;;  %543 = vst [vmem:[#allocation4 + $0xe0] sm:$0xf] %v4050_v19  ;;  %686 = vst [vmem:[#allocation4 + $0xc8] sm:$0xf] %v4050_v19  ;;  %v4646_v29 = vld [vmem:[%s5505_s3 + $0x190] sm:$0xff]   ;;  %v4651_v46 = vld [vmem:[%s5505_s3 + $0x188] sm:$0xff]  }
  0x46   : > { %4259 = vmatpush3.bf16.msra.mxu0 %v4627_v62  ;;  %734 = vst [vmem:[#allocation4 + $0xa8] sm:$0xf] %v4057_v17  ;;  %830 = vst [vmem:[#allocation4 + $0xb0] sm:$0xf] %v4050_v19  ;;  %v4629_v32 = vld [vmem:[#allocation4 + $0x94] ss:$36 sps:$4 sm:$0xff]  }
  0x47   : > { %4260 = vmatprep.subr.bf16.mxu0 %v4635_v8  ;;  %400 = vst [vmem:[#allocation2 + $0x81] sm:$0xff] %v391_v24  ;;  %496 = vst [vmem:[#allocation4 + $0x100] sm:$0xf] %v4043_v23  ;;  %v859_v31 = vld [vmem:[#allocation4 + $0xb4] sm:$0xff]  ;;  %1682 = vmatprep.mubr.bf16.mxu0 %v4629_v32  ;;  %v4654_v48 = vld [vmem:[%s5505_s3 + $0x1c0] sm:$0xff]  }
  0x48   : > { %4299 = vmatpush3.bf16.msra.mxu1 %v4633_v7  ;;  %783 = vst [vmem:[#allocation4 + $0xd0] sm:$0xf] %v4043_v23  ;;  %639 = vst [vmem:[#allocation4 + $0xe8] sm:$0xf] %v4043_v23  ;;  %v3752_v36 = vcombine.low %v854_v28, %v859_v31  ;;  %v4634_v39 = vld [vmem:[#allocation4 + $0x98] ss:$36 sps:$4 sm:$0xff]  }
  0x49   : > { %4300 = vmatprep.subr.bf16.mxu1 %v4637_v15  ;;  %640 = vst [vmem:[#allocation4 + $0x10c] sm:$0xf] %v4067_v26  ;;  %784 = vst [vmem:[#allocation4 + $0xf4] sm:$0xf] %v4067_v26  ;;  %v4653_v49 = vld [vmem:[%s5505_s3 + $0x100] sm:$0xff]   ;;  %v4659_v50 = vld [vmem:[%s5505_s3 + $0x238] sm:$0xff]  }
  0x4a   : > { %4261 = vmatpush3.bf16.msra.mxu0 %v4636_v14  ;;  %v408_v40 = vld [vmem:[#allocation2 + $0x70] sm:$0xff]  ;;  %v4657_v51 = vld [vmem:[%s5505_s3 + $0x180] sm:$0xff]   ;;  %v4662_v63 = vld [vmem:[#allocation4 + $0x18] ss:$36 sps:$4 sm:$0xff]  }
  0x4b   : > { %4262 = vmatprep.subr.bf16.mxu0 %v4639_v22  ;;  %v4631_v38 = vld [vmem:[#allocation4 + $0x9c] ss:$36 sps:$4 sm:$0xff]   ;;  %1683 = vmatmul.mubr.bf16.gmra.mxu0 %v3752_v36  ;;  %v504_v41 = vld [vmem:[#allocation2 + $0x72] sm:$0xff]  ;;  %v4035_v43 = vpack.c.bf16 %v408_v40, %v408_v40  ;;  %v4668_v6 = vld [vmem:[#allocation4 + $0x64] ss:$36 sps:$4 sm:$0xff]  }
  0x4c   : > { %4301 = vmatpush3.bf16.msra.mxu1 %v4638_v20  ;;  %1747 = vmatprep.mubr.bf16.mxu1 %v4631_v38  ;;  %v4051_v44 = vpack.c.bf16 %v504_v41, %v504_v41  ;;  %v864_v52 = vld [vmem:[#allocation4 + $0xd8] sm:$0xff]  ;;  %v4658_v60 = vld [vmem:[#allocation4 + $0x10] ss:$36 sps:$4 sm:$0xff]   ;;  %v4667_v34 = vld [vmem:[%s5505_s3 + $0x228] sm:$0xff]  }
  0x4d   : > { %4302 = vmatprep.subr.bf16.mxu1 %v4641_v27  ;;  %1748 = vmatmul.mubr.bf16.gmra.mxu1 %v4634_v39  ;;  %448 = vst [vmem:[#allocation4 + $0xfc] sm:$0xf] %v4035_v43  ;;  %591 = vst [vmem:[#allocation4 + $0xe4] sm:$0xf] %v4035_v43  ;;  %v4655_v53 = vld [vmem:[#allocation4 + $0x14] ss:$36 sps:$4 sm:$0xff]  }
  0x4e   : > { %4263 = vmatpush3.bf16.msra.mxu0 %v4640_v25  ;;  %v552_v45 = vld [vmem:[#allocation2 + $0x80] sm:$0xff]  ;;  %544 = vst [vmem:[#allocation4 + $0x104] sm:$0xf] %v4051_v44  ;;  %735 = vst [vmem:[#allocation4 + $0xcc] sm:$0xf] %v4035_v43  ;;  %v697_v0 = vld [vmem:[#allocation2 + $0x90] sm:$0xff] }
  0x4f   : > { %4264 = vmatprep.subr.bf16.mxu0 %v4648_v30  ;;  %v4059_v47 = vpack.c.bf16 %v552_v45, %v552_v45  ;;  %687 = vst [vmem:[#allocation4 + $0xec] sm:$0xf] %v4051_v44  ;;  %831 = vst [vmem:[#allocation4 + $0xd4] sm:$0xf] %v4051_v44  ;;  %v4660_v54 = vld [vmem:[#allocation4 + $0x1c] ss:$36 sps:$4 sm:$0xff]   ;;  %v4083_v4 = vpack.c.bf16 %v697_v0, %v697_v0 }
  0x50   : > { %4303 = vmatpush3.bf16.msra.mxu1 %v4646_v29  ;;  %v4642_v56 = vld [vmem:[#allocation4 + $0xdc] ss:$36 sps:$4 sm:$0xff]   ;;  %v745_v1 = vld [vmem:[#allocation2 + $0x91] sm:$0xff]  ;;  %v4672_v16 = vld [vmem:[#allocation4 + $0xa4] ss:$36 sps:$4 sm:$0xff]  }
  0x51   : > { %4304 = vmatprep.subr.bf16.mxu1 %v4650_v37  ;;  %592 = vst [vmem:[#allocation4 + $0x108] sm:$0xf] %v4059_v47  ;;  %736 = vst [vmem:[#allocation4 + $0xf0] sm:$0xf] %v4059_v47  ;;  %1690 = vmatprep.mubr.bf16.mxu0 %v4642_v56  ;;  %v648_v61 = vld [vmem:[#allocation2 + $0x82] sm:$0xff]  ;;  %v4663_v2 = vld [vmem:[%s5505_s3 + $0x230] sm:$0xff]   ;;  %v4091_v5 = vpack.c.bf16 %v745_v1, %v745_v1 }
  0x52   : > { %4265 = vmatpush3.bf16.msra.mxu0 %v4649_v33  ;;  %v4075_v62 = vpack.c.bf16 %v648_v61, %v648_v61  ;;  %v4664_v3 = vld [vmem:[#allocation4 + $0x5c] ss:$36 sps:$4 sm:$0xff]   ;;  %737 = vst [vmem:[#allocation4 + $0x114] sm:$0xf] %v4083_v4  ;;  %v2318_v7 = vld [vmem:[#allocation3 + $0x90] sm:$0xff]  ;;  %v4683_v26 = vld [vmem:[%s5505_s3 + $0x208] sm:$0xff]  }
  0x53   : > { %4266 = vmatprep.subr.bf16.mxu0 %v4652_v42  ;;  %785 = vst [vmem:[#allocation4 + $0x118] sm:$0xf] %v4091_v5  ;;  %v2366_v8 = vld [vmem:[#allocation3 + $0x91] sm:$0xff]  ;;  %v4670_v10 = vld [vmem:[#allocation4 + $0x60] ss:$36 sps:$4 sm:$0xff]   ;;  %v4155_v13 = vpack.c.bf16 %v2318_v7, %v2318_v7  ;;  %v4697_v43 = vld [vmem:[%s5508_s6 + $0x68] sm:$0xff]  }
  0x54   : > { %4305 = vmatpush3.bf16.msra.mxu1 %v4651_v46  ;;  %v869_v55 = vld [vmem:[#allocation4 + $0xfc] sm:$0xff]  ;;  %688 = vst [vmem:[#allocation4 + $0x110] sm:$0xf] %v4075_v62  ;;  %832 = vst [vmem:[#allocation4 + $0xf8] sm:$0xf] %v4075_v62  ;;  %v793_v11 = vld [vmem:[#allocation2 + $0x92] sm:$0xff]  ;;  %v4163_v14 = vpack.c.bf16 %v2366_v8, %v2366_v8 }
  0x55   : > { %4306 = vmatprep.subr.bf16.mxu1 %v4654_v48  ;;  %v3761_v58 = vcombine.low %v864_v52, %v869_v55  ;;  %v4647_v59 = vld [vmem:[#allocation4 + $0xe0] ss:$36 sps:$4 sm:$0xff]   ;;  %v4666_v9 = vld [vmem:[#allocation4 + $0x58] ss:$36 sps:$4 sm:$0xff]   ;;  %v4099_v15 = vpack.c.bf16 %v793_v11, %v793_v11  ;;  %v4676_v35 = vld [vmem:[#allocation4 + $0xac] ss:$36 sps:$4 sm:$0xff]  }
  0x56   : > { %4267 = vmatpush3.bf16.msra.mxu0 %v4653_v49  ;;  %v4671_v12 = vld [vmem:[%s5505_s3 + $0x220] sm:$0xff]   ;;  %v2414_v18 = vld [vmem:[#allocation3 + $0x92] sm:$0xff]  ;;  %2358 = vst [vmem:[#allocation4 + $0x114] sm:$0xf] %v4155_v13  ;;  %v4678_v22 = vld [vmem:[#allocation4 + $0xa8] ss:$36 sps:$4 sm:$0xff]  }
  0x57   : > { %4516 = vmatprep.subr.bf16.mxu0 %v4659_v50  ;;  %1691 = vmatmul.mubr.bf16.gmra.mxu0 %v3761_v58  ;;  %833 = vst [vmem:[#allocation4 + $0x11c] sm:$0xf] %v4099_v15  ;;  %v4675_v19 = vld [vmem:[%s5505_s3 + $0x218] sm:$0xff]   ;;  %v4674_v20 = vld [vmem:[#allocation4 + $0xa0] ss:$36 sps:$4 sm:$0xff]   ;;  %v4171_v21 = vpack.c.bf16 %v2414_v18, %v2414_v18  ;;  %v4679_v23 = vld [vmem:[%s5505_s3 + $0x210] sm:$0xff]  }
  0x58   : > { %4307 = vmatpush3.bf16.msra.mxu1 %v4657_v51  ;;  %v4644_v57 = vld [vmem:[#allocation4 + $0xe4] ss:$36 sps:$4 sm:$0xff]   ;;  %1796 = vmatprep.mubr.bf16.mxu0 %v4655_v53  ;;  %v867_v27 = vld [vmem:[#allocation4 + $0xf0] sm:$0xff]  ;;  %v4691_v37 = vld [vmem:[%s5508_s6 + $0x78] sm:$0xff]  }
  0x59   : > { %1755 = vmatprep.mubr.bf16.mxu1 %v4644_v57  ;;  %v4682_v29 = vld [vmem:[#allocation4 + $0xe8] ss:$36 sps:$4 sm:$0xff]   ;;  %v4686_v30 = vld [vmem:[%s5505_s3 + $0x200] sm:$0xff]   ;;  %v4689_v36 = vld [vmem:[#allocation4 + $0xb0] ss:$36 sps:$4 sm:$0xff]   ;;  %4344 = vmatprep.subr.bf16.mxu1 %v4691_v37 }
  0x5a   : > { %1756 = vmatmul.mubr.bf16.gmra.mxu1 %v4647_v59  ;;  %v4684_v17 = vld [vmem:[#allocation4 + $0xf4] ss:$36 sps:$4 sm:$0xff]   ;;  %v4687_v31 = vld [vmem:[#allocation4 + $0x20] ss:$36 sps:$4 sm:$0xff]   ;;  %v4688_v33 = vld [vmem:[#allocation4 + $0x68] ss:$36 sps:$4 sm:$0xff]  }
  0x5b   : > { %1861 = vmatprep.mubr.bf16.mxu1 %v4660_v54  ;;  %2406 = vst [vmem:[#allocation4 + $0x118] sm:$0xf] %v4163_v14  ;;  %v4680_v24 = vld [vmem:[#allocation4 + $0xec] ss:$36 sps:$4 sm:$0xff]   ;;  %v4692_v38 = vld [vmem:[%s5508_s6 + $0x38] sm:$0xff]   ;;  %v4701_v47 = vld [vmem:[%s5508_s6 + $0x60] sm:$0xff]  }
  0x5c   : > { %v4693_v39 = vld [vmem:[%s5508_s6 + $0x70] sm:$0xff]   ;;  %v4694_v40 = vld [vmem:[%s5508_s6 + $0xf8] sm:$0xff]   ;;  %v4699_v45 = vld [vmem:[%s5508_s6 + $0x28] sm:$0xff]  }
  0x5d   : > { %v4695_v41 = vld [vmem:[%s5508_s6 + $0x30] sm:$0xff]   ;;  %v4696_v42 = vld [vmem:[%s5508_s6 + $0xb8] sm:$0xff]   ;;  %v4702_v48 = vld [vmem:[%s5508_s6 + $0xe8] sm:$0xff]  }
  0x5e   : > { %v4690_v25 = vld [vmem:[#allocation4 + $0xf8] ss:$36 sps:$4 sm:$0xff]   ;;  %v4698_v44 = vld [vmem:[%s5508_s6 + $0xf0] sm:$0xff]   ;;  %v4703_v49 = vld [vmem:[%s5508_s6 + $0x20] sm:$0xff]  }
  0x5f   : > { %1797 = vmatmul.mubr.bf16.vlgmr.msra.gmra.mxu0 %v4658_v60  ;;  %2454 = vst [vmem:[#allocation4 + $0x11c] sm:$0xf] %v4171_v21  ;;  %v4700_v46 = vld [vmem:[%s5508_s6 + $0xb0] sm:$0xff]   ;;  %v4705_v51 = vld [vmem:[%s5508_s6 + $0x58] sm:$0xff]   ;;  %v4706_v52 = vld [vmem:[%s5508_s6 + $0xe0] sm:$0xff]  }
  0x60   : > { %4517 = vmatpush3.bf16.msra.mxu0 %v4659_v50  ;;  %1804 = vmatprep.mubr.bf16.mxu0 %v4664_v3  ;;  %v4704_v50 = vld [vmem:[%s5508_s6 + $0xa8] sm:$0xff]   ;;  %v4707_v53 = vld [vmem:[%s5508_s6 + $0x18] sm:$0xff]   ;;  %v4708_v54 = vld [vmem:[%s5508_s6 + $0xa0] sm:$0xff]  }
  0x61   : > { %4518 = vmatprep.subr.bf16.mxu0 %v4663_v2  ;;  %v4709_v55 = vld [vmem:[%s5508_s6 + $0x50] sm:$0xff]   ;;  %v4710_v56 = vld [vmem:[%s5508_s6 + $0xd8] sm:$0xff]   ;;  %v4713_v59 = vld [vmem:[%s5508_s6 + $0x48] sm:$0xff]  }
  0x62   : > { %1862 = vmatmul.mubr.bf16.vlgmr.msra.gmra.mxu1 %v4662_v63  ;;  %v872_v28 = vld [vmem:[#allocation4 + $0x114] sm:$0xff]  ;;  %v4715_v61 = vld [vmem:[%s5508_s6 + $0x8] sm:$0xff]   ;;  %v4717_v63 = vld [vmem:[%s5508_s6 + $0x40] sm:$0xff]  }
  0x63   : > { %1869 = vmatprep.mubr.bf16.mxu1 %v4668_v6  ;;  %v3767_v32 = vcombine.low %v867_v27, %v872_v28  ;;  %4345 = vmatpush3.bf16.msra.mxu1 %v4692_v38  ;;  %v4711_v57 = vld [vmem:[%s5508_s6 + $0x10] sm:$0xff]   ;;  %v4712_v58 = vld [vmem:[%s5508_s6 + $0x98] sm:$0xff]   ;;  %v4718_v0 = vld [vmem:[%s5508_s6 + $0xc8] sm:$0xff]  }
  0x64   : > { %4519 = vmatpush3.bf16.msra.mxu0 %v4663_v2  ;;  %4346 = vmatprep.subr.bf16.mxu1 %v4693_v39  ;;  %v4714_v60 = vld [vmem:[%s5508_s6 + $0xd0] sm:$0xff]   ;;  %v4719_v1 = vld [vmem:[%s5508_s6] sm:$0xff]   ;;  %v4720_v2 = vld [vmem:[%s5508_s6 + $0x88] sm:$0xff]  }
  0x65   : > { %4520 = vmatprep.subr.bf16.mxu0 %v4667_v34  ;;  %v4716_v62 = vld [vmem:[%s5508_s6 + $0x90] sm:$0xff]   ;;  %v4724_v3 = vld [vmem:[%s5508_s6 + $0xc0] sm:$0xff]   ;;  %v4725_v4 = vld [vmem:[%s5508_s6 + $0x178] sm:$0xff]  }
  0x66   : > { %v4726_v5 = vld [vmem:[%s5508_s6 + $0x80] sm:$0xff]   ;;  %v4734_v6 = vld [vmem:[%s5508_s6 + $0x1f8] sm:$0xff]  }
  0x67   : > { %1805 = vmatmul.mubr.bf16.gmra.mxu0 %v4666_v9  ;;  %4347 = vmatpush3.bf16.msra.mxu1 %v4695_v41 }
  0x68   : > { %4521 = vmatpush3.bf16.msra.mxu0 %v4667_v34  ;;  %1812 = vmatprep.mubr.bf16.mxu0 %v4672_v16 }
  0x69   : > { %4522 = vmatprep.subr.bf16.mxu0 %v4671_v12  ;;  %4348 = vmatprep.subr.bf16.mxu1 %v4697_v43 }
  0x6a   : > { %1870 = vmatmul.mubr.bf16.gmra.mxu1 %v4670_v10 }
  0x6b   : > { %1877 = vmatprep.mubr.bf16.mxu1 %v4676_v35  ;;  %4349 = vmatpush3.bf16.msra.mxu1 %v4699_v45 }
  0x6c   : > { %4523 = vmatpush3.bf16.msra.mxu0 %v4671_v12  ;;  %4350 = vmatprep.subr.bf16.mxu1 %v4701_v47 }
  0x6d   : > { %4524 = vmatprep.subr.bf16.mxu0 %v4675_v19 }
  0x6f   : > { %1813 = vmatmul.mubr.bf16.gmra.mxu0 %v4674_v20  ;;  %4351 = vmatpush3.bf16.msra.mxu1 %v4703_v49 }
  0x70   : > { %4525 = vmatpush3.bf16.msra.mxu0 %v4675_v19  ;;  %1820 = vmatprep.mubr.bf16.mxu0 %v4680_v24 }
  0x71   : > { %4526 = vmatprep.subr.bf16.mxu0 %v4679_v23  ;;  %4352 = vmatprep.subr.bf16.mxu1 %v4705_v51 }
  0x72   : > { %1878 = vmatmul.mubr.bf16.gmra.mxu1 %v4678_v22 }
  0x73   : > { %1885 = vmatprep.mubr.bf16.mxu1 %v4684_v17  ;;  %4353 = vmatpush3.bf16.msra.mxu1 %v4707_v53 }
  0x74   : > { %4527 = vmatpush3.bf16.msra.mxu0 %v4679_v23  ;;  %4354 = vmatprep.subr.bf16.mxu1 %v4709_v55 }
  0x75   : > { %4528 = vmatprep.subr.bf16.mxu0 %v4683_v26 }
  0x77   : > { %1821 = vmatmul.mubr.bf16.gmra.mxu0 %v4682_v29  ;;  %4355 = vmatpush3.bf16.msra.mxu1 %v4711_v57 }
  0x78   : > { %4529 = vmatpush3.bf16.msra.mxu0 %v4683_v26  ;;  %4532 = vmatprep.mubr.bf16.mxu0 %v4687_v31 }
  0x79   : > { %4530 = vmatprep.subr.bf16.mxu0 %v4686_v30  ;;  %4356 = vmatprep.subr.bf16.mxu1 %v4713_v59 }
  0x7a   : > { %1886 = vmatmul.mubr.bf16.gmra.mxu1 %v3767_v32 }
  0x7b   : > { %4357 = vmatpush3.bf16.msra.mxu1 %v4715_v61 }
  0x7c   : > { %4531 = vmatpush3.bf16.msra.mxu0 %v4686_v30  ;;  %4358 = vmatprep.subr.bf16.mxu1 %v4717_v63 }
  0x7d   : > { %4384 = vmatprep.subr.bf16.mxu0 %v4694_v40 }
  0x7f   : > { %4533 = vmatmul.mubr.bf16.vlgmr.msra.gmra.mxu0 %v4688_v33  ;;  %4359 = vmatpush3.bf16.msra.mxu1 %v4719_v1 }
  0x80   : > { %4536 = vmatprep.mubr.bf16.mxu0 %v4689_v36  ;;  %4385 = vmatpush3.bf16.msra.mxu0 %v4696_v42 }
  0x81   : > { %4386 = vmatprep.subr.bf16.mxu0 %v4698_v44  ;;  %4424 = vmatprep.subr.bf16.mxu1 %v4725_v4 }
  0x84   : > { %4387 = vmatpush3.bf16.msra.mxu0 %v4700_v46 }
  0x85   : > { %4388 = vmatprep.subr.bf16.mxu0 %v4702_v48 }
  0x87   : > { %4537 = vmatmul.mubr.bf16.gmra.mxu0 %v4690_v25 }
  0x88   : > { %4389 = vmatpush3.bf16.msra.mxu0 %v4704_v50 }
  0x89   : > { %4390 = vmatprep.subr.bf16.mxu0 %v4706_v52 }
  0x8c   : > { %4391 = vmatpush3.bf16.msra.mxu0 %v4708_v54 }
  0x8d   : > { %4392 = vmatprep.subr.bf16.mxu0 %v4710_v56 }
  0x90   : > { %4393 = vmatpush3.bf16.msra.mxu0 %v4712_v58 }
  0x91   : > { %4394 = vmatprep.subr.bf16.mxu0 %v4714_v60 }
  0x94   : > { %4395 = vmatpush3.bf16.msra.mxu0 %v4716_v62 }
  0x95   : > { %4396 = vmatprep.subr.bf16.mxu0 %v4718_v0 }
  0x98   : > { %4397 = vmatpush3.bf16.msra.mxu0 %v4720_v2 }
  0x99   : > { %4398 = vmatprep.subr.bf16.mxu0 %v4724_v3 }
  0x9c   : > { %4399 = vmatpush3.bf16.msra.mxu0 %v4726_v5 }
  0x9d   : > { %4464 = vmatprep.subr.bf16.mxu0 %v4734_v6 }
  0xf9   : > { %v4188_v7 = vpop.f32.mrf.mxu0 }
  0xfb   : > { %v4228_v8 = vpop.f32.mrf.mxu1  ;;  %v4189_v9 = vpop.f32.mrf.mxu0 }
  0xfc   : > { %v4190_v0 = vadd.f32 %v4189_v9, %v4188_v7 }
  0xfd   : > { %v4229_v34 = vpop.f32.mrf.mxu1  ;;  %v5244_v10 = vpop.f32.mrf.mxu0 }
  0xfe   : > { %v4230_v1 = vadd.f32 %v4229_v34, %v4228_v8 }
  0xff   : > { %v5246_v11 = vpop.f32.mrf.mxu1  ;;  %v4192_v12 = vpop.f32.mrf.mxu0 }
 0x101   : > { %v4232_v13 = vpop.f32.mrf.mxu1  ;;  %v4194_v14 = vpop.f32.mrf.mxu0 }
 0x103   : > { %v4234_v15 = vpop.f32.mrf.mxu1  ;;  %v4195_v16 = vpop.f32.mrf.mxu0 }
 0x104   : > { %v4196_v60 = vadd.f32 %v4195_v16, %v4194_v14 }
 0x105   : > { %v4235_v35 = vpop.f32.mrf.mxu1  ;;  %v4197_v17 = vpop.f32.mrf.mxu0 }
 0x106   : > { %v4236_v61 = vadd.f32 %v4235_v35, %v4234_v15  ;;  %v1734_v35 = vadd.f32 %v4230_v1, %v4190_v0 }
 0x107   : > { %v4237_v18 = vpop.f32.mrf.mxu1  ;;  %v4198_v19 = vpop.f32.mrf.mxu0 }
 0x108   : > { %v4199_v4 = vadd.f32 %v4198_v19, %v4197_v17 }
 0x109   : > { %v4238_v20 = vpop.f32.mrf.mxu1 }
 0x10a   : > { %v4239_v5 = vadd.f32 %v4238_v20, %v4237_v18 }
 0x10b   : > { %v4200_v21 = vpop.f32.mrf.mxu0 }
 0x10c   : > { %v1745_v34 = vadd.f32 %v4239_v5, %v4199_v4 }
 0x10d   : > { %v4240_v22 = vpop.f32.mrf.mxu1  ;;  %v4201_v23 = vpop.f32.mrf.mxu0 }
 0x10e   : > { %v4202_v14 = vadd.f32 %v4201_v23, %v4200_v21 }
 0x10f   : > { %v4241_v24 = vpop.f32.mrf.mxu1  ;;  %v5248_v25 = vpop.f32.mrf.mxu0 }
 0x110   : > { %v4242_v15 = vadd.f32 %v4241_v24, %v4240_v22 }
 0x111   : > { %v5250_v26 = vpop.f32.mrf.mxu1  ;;  %v5252_v27 = vpop.f32.mrf.mxu0 }
 0x113   : > { %v5254_v28 = vpop.f32.mrf.mxu1 }
 0x114   : > { %v4245_v24 = vadd.f32 %v5254_v28, %v5250_v26 }
 0x117   : > { %v4206_v29 = vpop.f32.mrf.mxu0 }
 0x119   : > { %v4207_v31 = vpop.f32.mrf.mxu0 }
 0x11a   : > { %v4246_v30 = vpop.f32.mrf.mxu1  ;;  %v4208_v17 = vadd.f32 %v4207_v31, %v4206_v29 }
 0x11b   : > { %v5256_v33 = vpop.f32.mrf.mxu0 }
 0x11c   : > { %v4247_v32 = vpop.f32.mrf.mxu1  ;;  %5510 = vst [vmem:[#allocation5_spill] sm:$0xff] %v5256_v33  ;;  %v4233_v33 = vadd.f32 %v4232_v13, %v5246_v11  ;;  %v4205_v11 = vadd.f32 %v5252_v27, %v5248_v25 }
 0x11d   : > { %v5260_v37 = vpop.f32.mrf.mxu0  ;;  %v4248_v18 = vadd.f32 %v4247_v32, %v4246_v30 }
 0x11e   : > { %v5258_v36 = vpop.f32.mrf.mxu1  ;;  %5512 = vst [vmem:[#allocation7_spill] sm:$0xff] %v5260_v37  ;;  %v4193_v37 = vadd.f32 %v4192_v12, %v5244_v10  ;;  %v1753_v1 = vadd.f32 %v4245_v24, %v4205_v11 }
 0x11f   : > { %5511 = vst [vmem:[#allocation6_spill] sm:$0xff] %v5258_v36  ;;  %v4268_v39 = vpop.f32.mrf.mxu0  ;;  %v1758_v25 = vadd.f32 %v4248_v18, %v4208_v17 }
 0x120   : > { %v5262_v38 = vpop.f32.mrf.mxu1 }
 0x121   : > { %5513 = vst [vmem:[#allocation8_spill] sm:$0xff] %v5262_v38  ;;  %v4269_v41 = vpop.f32.mrf.mxu0 }
 0x122   : > { %v4308_v40 = vpop.f32.mrf.mxu1  ;;  %v4270_v38 = vadd.f32 %v4269_v41, %v4268_v39  ;;  %v1737_v39 = vadd.f32 %v4233_v33, %v4193_v37  ;;  %v1750_v41 = vadd.f32 %v4242_v15, %v4202_v14 }
 0x123   : > { %v4271_v43 = vpop.f32.mrf.mxu0 }
 0x124   : > { %v4309_v42 = vpop.f32.mrf.mxu1  ;;  %v1799_v19 = vadd.f32 %v4270_v38, %v1734_v35 }
 0x125   : > { %v4272_v45 = vpop.f32.mrf.mxu0  ;;  %v4310_v20 = vadd.f32 %v4309_v42, %v4308_v40  ;;  %v5517_v29 = vld [vmem:[#allocation7_spill] sm:$0xff]  ;;  %v5283_v40 = vld [vmem:[%s5506_s4] ss:$0 sm:$0xff] }
 0x126   : > { %v5264_v44 = vpop.f32.mrf.mxu1  ;;  %v5518_v31 = vld [vmem:[#allocation6_spill] sm:$0xff] }
 0x127   : > { %5514 = vst [vmem:[#allocation9_spill] sm:$0xff] %v5264_v44  ;;  %v4274_v47 = vpop.f32.mrf.mxu0  ;;  %v1742_v44 = vadd.f32 %v4236_v61, %v4196_v60 }
 0x128   : > { %v4312_v46 = vpop.f32.mrf.mxu1  ;;  %v5519_v32 = vld [vmem:[#allocation8_spill] sm:$0xff] }
 0x129   : > { %v4275_v49 = vpop.f32.mrf.mxu0  ;;  %v4251_v33 = vadd.f32 %v5519_v32, %v5518_v31 }
 0x12a   : > { %v4314_v48 = vpop.f32.mrf.mxu1  ;;  %v4276_v2 = vadd.f32 %v4275_v49, %v4274_v47  ;;  %v4273_v49 = vadd.f32 %v4272_v45, %v4271_v43  ;;  %v1864_v45 = vadd.f32 %v4310_v20, %v1799_v19 }
 0x12b   : > { %v4277_v51 = vpop.f32.mrf.mxu0 }
 0x12c   : > { %v4315_v50 = vpop.f32.mrf.mxu1 }
 0x12d   : > { %v4278_v53 = vpop.f32.mrf.mxu0  ;;  %v4316_v7 = vadd.f32 %v4315_v50, %v4314_v48  ;;  %v1802_v48 = vadd.f32 %v4273_v49, %v1737_v39 }
 0x12e   : > { %v4317_v52 = vpop.f32.mrf.mxu1  ;;  %v4279_v8 = vadd.f32 %v4278_v53, %v4277_v51  ;;  %v5520_v27 = vld [vmem:[#allocation9_spill] sm:$0xff] }
 0x12f   : > { %v4280_v55 = vpop.f32.mrf.mxu0  ;;  %v4313_v42 = vadd.f32 %v4312_v46, %v5520_v27  ;;  %v5289_v51 = vld [vmem:[%s5507_s5] ss:$0 sm:$0xff] }
 0x130   : > { %v4318_v54 = vpop.f32.mrf.mxu1  ;;  %v1810_v13 = vadd.f32 %v4279_v8, %v1745_v34 }
 0x131   : > { %v4281_v57 = vpop.f32.mrf.mxu0  ;;  %v4319_v21 = vadd.f32 %v4318_v54, %v4317_v52 }
 0x132   : > { %v4320_v56 = vpop.f32.mrf.mxu1  ;;  %v4282_v10 = vadd.f32 %v4281_v57, %v4280_v55 }
 0x133   : > { %v4283_v59 = vpop.f32.mrf.mxu0  ;;  %v1875_v57 = vadd.f32 %v4319_v21, %v1810_v13 }
 0x134   : > { %v4321_v58 = vpop.f32.mrf.mxu1  ;;  %v1815_v26 = vadd.f32 %v4282_v10, %v1750_v41 }
 0x135   : > { %v4284_v63 = vpop.f32.mrf.mxu0  ;;  %v4322_v28 = vadd.f32 %v4321_v58, %v4320_v56 }
 0x136   : > { %v5266_v62 = vpop.f32.mrf.mxu1  ;;  %v4285_v61 = vadd.f32 %v4284_v63, %v4283_v59 }
 0x137   : > { %5515 = vst [vmem:[#allocation10_spill] sm:$0xff] %v5266_v62  ;;  %v4286_v6 = vpop.f32.mrf.mxu0  ;;  %v1807_v62 = vadd.f32 %v4276_v2, %v1742_v44  ;;  %v5516_v44 = vld [vmem:[#allocation5_spill] sm:$0xff]  ;;  %v1880_v15 = vadd.f32 %v4322_v28, %v1815_v26 }
 0x138   : > { %v5268_v3 = vpop.f32.mrf.mxu1  ;;  %v4211_v30 = vadd.f32 %v5517_v29, %v5516_v44  ;;  %v1818_v63 = vadd.f32 %v4285_v61, %v1753_v1 }
 0x139   : > { %v4287_v16 = vpop.f32.mrf.mxu0  ;;  %v1872_v23 = vadd.f32 %v4316_v7, %v1807_v62 }
 0x13a   : > { %v4326_v36 = vpop.f32.mrf.mxu1  ;;  %v4288_v37 = vadd.f32 %v4287_v16, %v4286_v6  ;;  %v1761_v60 = vadd.f32 %v4251_v33, %v4211_v30  ;;  %v1867_v6 = vadd.f32 %v4313_v42, %v1802_v48 }
 0x13b   : > { %v4289_v47 = vpop.f32.mrf.mxu0 }
 0x13c   : > { %v4327_v9 = vpop.f32.mrf.mxu1  ;;  %v1823_v46 = vadd.f32 %v4288_v37, %v1758_v25 }
 0x13d   : > { %v4290_v12 = vpop.f32.mrf.mxu0  ;;  %v4328_v62 = vadd.f32 %v4327_v9, %v4326_v36 }
 0x13e   : > { %v4329_v22 = vpop.f32.mrf.mxu1  ;;  %v4291_v50 = vadd.f32 %v4290_v12, %v4289_v47  ;;  %v5521_v36 = vld [vmem:[#allocation10_spill] sm:$0xff] }
 0x13f   : > { %v4534_v38 = vpop.f32.mrf.mxu0  ;;  %v4325_v7 = vadd.f32 %v5268_v3, %v5521_v36  ;;  %v1888_v9 = vadd.f32 %v4328_v62, %v1823_v46 }
 0x140   : > { %v1937_v43 = vadd.f32 %v4534_v38, %v1872_v23  ;;  %v4330_v53 = vpop.f32.mrf.mxu1  ;;  %v1826_v4 = vadd.f32 %v4291_v50, %v1761_v60 }
 0x141   : > { %v1928_v52 = vpop.f32.mrf.mxu0  ;;  %v4331_v5 = vadd.f32 %v4330_v53, %v4329_v22  ;;  %v1883_v29 = vadd.f32 %v4325_v7, %v1818_v63 }
 0x142   : > { %v1968_v54 = vmul.f32 %v5283_v40, %v1937_v43  ;;  %v1929_v55 = vadd.f32 %v1928_v52, %v1864_v45 }
 0x143   : > { %v4535_v0 = vpop.f32.mrf.mxu0  ;;  %v1891_v41 = vadd.f32 %v4331_v5, %v1826_v4 }
 0x144   : > { %v1983_v56 = vadd.f32 %v5289_v51, %v1968_v54  ;;  %v1966_v58 = vmul.f32 %v5283_v40, %v1929_v55  ;;  %v1940_v2 = vadd.f32 %v4535_v0, %v1875_v57 }
 0x145   : > { %v1931_v14 = vpop.f32.mrf.mxu0 }
 0x146   : > { %vm1991_vm8 = vcmp.ge.f32.partialorder %v1983_v56, 0.0  ;;  %v1999_v16 = vmul.f32 0.1, %v1983_v56  ;;  %v1981_v35 = vadd.f32 %v5289_v51, %v1966_v58  ;;  %v1969_v59 = vmul.f32 %v5283_v40, %v1940_v2 }
 0x147   : > { %v1932_v8 = vadd.f32 %v1931_v14, %v1867_v6  ;;  %v4538_v34 = vpop.f32.mrf.mxu0 }
 0x148   : > { %v2007_v47 = vsel %vm1991_vm8, %v1983_v56, %v1999_v16  ;;  %vm1989_vm9 = vcmp.ge.f32.partialorder %v1981_v35, 0.0  ;;  %v1997_v17 = vmul.f32 0.1, %v1981_v35  ;;  %v1984_v18 = vadd.f32 %v5289_v51, %v1969_v59 }
 0x149   : > { %2016 = vst [vmem:[#allocation3 + $0x31] sm:$0xff] %v2007_v47  ;;  %v1967_v19 = vmul.f32 %v5283_v40, %v1932_v8  ;;  %v1953_v20 = vadd.f32 %v4538_v34, %v1888_v9  ;;  %v1944_v39 = vpop.f32.mrf.mxu0  ;;  %v4111_v49 = vpack.c.bf16 %v2007_v47, %v2007_v47 }
 0x14a   : > { %v2005_v10 = vsel %vm1989_vm9, %v1981_v35, %v1997_v17  ;;  %vm1992_vm10 = vcmp.ge.f32.partialorder %v1984_v18, 0.0  ;;  %v2000_v12 = vmul.f32 0.1, %v1984_v18  ;;  %v1945_v11 = vadd.f32 %v1944_v39, %v1880_v15 }
 0x14b   : > { %2014 = vst [vmem:[#allocation3 + $0x11] sm:$0xff] %v2005_v10  ;;  %v1982_v3 = vadd.f32 %v5289_v51, %v1967_v19  ;;  %v1972_v13 = vmul.f32 %v5283_v40, %v1953_v20  ;;  %v4539_v21 = vpop.f32.mrf.mxu0  ;;  %v4109_v22 = vpack.c.bf16 %v2005_v10, %v2005_v10  ;;  %2113 = vst [vmem:[#allocation4 + $0x70] sm:$0xf] %v4111_v49 }
 0x14c   : > { %2400 = vst [vmem:[#allocation4 + $0x40] sm:$0xf] %v4111_v49  ;;  %2256 = vst [vmem:[#allocation4 + $0x58] sm:$0xf] %v4111_v49  ;;  %v2008_v23 = vsel %vm1992_vm10, %v1984_v18, %v2000_v12  ;;  %v1970_v24 = vmul.f32 %v5283_v40, %v1945_v11  ;;  %v1956_v44 = vadd.f32 %v4539_v21, %v1891_v41  ;;  %v4727_v18 = vld [vmem:[%s5508_s6 + $0x138] sm:$0xff]   ;;  %v4733_v41 = vld [vmem:[%s5508_s6 + $0x170] sm:$0xff]  }
 0x14d   : > { %2017 = vst [vmem:[#allocation3 + $0x41] sm:$0xff] %v2008_v23  ;;  %vm1990_vm11 = vcmp.ge.f32.partialorder %v1982_v3, 0.0  ;;  %v1998_v30 = vmul.f32 0.1, %v1982_v3  ;;  %v1987_v31 = vadd.f32 %v5289_v51, %v1972_v13  ;;  %v1947_v32 = vpop.f32.mrf.mxu0  ;;  %2111 = vst [vmem:[#allocation4 + $0x28] sm:$0xf] %v4109_v22  ;;  %v4112_v33 = vpack.c.bf16 %v2008_v23, %v2008_v23 }
 0x14e   : > { %2254 = vst [vmem:[#allocation4 + $0x10] sm:$0xf] %v4109_v22  ;;  %v1985_v37 = vadd.f32 %v5289_v51, %v1970_v24  ;;  %v1973_v38 = vmul.f32 %v5283_v40, %v1956_v44  ;;  %v1948_v25 = vadd.f32 %v1947_v32, %v1883_v29  ;;  %v4737_v23 = vld [vmem:[%s5508_s6 + $0x130] sm:$0xff]   ;;  %v4738_v44 = vld [vmem:[%s5508_s6 + $0x1b8] sm:$0xff]   ;;  %v4739_v32 = vld [vmem:[%s5508_s6 + $0x168] sm:$0xff]  }
 0x14f   : > { %v2006_v27 = vsel %vm1990_vm11, %v1982_v3, %v1998_v30  ;;  %vm1995_vm12 = vcmp.ge.f32.partialorder %v1987_v31, 0.0  ;;  %v2003_v42 = vmul.f32 0.1, %v1987_v31  ;;  %2114 = vst [vmem:[#allocation4 + $0x94] sm:$0xf] %v4112_v33 }
 0x150   : > { %2257 = vst [vmem:[#allocation4 + $0x7c] sm:$0xf] %v4112_v33  ;;  %2401 = vst [vmem:[#allocation4 + $0x64] sm:$0xf] %v4112_v33  ;;  %v2025_v43 = vld [vmem:[#allocation3 + $0x30] sm:$0xff]  ;;  %vm1993_vm13 = vcmp.ge.f32.partialorder %v1985_v37, 0.0  ;;  %v1988_v26 = vadd.f32 %v5289_v51, %v1973_v38  ;;  %v1971_v28 = vmul.f32 %v5283_v40, %v1948_v25  ;;  %v4110_v53 = vpack.c.bf16 %v2006_v27, %v2006_v27 }
 0x151   : > { %v2121_v45 = vld [vmem:[#allocation3 + $0x32] sm:$0xff]  ;;  %2015 = vst [vmem:[#allocation3 + $0x21] sm:$0xff] %v2006_v27  ;;  %v2001_v48 = vmul.f32 0.1, %v1985_v37  ;;  %v2011_v50 = vsel %vm1995_vm12, %v1987_v31, %v2003_v42  ;;  %v4103_v52 = vpack.c.bf16 %v2025_v43, %v2025_v43  ;;  %v4743_v38 = vld [vmem:[%s5508_s6 + $0x128] sm:$0xff]   ;;  %v4746_v43 = vld [vmem:[%s5508_s6 + $0x160] sm:$0xff]  }
 0x152   : > { %v4119_v54 = vpack.c.bf16 %v2121_v45, %v2121_v45  ;;  %v2023_v55 = vld [vmem:[#allocation3 + $0x10] sm:$0xff]  ;;  %2020 = vst [vmem:[#allocation3 + $0x71] sm:$0xff] %v2011_v50  ;;  %vm1996_vm14 = vcmp.ge.f32.partialorder %v1988_v26, 0.0  ;;  %v2004_v61 = vmul.f32 0.1, %v1988_v26  ;;  %v1986_v46 = vadd.f32 %v5289_v51, %v1971_v28  ;;  %v4751_v28 = vld [vmem:[%s5508_s6 + $0x1a8] sm:$0xff]  }
 0x153   : > { %v2119_v57 = vld [vmem:[#allocation3 + $0x12] sm:$0xff]  ;;  %v2009_v60 = vsel %vm1993_vm13, %v1985_v37, %v2001_v48  ;;  %v4101_v62 = vpack.c.bf16 %v2023_v55, %v2023_v55  ;;  %2065 = vst [vmem:[#allocation4 + $0x6c] sm:$0xf] %v4103_v52  ;;  %2112 = vst [vmem:[#allocation4 + $0x4c] sm:$0xf] %v4110_v53  ;;  %v4115_v1 = vpack.c.bf16 %v2011_v50, %v2011_v50  ;;  %v4747_v48 = vld [vmem:[%s5508_s6 + $0x1e8] sm:$0xff]  }
 0x154   : > { %2018 = vst [vmem:[#allocation3 + $0x51] sm:$0xff] %v2009_v60  ;;  %v4117_v0 = vpack.c.bf16 %v2119_v57, %v2119_v57  ;;  %2161 = vst [vmem:[#allocation4 + $0x74] sm:$0xf] %v4119_v54  ;;  %v4113_v40 = vpack.c.bf16 %v2009_v60, %v2009_v60  ;;  %v2026_v56 = vld [vmem:[#allocation3 + $0x40] sm:$0xff]  ;;  %v2012_v2 = vsel %vm1996_vm14, %v1988_v26, %v2004_v61  ;;  %vm1994_vm15 = vcmp.ge.f32.partialorder %v1986_v46, 0.0  ;;  %v4740_v33 = vld [vmem:[%s5508_s6 + $0x1f0] sm:$0xff]  }
 0x155   : > { %2208 = vst [vmem:[#allocation4 + $0x54] sm:$0xf] %v4103_v52  ;;  %2255 = vst [vmem:[#allocation4 + $0x34] sm:$0xf] %v4110_v53  ;;  %v2122_v58 = vld [vmem:[#allocation3 + $0x42] sm:$0xff]  ;;  %v4127_v5 = vpack.c.bf16 %v2026_v56, %v2026_v56  ;;  %v4139_v6 = vpack.c.bf16 %v2012_v2, %v2012_v2  ;;  %v4744_v27 = vld [vmem:[%s5508_s6 + $0x1b0] sm:$0xff]  }
 0x156   : > { %2352 = vst [vmem:[#allocation4 + $0x3c] sm:$0xf] %v4103_v52  ;;  %2399 = vst [vmem:[#allocation4 + $0x1c] sm:$0xf] %v4110_v53  ;;  %v2002_v51 = vmul.f32 0.1, %v1986_v46  ;;  %v4166_v4 = vpack.c.bf16 %v2122_v58, %v2122_v58 }
 0x157   : > { %2304 = vst [vmem:[#allocation4 + $0x5c] sm:$0xf] %v4119_v54  ;;  %2448 = vst [vmem:[#allocation4 + $0x44] sm:$0xf] %v4119_v54  ;;  %v4723_v10 = vld [vmem:[#allocation4 + $0x4] ss:$36 sps:$4 sm:$0xff]  }
 0x158   : > { %2021 = vst [vmem:[#allocation3 + $0x81] sm:$0xff] %v2012_v2  ;;  %2063 = vst [vmem:[#allocation4 + $0x24] sm:$0xf] %v4101_v62  ;;  %v2010_v14 = vsel %vm1994_vm15, %v1986_v46, %v2002_v51  ;;  %v2024_v15 = vld [vmem:[#allocation3 + $0x20] sm:$0xff]  ;;  %3287 = vmatprep.mubr.bf16.mxu1 %v4723_v10  ;;  %v4752_v50 = vld [vmem:[%s5508_s6 + $0x158] sm:$0xff]  }
 0x159   : > { %2159 = vst [vmem:[#allocation4 + $0x2c] sm:$0xf] %v4117_v0  ;;  %2206 = vst [vmem:[#allocation4 + $0xc] sm:$0xf] %v4101_v62  ;;  %v2120_v16 = vld [vmem:[#allocation3 + $0x22] sm:$0xff]  ;;  %v4114_v35 = vpack.c.bf16 %v2010_v14, %v2010_v14  ;;  %v4102_v59 = vpack.c.bf16 %v2024_v15, %v2024_v15  ;;  %v2029_v36 = vld [vmem:[#allocation3 + $0x70] sm:$0xff] }
 0x15a   : > { %2115 = vst [vmem:[#allocation4 + $0xb8] sm:$0xf] %v4113_v40  ;;  %2117 = vst [vmem:[#allocation4 + $0x100] sm:$0xf] %v4115_v1  ;;  %v4118_v63 = vpack.c.bf16 %v2120_v16, %v2120_v16  ;;  %v2125_v7 = vld [vmem:[#allocation3 + $0x72] sm:$0xff]  ;;  %v4107_v34 = vpack.c.bf16 %v2029_v36, %v2029_v36  ;;  %v4750_v26 = vld [vmem:[%s5508_s6 + $0x120] sm:$0xff]  }
 0x15b   : > { %2302 = vst [vmem:[#allocation4 + $0x14] sm:$0xf] %v4117_v0  ;;  %2402 = vst [vmem:[#allocation4 + $0x88] sm:$0xf] %v4113_v40  ;;  %v2027_v8 = vld [vmem:[#allocation3 + $0x50] sm:$0xff]  ;;  %v4123_v47 = vpack.c.bf16 %v2125_v7, %v2125_v7  ;;  %v4753_v52 = vld [vmem:[%s5508_s6 + $0x1e0] sm:$0xff]  }
 0x15c   : > { %2258 = vst [vmem:[#allocation4 + $0xa0] sm:$0xf] %v4113_v40  ;;  %2404 = vst [vmem:[#allocation4 + $0xd0] sm:$0xf] %v4115_v1  ;;  %v2123_v9 = vld [vmem:[#allocation3 + $0x52] sm:$0xff]  ;;  %v4105_v19 = vpack.c.bf16 %v2027_v8, %v2027_v8  ;;  %v4757_v46 = vld [vmem:[%s5508_s6 + $0x1a0] sm:$0xff]  }
 0x15d   : > { %2260 = vst [vmem:[#allocation4 + $0xe8] sm:$0xf] %v4115_v1  ;;  %2449 = vst [vmem:[#allocation4 + $0x68] sm:$0xf] %v4166_v4  ;;  %v4167_v17 = vpack.c.bf16 %v2123_v9, %v2123_v9  ;;  %v4728_v24 = vld [vmem:[#allocation4 + $0x4c] ss:$36 sps:$4 sm:$0xff]  }
 0x15e   : > { %2019 = vst [vmem:[#allocation3 + $0x61] sm:$0xff] %v2010_v14  ;;  %2209 = vst [vmem:[#allocation4 + $0x78] sm:$0xf] %v4127_v5  ;;  %v2470_v25 = vld [vmem:[#allocation4 + $0x6c] sm:$0xff]  ;;  %v4756_v55 = vld [vmem:[%s5508_s6 + $0x118] sm:$0xff]  }
 0x15f   : > { %2066 = vst [vmem:[#allocation4 + $0x90] sm:$0xf] %v4127_v5  ;;  %2162 = vst [vmem:[#allocation4 + $0x98] sm:$0xf] %v4166_v4  ;;  %v2173_v20 = vld [vmem:[#allocation3 + $0x80] sm:$0xff]  ;;  %v4759_v62 = vld [vmem:[%s5508_s6 + $0x150] sm:$0xff]  }
 0x160   : > { %2305 = vst [vmem:[#allocation4 + $0x80] sm:$0xf] %v4166_v4  ;;  %2353 = vst [vmem:[#allocation4 + $0x60] sm:$0xf] %v4127_v5  ;;  %v2269_v39 = vld [vmem:[#allocation3 + $0x82] sm:$0xff]  ;;  %v4131_v12 = vpack.c.bf16 %v2173_v20, %v2173_v20  ;;  %v4760_v40 = vld [vmem:[%s5508_s6 + $0x1d8] sm:$0xff]  }
 0x161   : > { %2261 = vst [vmem:[#allocation4 + $0x10c] sm:$0xf] %v4139_v6  ;;  %2405 = vst [vmem:[#allocation4 + $0xf4] sm:$0xf] %v4139_v6  ;;  %v4721_v49 = vld [vmem:[#allocation4] ss:$36 sps:$4 sm:$0xff]   ;;  %v4147_v11 = vpack.c.bf16 %v2269_v39, %v2269_v39 }
 0x162   : > { %2116 = vst [vmem:[#allocation4 + $0xdc] sm:$0xf] %v4114_v35  ;;  %2259 = vst [vmem:[#allocation4 + $0xc4] sm:$0xf] %v4114_v35  ;;  %3288 = vmatmul.mubr.bf16.vlgmr.msra.gmra.mxu1 %v4721_v49  ;;  %v4730_v29 = vld [vmem:[#allocation4 + $0x8] ss:$36 sps:$4 sm:$0xff]  }
 0x163   : > { %2403 = vst [vmem:[#allocation4 + $0xac] sm:$0xf] %v4114_v35  ;;  %2064 = vst [vmem:[#allocation4 + $0x48] sm:$0xf] %v4102_v59  ;;  %4425 = vmatpush3.bf16.msra.mxu1 %v4727_v18  ;;  %3295 = vmatprep.mubr.bf16.mxu1 %v4728_v24  ;;  %v4741_v45 = vld [vmem:[#allocation4 + $0x94] ss:$36 sps:$4 sm:$0xff]  }
 0x164   : > { %2207 = vst [vmem:[#allocation4 + $0x30] sm:$0xf] %v4102_v59  ;;  %2160 = vst [vmem:[#allocation4 + $0x50] sm:$0xf] %v4118_v63  ;;  %4426 = vmatprep.subr.bf16.mxu1 %v4733_v41  ;;  %v4763_v1 = vld [vmem:[%s5508_s6 + $0x110] sm:$0xff]   ;;  %v4764_v56 = vld [vmem:[%s5508_s6 + $0x198] sm:$0xff]  }
 0x165   : > { %2303 = vst [vmem:[#allocation4 + $0x38] sm:$0xf] %v4118_v63  ;;  %2351 = vst [vmem:[#allocation4 + $0x18] sm:$0xf] %v4102_v59  ;;  %v2028_v3 = vld [vmem:[#allocation3 + $0x60] sm:$0xff]  ;;  %v4765_v58 = vld [vmem:[%s5508_s6 + $0x148] sm:$0xff]  }
 0x166   : > { %2447 = vst [vmem:[#allocation4 + $0x20] sm:$0xf] %v4118_v63  ;;  %2069 = vst [vmem:[#allocation4 + $0xfc] sm:$0xf] %v4107_v34  ;;  %v2124_v13 = vld [vmem:[#allocation3 + $0x62] sm:$0xff]  ;;  %v4129_v21 = vpack.c.bf16 %v2028_v3, %v2028_v3  ;;  %v2475_v60 = vld [vmem:[#allocation4 + $0x90] sm:$0xff] }
 0x167   : > { %2165 = vst [vmem:[#allocation4 + $0x104] sm:$0xf] %v4123_v47  ;;  %2212 = vst [vmem:[#allocation4 + $0xe4] sm:$0xf] %v4107_v34  ;;  %v4122_v22 = vpack.c.bf16 %v2124_v13, %v2124_v13  ;;  %v4735_v37 = vld [vmem:[#allocation4 + $0x54] ss:$36 sps:$4 sm:$0xff]   ;;  %4427 = vmatpush3.bf16.msra.mxu1 %v4737_v23 }
 0x168   : > { %2356 = vst [vmem:[#allocation4 + $0xcc] sm:$0xf] %v4107_v34  ;;  %2308 = vst [vmem:[#allocation4 + $0xec] sm:$0xf] %v4123_v47  ;;  %4428 = vmatprep.subr.bf16.mxu1 %v4739_v32  ;;  %v4766_v4 = vld [vmem:[%s5508_s6 + $0x1d0] sm:$0xff]   ;;  %v4767_v14 = vld [vmem:[%s5508_s6 + $0x108] sm:$0xff]  }
 0x169   : > { %2452 = vst [vmem:[#allocation4 + $0xd4] sm:$0xf] %v4123_v47  ;;  %2450 = vst [vmem:[#allocation4 + $0x8c] sm:$0xf] %v4167_v17  ;;  %v4754_v0 = vld [vmem:[#allocation4 + $0xdc] ss:$36 sps:$4 sm:$0xff]  }
 0x16a   : > { %2067 = vst [vmem:[#allocation4 + $0xb4] sm:$0xf] %v4105_v19  ;;  %2163 = vst [vmem:[#allocation4 + $0xbc] sm:$0xf] %v4167_v17  ;;  %v2465_v31 = vld [vmem:[#allocation4 + $0x48] sm:$0xff]  ;;  %v4771_v16 = vld [vmem:[%s5508_s6 + $0x190] sm:$0xff]  }
 0x16b   : > { %2210 = vst [vmem:[#allocation4 + $0x9c] sm:$0xf] %v4105_v19  ;;  %2354 = vst [vmem:[#allocation4 + $0x84] sm:$0xf] %v4105_v19  ;;  %v4732_v30 = vld [vmem:[#allocation4 + $0xc] ss:$36 sps:$4 sm:$0xff]   ;;  %v3925_v42 = vcombine.low %v2465_v31, %v2470_v25  ;;  %4429 = vmatpush3.bf16.msra.mxu1 %v4743_v38 }
 0x16c   : > { %2306 = vst [vmem:[#allocation4 + $0xa4] sm:$0xf] %v4167_v17  ;;  %2213 = vst [vmem:[#allocation4 + $0x108] sm:$0xf] %v4131_v12  ;;  %3352 = vmatprep.mubr.bf16.mxu0 %v4732_v30  ;;  %4430 = vmatprep.subr.bf16.mxu1 %v4746_v43  ;;  %v4745_v54 = vld [vmem:[#allocation4 + $0x50] ss:$36 sps:$4 sm:$0xff]  }
 0x16d   : > { %2309 = vst [vmem:[#allocation4 + $0x110] sm:$0xf] %v4147_v11  ;;  %2357 = vst [vmem:[#allocation4 + $0xf0] sm:$0xf] %v4131_v12  ;;  %3353 = vmatmul.mubr.bf16.vlgmr.msra.gmra.mxu0 %v4730_v29  ;;  %3296 = vmatmul.mubr.bf16.gmra.mxu1 %v3925_v42  ;;  %v2490_v6 = vld [vmem:[#allocation4 + $0xfc] sm:$0xff]  ;;  %v4774_v63 = vld [vmem:[%s5508_s6 + $0x1c8] sm:$0xff]  }
 0x16e   : > { %2453 = vst [vmem:[#allocation4 + $0xf8] sm:$0xf] %v4147_v11  ;;  %2211 = vst [vmem:[#allocation4 + $0xc0] sm:$0xf] %v4129_v21  ;;  %3360 = vmatprep.mubr.bf16.mxu0 %v4735_v37  ;;  %4465 = vmatpush3.bf16.msra.mxu0 %v4738_v44  ;;  %v4773_v35 = vld [vmem:[%s5508_s6 + $0x140] sm:$0xff]   ;;  %v4776_v7 = vld [vmem:[%s5508_s6 + $0x188] sm:$0xff]  }
 0x16f   : > { %2068 = vst [vmem:[#allocation4 + $0xd8] sm:$0xf] %v4129_v21  ;;  %2164 = vst [vmem:[#allocation4 + $0xe0] sm:$0xf] %v4122_v22  ;;  %4466 = vmatprep.subr.bf16.mxu0 %v4740_v33  ;;  %3303 = vmatprep.mubr.bf16.mxu1 %v4741_v45  ;;  %v4770_v59 = vld [vmem:[#allocation4 + $0x14] ss:$36 sps:$4 sm:$0xff]  }
 0x170   : > { %2307 = vst [vmem:[#allocation4 + $0xc8] sm:$0xf] %v4122_v22  ;;  %2355 = vst [vmem:[#allocation4 + $0xa8] sm:$0xf] %v4129_v21  ;;  %4431 = vmatpush3.bf16.msra.mxu1 %v4750_v26  ;;  %v4775_v36 = vld [vmem:[%s5508_s6 + $0x100] sm:$0xff]   ;;  %v4781_v34 = vld [vmem:[%s5508_s6 + $0x238] sm:$0xff]  }
 0x171   : > { %2451 = vst [vmem:[#allocation4 + $0xb0] sm:$0xf] %v4122_v22  ;;  %v2480_v53 = vld [vmem:[#allocation4 + $0xb4] sm:$0xff]  ;;  %4432 = vmatprep.subr.bf16.mxu1 %v4752_v50  ;;  %v4780_v9 = vld [vmem:[%s5508_s6 + $0x1c0] sm:$0xff]   ;;  %v4788_v39 = vld [vmem:[%s5508_s6 + $0x228] sm:$0xff]  }
 0x172   : > { %4467 = vmatpush3.bf16.msra.mxu0 %v4744_v27  ;;  %v3934_v61 = vcombine.low %v2475_v60, %v2480_v53  ;;  %v4758_v51 = vld [vmem:[#allocation4 + $0x98] ss:$36 sps:$4 sm:$0xff]   ;;  %v4768_v17 = vld [vmem:[#allocation4 + $0x10] ss:$36 sps:$4 sm:$0xff]   ;;  %v4784_v18 = vld [vmem:[%s5508_s6 + $0x180] sm:$0xff]  }
 0x173   : > { %4468 = vmatprep.subr.bf16.mxu0 %v4747_v48  ;;  %v4761_v5 = vld [vmem:[#allocation4 + $0xe4] ss:$36 sps:$4 sm:$0xff]   ;;  %v4779_v47 = vld [vmem:[#allocation4 + $0x1c] ss:$36 sps:$4 sm:$0xff]   ;;  %v4785_v19 = vld [vmem:[%s5508_s6 + $0x230] sm:$0xff]  }
 0x174   : > { %4433 = vmatpush3.bf16.msra.mxu1 %v4756_v55  ;;  %v4782_v20 = vld [vmem:[#allocation4 + $0x5c] ss:$36 sps:$4 sm:$0xff]   ;;  %v4786_v10 = vld [vmem:[#allocation4 + $0x64] ss:$36 sps:$4 sm:$0xff]   ;;  %v4793_v24 = vld [vmem:[#allocation4 + $0xac] ss:$36 sps:$4 sm:$0xff]  }
 0x175   : > { %v4748_v57 = vld [vmem:[#allocation4 + $0x9c] ss:$36 sps:$4 sm:$0xff]   ;;  %3361 = vmatmul.mubr.bf16.gmra.mxu0 %v4745_v54  ;;  %3304 = vmatmul.mubr.bf16.gmra.mxu1 %v3934_v61  ;;  %v4799_v30 = vld [vmem:[%s5508_s6 + $0x210] sm:$0xff]   ;;  %v4803_v32 = vld [vmem:[%s5508_s6 + $0x208] sm:$0xff]  }
 0x176   : > { %3368 = vmatprep.mubr.bf16.mxu0 %v4748_v57  ;;  %4469 = vmatpush3.bf16.msra.mxu0 %v4751_v28  ;;  %v2485_v2 = vld [vmem:[#allocation4 + $0xd8] sm:$0xff]  ;;  %v4772_v8 = vld [vmem:[#allocation4 + $0xe0] ss:$36 sps:$4 sm:$0xff]   ;;  %v4796_v31 = vld [vmem:[#allocation4 + $0xec] ss:$36 sps:$4 sm:$0xff]  }
 0x177   : > { %4470 = vmatprep.subr.bf16.mxu0 %v4753_v52  ;;  %3311 = vmatprep.mubr.bf16.mxu1 %v4754_v0  ;;  %v3943_v15 = vcombine.low %v2485_v2, %v2490_v6  ;;  %v4777_v41 = vld [vmem:[#allocation4 + $0x18] ss:$36 sps:$4 sm:$0xff]   ;;  %v4792_v3 = vld [vmem:[%s5508_s6 + $0x220] sm:$0xff]   ;;  %v4798_v33 = vld [vmem:[#allocation4 + $0xa8] ss:$36 sps:$4 sm:$0xff]  }
 0x178   : > { %4434 = vmatprep.subr.bf16.mxu1 %v4759_v62  ;;  %v2472_v49 = vld [vmem:[#allocation4 + $0x7c] sm:$0xff]  ;;  %v4789_v13 = vld [vmem:[#allocation4 + $0xa4] ss:$36 sps:$4 sm:$0xff]   ;;  %v4800_v37 = vld [vmem:[#allocation4 + $0xf4] ss:$36 sps:$4 sm:$0xff]  }
 0x179   : > { %4435 = vmatpush3.bf16.msra.mxu1 %v4763_v1  ;;  %v2467_v12 = vld [vmem:[#allocation4 + $0x58] sm:$0xff]  ;;  %v2482_v22 = vld [vmem:[#allocation4 + $0xc4] sm:$0xff]  ;;  %v4805_v42 = vld [vmem:[#allocation4 + $0xf0] ss:$36 sps:$4 sm:$0xff]  }
 0x17a   : > { %4471 = vmatpush3.bf16.msra.mxu0 %v4757_v46  ;;  %4436 = vmatprep.subr.bf16.mxu1 %v4765_v58  ;;  %v3929_v11 = vcombine.low %v2467_v12, %v2472_v49  ;;  %v4795_v21 = vld [vmem:[%s5508_s6 + $0x218] sm:$0xff]   ;;  %v4791_v23 = vld [vmem:[#allocation4 + $0x60] ss:$36 sps:$4 sm:$0xff]   ;;  %v4802_v38 = vld [vmem:[#allocation4 + $0xe8] ss:$36 sps:$4 sm:$0xff]  }
 0x17b   : > { %4472 = vmatprep.subr.bf16.mxu0 %v4760_v40  ;;  %v2477_v44 = vld [vmem:[#allocation4 + $0xa0] sm:$0xff]  ;;  %v4807_v43 = vld [vmem:[#allocation4 + $0x68] ss:$36 sps:$4 sm:$0xff]   ;;  %v4808_v45 = vld [vmem:[#allocation4 + $0xb0] ss:$36 sps:$4 sm:$0xff]  }
 0x17c   : > { %v3938_v29 = vcombine.low %v2477_v44, %v2482_v22  ;;  %v4806_v25 = vld [vmem:[%s5508_s6 + $0x200] sm:$0xff]   ;;  %v4809_v48 = vld [vmem:[#allocation4 + $0xf8] ss:$36 sps:$4 sm:$0xff]  }
 0x17d   : > { %3369 = vmatmul.mubr.bf16.gmra.mxu0 %v4758_v51  ;;  %3312 = vmatmul.mubr.bf16.gmra.mxu1 %v3943_v15  ;;  %v4804_v27 = vld [vmem:[#allocation4 + $0x20] ss:$36 sps:$4 sm:$0xff]  }
 0x17e   : > { %3376 = vmatprep.mubr.bf16.mxu0 %v4761_v5  ;;  %4473 = vmatpush3.bf16.msra.mxu0 %v4764_v56 }
 0x17f   : > { %4474 = vmatprep.subr.bf16.mxu0 %v4766_v4  ;;  %4437 = vmatpush3.bf16.msra.mxu1 %v4767_v14 }
 0x180   : > { %3417 = vmatprep.mubr.bf16.mxu1 %v4770_v59  ;;  %4438 = vmatprep.subr.bf16.mxu1 %v4773_v35 }
 0x182   : > { %4475 = vmatpush3.bf16.msra.mxu0 %v4771_v16 }
 0x183   : > { %4476 = vmatprep.subr.bf16.mxu0 %v4774_v63  ;;  %4439 = vmatpush3.bf16.msra.mxu1 %v4775_v36 }
 0x184   : > { %4540 = vmatprep.subr.bf16.mxu1 %v4781_v34 }
 0x185   : > { %3377 = vmatmul.mubr.bf16.gmra.mxu0 %v4772_v8 }
 0x186   : > { %4477 = vmatpush3.bf16.msra.mxu0 %v4776_v7  ;;  %3482 = vmatprep.mubr.bf16.mxu0 %v4779_v47 }
 0x187   : > { %4478 = vmatprep.subr.bf16.mxu0 %v4780_v9  ;;  %3418 = vmatmul.mubr.bf16.vlgmr.msra.gmra.mxu1 %v4768_v17 }
 0x188   : > { %3425 = vmatprep.mubr.bf16.mxu1 %v4782_v20  ;;  %4541 = vmatpush3.bf16.msra.mxu1 %v4781_v34 }
 0x189   : > { %4542 = vmatprep.subr.bf16.mxu1 %v4785_v19 }
 0x18a   : > { %4479 = vmatpush3.bf16.msra.mxu0 %v4784_v18 }
 0x18c   : > { %4543 = vmatpush3.bf16.msra.mxu1 %v4785_v19 }
 0x18d   : > { %3483 = vmatmul.mubr.bf16.vlgmr.msra.gmra.mxu0 %v4777_v41  ;;  %4544 = vmatprep.subr.bf16.mxu1 %v4788_v39 }
 0x18e   : > { %3490 = vmatprep.mubr.bf16.mxu0 %v4786_v10 }
 0x18f   : > { %3426 = vmatmul.mubr.bf16.gmra.mxu1 %v3929_v11 }
 0x190   : > { %3433 = vmatprep.mubr.bf16.mxu1 %v4789_v13  ;;  %4545 = vmatpush3.bf16.msra.mxu1 %v4788_v39 }
 0x191   : > { %4546 = vmatprep.subr.bf16.mxu1 %v4792_v3 }
 0x194   : > { %4547 = vmatpush3.bf16.msra.mxu1 %v4792_v3 }
 0x195   : > { %3491 = vmatmul.mubr.bf16.gmra.mxu0 %v4791_v23  ;;  %4548 = vmatprep.subr.bf16.mxu1 %v4795_v21 }
 0x196   : > { %3498 = vmatprep.mubr.bf16.mxu0 %v4793_v24 }
 0x197   : > { %3434 = vmatmul.mubr.bf16.gmra.mxu1 %v3938_v29 }
 0x198   : > { %3441 = vmatprep.mubr.bf16.mxu1 %v4796_v31  ;;  %4549 = vmatpush3.bf16.msra.mxu1 %v4795_v21 }
 0x199   : > { %4550 = vmatprep.subr.bf16.mxu1 %v4799_v30 }
 0x19c   : > { %4551 = vmatpush3.bf16.msra.mxu1 %v4799_v30 }
 0x19d   : > { %3499 = vmatmul.mubr.bf16.gmra.mxu0 %v4798_v33  ;;  %4552 = vmatprep.subr.bf16.mxu1 %v4803_v32 }
 0x19e   : > { %3506 = vmatprep.mubr.bf16.mxu0 %v4800_v37 }
 0x19f   : > { %3442 = vmatmul.mubr.bf16.gmra.mxu1 %v4802_v38 }
 0x1a0   : > { %4553 = vmatpush3.bf16.msra.mxu1 %v4803_v32  ;;  %4556 = vmatprep.mubr.bf16.mxu1 %v4804_v27 }
 0x1a1   : > { %4554 = vmatprep.subr.bf16.mxu1 %v4806_v25 }
 0x1a4   : > { %4555 = vmatpush3.bf16.msra.mxu1 %v4806_v25 }
 0x1a5   : > { %3507 = vmatmul.mubr.bf16.gmra.mxu0 %v4805_v42 }
 0x1a7   : > { %4557 = vmatmul.mubr.bf16.vlgmr.msra.gmra.mxu1 %v4807_v43 }
 0x1a8   : > { %4560 = vmatprep.mubr.bf16.mxu1 %v4808_v45 }
 0x1af   : > { %4561 = vmatmul.mubr.bf16.gmra.mxu1 %v4809_v48 }
 0x222   : > { %v4360_v26 = vpop.f32.mrf.mxu1 }
 0x224   : > { %v4361_v28 = vpop.f32.mrf.mxu1 }
 0x225   : > { %v4362_v42 = vadd.f32 %v4361_v28, %v4360_v26 }
 0x226   : > { %v5425_v50 = vpop.f32.mrf.mxu1 }
 0x228   : > { %v5427_v53 = vpop.f32.mrf.mxu1 }
 0x22d   : > { %v4400_v52 = vpop.f32.mrf.mxu0  ;;  %v4366_v55 = vpop.f32.mrf.mxu1 }
 0x22f   : > { %v4401_v54 = vpop.f32.mrf.mxu0  ;;  %v4367_v60 = vpop.f32.mrf.mxu1 }
 0x230   : > { %v4402_v33 = vadd.f32 %v4401_v54, %v4400_v52  ;;  %v4368_v38 = vadd.f32 %v4367_v60, %v4366_v55  ;;  %v4365_v60 = vadd.f32 %v5427_v53, %v5425_v50 }
 0x231   : > { %v4403_v57 = vpop.f32.mrf.mxu0  ;;  %v4369_v46 = vpop.f32.mrf.mxu1 }
 0x233   : > { %v4404_v61 = vpop.f32.mrf.mxu0  ;;  %v4370_v0 = vpop.f32.mrf.mxu1 }
 0x235   : > { %v4406_v62 = vpop.f32.mrf.mxu0  ;;  %v5429_v1 = vpop.f32.mrf.mxu1 }
 0x237   : > { %v4407_v40 = vpop.f32.mrf.mxu0  ;;  %v4373_v58 = vpop.f32.mrf.mxu1 }
 0x238   : > { %v4408_v31 = vadd.f32 %v4407_v40, %v4406_v62  ;;  %v4371_v62 = vadd.f32 %v4370_v0, %v4369_v46  ;;  %v4374_v26 = vadd.f32 %v4373_v58, %v5429_v1 }
 0x239   : > { %v4409_v56 = vpop.f32.mrf.mxu0  ;;  %v5431_v51 = vpop.f32.mrf.mxu1 }
 0x23a   : > { %5522 = vst [vmem:[#allocation5_spill] sm:$0xff] %v5431_v51  ;;  %v3363_v45 = vadd.f32 %v4408_v31, %v4368_v38 }
 0x23b   : > { %v4410_v2 = vpop.f32.mrf.mxu0  ;;  %v5433_v5 = vpop.f32.mrf.mxu1 }
 0x23c   : > { %5523 = vst [vmem:[#allocation7_spill] sm:$0xff] %v5433_v5  ;;  %v4411_v48 = vadd.f32 %v4410_v2, %v4409_v56 }
 0x23d   : > { %v4412_v4 = vpop.f32.mrf.mxu0  ;;  %v5435_v14 = vpop.f32.mrf.mxu1 }
 0x23f   : > { %v4413_v6 = vpop.f32.mrf.mxu0  ;;  %v5439_v16 = vpop.f32.mrf.mxu1 }
 0x240   : > { %v4380_v0 = vadd.f32 %v5439_v16, %v5435_v14  ;;  %v4810_v16 = vld [vmem:[%s4977_s26 + $0x10] sm:$0xff] }
 0x241   : > { %v5437_v15 = vpop.f32.mrf.mxu0  ;;  %v5443_v59 = vpop.f32.mrf.mxu1  ;;  %v5532_v31 = vld [vmem:[#allocation5_spill] sm:$0xff] }
 0x242   : > { %5525 = vst [vmem:[#allocation8_spill] sm:$0xff] %v5443_v59  ;;  %v4405_v59 = vadd.f32 %v4404_v61, %v4403_v57 }
 0x243   : > { %v5441_v35 = vpop.f32.mrf.mxu0  ;;  %v5445_v36 = vpop.f32.mrf.mxu1 }
 0x244   : > { %5524 = vst [vmem:[#allocation6_spill] sm:$0xff] %v5441_v35  ;;  %5526 = vst [vmem:[#allocation9_spill] sm:$0xff] %v5445_v36  ;;  %v4414_v35 = vadd.f32 %v4413_v6, %v4412_v4  ;;  %v3358_v61 = vadd.f32 %v4405_v59, %v4365_v60 }
 0x245   : > { %v4418_v63 = vpop.f32.mrf.mxu0 }
 0x246   : > { %v3371_v46 = vadd.f32 %v4414_v35, %v4374_v26  ;;  %v4813_v26 = vld [vmem:[%s4977_s26 + $0x8] sm:$0xff] }
 0x247   : > { %v4419_v7 = vpop.f32.mrf.mxu0  ;;  %v4440_v8 = vpop.f32.mrf.mxu1 }
 0x248   : > { %v4420_v28 = vadd.f32 %v4419_v7, %v4418_v63 }
 0x249   : > { %v5447_v9 = vpop.f32.mrf.mxu0  ;;  %v4441_v34 = vpop.f32.mrf.mxu1 }
 0x24a   : > { %v4442_v5 = vadd.f32 %v4441_v34, %v4440_v8  ;;  %v3366_v8 = vadd.f32 %v4411_v48, %v4371_v62  ;;  %v3379_v7 = vadd.f32 %v4420_v28, %v4380_v0 }
 0x24b   : > { %v5449_v47 = vpop.f32.mrf.mxu0  ;;  %v4443_v17 = vpop.f32.mrf.mxu1 }
 0x24d   : > { %v4480_v18 = vpop.f32.mrf.mxu0  ;;  %v4444_v19 = vpop.f32.mrf.mxu1 }
 0x24e   : > { %v4445_v56 = vadd.f32 %v4444_v19, %v4443_v17 }
 0x24f   : > { %v4481_v20 = vpop.f32.mrf.mxu0  ;;  %v4446_v39 = vpop.f32.mrf.mxu1 }
 0x250   : > { %v4482_v40 = vadd.f32 %v4481_v20, %v4480_v18  ;;  %v3423_v17 = vadd.f32 %v4445_v56, %v3358_v61  ;;  %v5529_v20 = vld [vmem:[#allocation6_spill] sm:$0xff] }
 0x251   : > { %v4483_v41 = vpop.f32.mrf.mxu0  ;;  %v4447_v49 = vpop.f32.mrf.mxu1 }
 0x252   : > { %v4448_v25 = vadd.f32 %v4447_v49, %v4446_v39 }
 0x253   : > { %v4484_v10 = vpop.f32.mrf.mxu0  ;;  %v4449_v12 = vpop.f32.mrf.mxu1 }
 0x254   : > { %v3428_v52 = vadd.f32 %v4448_v25, %v3363_v45  ;;  %v4485_v4 = vadd.f32 %v4484_v10, %v4483_v41  ;;  %v4417_v41 = vadd.f32 %v5529_v20, %v5437_v15  ;;  %v4812_v45 = vld [vmem:[%s4977_s26 + $0x18] sm:$0xff] }
 0x255   : > { %v4486_v11 = vpop.f32.mrf.mxu0  ;;  %v4450_v3 = vpop.f32.mrf.mxu1 }
 0x256   : > { %v4451_v54 = vadd.f32 %v4450_v3, %v4449_v12 }
 0x257   : > { %v4487_v13 = vpop.f32.mrf.mxu0  ;;  %v4452_v21 = vpop.f32.mrf.mxu1 }
 0x258   : > { %v4488_v51 = vadd.f32 %v4487_v13, %v4486_v11  ;;  %v3431_v50 = vadd.f32 %v4451_v54, %v3366_v8  ;;  %v3488_v13 = vadd.f32 %v4485_v4, %v3423_v17 }
 0x259   : > { %v4489_v22 = vpop.f32.mrf.mxu0  ;;  %v4453_v23 = vpop.f32.mrf.mxu1 }
 0x25a   : > { %v3493_v57 = vadd.f32 %v4488_v51, %v3428_v52  ;;  %v4454_v18 = vadd.f32 %v4453_v23, %v4452_v21  ;;  %v4811_v23 = vld [vmem:[%s4977_s26] sm:$0xff] }
 0x25b   : > { %v4490_v24 = vpop.f32.mrf.mxu0  ;;  %v5451_v44 = vpop.f32.mrf.mxu1 }
 0x25c   : > { %5527 = vst [vmem:[#allocation10_spill] sm:$0xff] %v5451_v44  ;;  %v3355_v44 = vadd.f32 %v4402_v33, %v4362_v42  ;;  %v4491_v39 = vadd.f32 %v4490_v24, %v4489_v22  ;;  %v5533_v33 = vld [vmem:[#allocation7_spill] sm:$0xff]  ;;  %v3436_v38 = vadd.f32 %v4454_v18, %v3371_v46 }
 0x25d   : > { %v4492_v29 = vpop.f32.mrf.mxu0  ;;  %v5453_v30 = vpop.f32.mrf.mxu1 }
 0x25e   : > { %5528 = vst [vmem:[#allocation11_spill] sm:$0xff] %v5453_v30  ;;  %v3420_v34 = vadd.f32 %v4442_v5, %v3355_v44  ;;  %v4423_v5 = vadd.f32 %v5449_v47, %v5447_v9  ;;  %v3496_v19 = vadd.f32 %v4491_v39, %v3431_v50  ;;  %v5530_v9 = vld [vmem:[#allocation8_spill] sm:$0xff]  ;;  %v5531_v47 = vld [vmem:[#allocation9_spill] sm:$0xff] }
 0x25f   : > { %v4493_v32 = vpop.f32.mrf.mxu0  ;;  %v4458_v37 = vpop.f32.mrf.mxu1  ;;  %v4383_v10 = vadd.f32 %v5531_v47, %v5530_v9 }
 0x260   : > { %v3485_v63 = vadd.f32 %v4482_v40, %v3420_v34  ;;  %v4494_v12 = vadd.f32 %v4493_v32, %v4492_v29  ;;  %v4814_v34 = vld [vmem:[%s4977_s26 + $0x30] sm:$0xff] }
 0x261   : > { %v5455_v27 = vpop.f32.mrf.mxu0  ;;  %v4459_v43 = vpop.f32.mrf.mxu1  ;;  %v3382_v15 = vadd.f32 %v4423_v5, %v4383_v10 }
 0x262   : > { %v4460_v53 = vadd.f32 %v4459_v43, %v4458_v37  ;;  %v4377_v37 = vadd.f32 %v5533_v33, %v5532_v31  ;;  %v3501_v54 = vadd.f32 %v4494_v12, %v3436_v38 }
 0x263   : > { %v5457_v36 = vpop.f32.mrf.mxu0  ;;  %v4461_v30 = vpop.f32.mrf.mxu1  ;;  %v5534_v25 = vld [vmem:[#allocation10_spill] sm:$0xff] }
 0x264   : > { %v3444_v21 = vadd.f32 %v4460_v53, %v3379_v7  ;;  %v3374_v40 = vadd.f32 %v4417_v41, %v4377_v37 }
 0x265   : > { %v4498_v55 = vpop.f32.mrf.mxu0  ;;  %v4462_v2 = vpop.f32.mrf.mxu1  ;;  %v5535_v29 = vld [vmem:[#allocation11_spill] sm:$0xff] }
 0x266   : > { %v4463_v22 = vadd.f32 %v4462_v2, %v4461_v30  ;;  %v4457_v32 = vadd.f32 %v5535_v29, %v5534_v25 }
 0x267   : > { %v4499_v49 = vpop.f32.mrf.mxu0  ;;  %v4558_v6 = vpop.f32.mrf.mxu1 }
 0x268   : > { %v3558_v58 = vadd.f32 %v4558_v6, %v3493_v57  ;;  %v4500_v14 = vadd.f32 %v4499_v49, %v4498_v55  ;;  %v4497_v55 = vadd.f32 %v5457_v36, %v5455_v27  ;;  %v3447_v60 = vadd.f32 %v4463_v22, %v3382_v15  ;;  %v4815_v36 = vld [vmem:[%s4977_s26 + $0x20] sm:$0xff]  ;;  %v4816_v6 = vld [vmem:[%s4977_s26 + $0x38] sm:$0xff] }
 0x269   : > { %v4501_v1 = vpop.f32.mrf.mxu0  ;;  %v3549_v51 = vpop.f32.mrf.mxu1  ;;  %v3439_v8 = vadd.f32 %v4457_v32, %v3374_v40 }
 0x26a   : > { %v3582_v35 = vadd.f32 %v4810_v16, %v3558_v58  ;;  %v3550_v59 = vadd.f32 %v3549_v51, %v3485_v63  ;;  %v3509_v62 = vadd.f32 %v4500_v14, %v3444_v21 }
 0x26b   : > { %v4502_v11 = vpop.f32.mrf.mxu0  ;;  %v4559_v3 = vpop.f32.mrf.mxu1  ;;  %v3504_v0 = vadd.f32 %v4497_v55, %v3439_v8 }
 0x26c   : > { %3590 = vst [vmem:[%s5471_s14 + $0x10] sm:$0xff] %v3582_v35  ;;  %v3580_v24 = vadd.f32 %v4811_v23, %v3550_v59  ;;  %v3561_v44 = vadd.f32 %v4559_v3, %v3496_v19  ;;  %v4503_v43 = vadd.f32 %v4502_v11, %v4501_v1  ;;  %v4817_v1 = vld [vmem:[%s4977_s26 + $0x28] sm:$0xff] }
 0x26d   : > { %v3552_v42 = vpop.f32.mrf.mxu1 }
 0x26e   : > { %3588 = vst [vmem:[%s5471_s14] sm:$0xff] %v3580_v24  ;;  %v3583_v30 = vadd.f32 %v4812_v45, %v3561_v44  ;;  %v3553_v48 = vadd.f32 %v3552_v42, %v3488_v13  ;;  %v3512_v57 = vadd.f32 %v4503_v43, %v3447_v60 }
 0x26f   : > { %v4562_v52 = vpop.f32.mrf.mxu1 }
 0x270   : > { %3591 = vst [vmem:[%s5471_s14 + $0x18] sm:$0xff] %v3583_v30  ;;  %v3581_v28 = vadd.f32 %v4813_v26, %v3553_v48  ;;  %v3574_v56 = vadd.f32 %v4562_v52, %v3509_v62 }
 0x271   : > { %v3565_v2 = vpop.f32.mrf.mxu1 }
 0x272   : > { %3589 = vst [vmem:[%s5471_s14 + $0x8] sm:$0xff] %v3581_v28  ;;  %v3586_v39 = vadd.f32 %v4814_v34, %v3574_v56  ;;  %v3566_v49 = vadd.f32 %v3565_v2, %v3501_v54 }
 0x273   : > { %v4563_v61 = vpop.f32.mrf.mxu1 }
 0x274   : > { %3594 = vst [vmem:[%s5471_s14 + $0x30] sm:$0xff] %v3586_v39  ;;  %v3584_v27 = vadd.f32 %v4815_v36, %v3566_v49  ;;  %v3577_v46 = vadd.f32 %v4563_v61, %v3512_v57 }
 0x275   : > { %v3568_v4 = vpop.f32.mrf.mxu1 }
 0x276   : > { %3592 = vst [vmem:[%s5471_s14 + $0x20] sm:$0xff] %v3584_v27  ;;  %v3587_v50 = vadd.f32 %v4816_v6, %v3577_v46  ;;  %v3569_v53 = vadd.f32 %v3568_v4, %v3504_v0 }
 0x278   : > { %3595 = vst [vmem:[%s5471_s14 + $0x38] sm:$0xff] %v3587_v50  ;;  %v3585_v58 = vadd.f32 %v4817_v1, %v3569_v53 }
 0x27a   : > { %3593 = vst [vmem:[%s5471_s14 + $0x28] sm:$0xff] %v3585_v58 }
 0x27b PF: > { %s17_s24 = sadd.s32 1, %s4824_s24  }
 0x27c   : > { %p14_p4 = scmp.ge.s32.totalorder %s17_s24, 4  }
 0x27e   :  { %16 = sbr.rel (!%p14_p4) target bundleno = 1 (0x1), region = 84 }

// kernel: network_block_pallas.2
= control target key start
LH: loop header
LB: loop body
LE: loop exit
PB: predicated region body
PF: predicated region fallthrough
CT: control target
= control target key end

     0   :  { %s5538_s27 = smov 0   ;;  %s5540_s28 = smov 0   ;;  %s6399_s0 = inlined_call_operand.vmem [shape: f32[4,2,8,8,128], index: 0, kind: input, shape index: {}]   ;;  %s6400_s1 = inlined_call_operand.vmem [shape: f32[1,128], index: 1, kind: input, shape index: {}]   ;;  %s6401_s2 = inlined_call_operand.vmem [shape: f32[1,128], index: 2, kind: input, shape index: {}]   ;;  %s6402_s3 = inlined_call_operand.vmem [shape: bf16[1152,128], index: 3, kind: input, shape index: {}]   ;;  %s6403_s4 = inlined_call_operand.vmem [shape: f32[1,128], index: 4, kind: input, shape index: {}]   ;;  %s6404_s5 = inlined_call_operand.vmem [shape: f32[1,128], index: 5, kind: input, shape index: {}]   ;;  %s6405_s6 = inlined_call_operand.vmem [shape: bf16[1152,128], index: 6, kind: input, shape index: {}]   ;;  %s6406_s7 = inlined_call_operand.vmem [shape: bf16[128,128], index: 7, kind: input, shape index: {}]   ;;  %s6407_s8 = inlined_call_operand.vmem [shape: f32[2,8,8,128], index: 8, kind: output, shape index: {}]  }
   0x1   :  { %s5542_s29 = smov 0  }
   0x2 LB: > { %s4182_s30 = sadd.s32 4294967295, %s5489_s29   ;;  %s5555_s9 = sadd.s32 1, %s5489_s29   ;;  %s5489_s29 = sphi %s5542_s29, %s6418_s29   ;;  %s5485_s28 = sphi %s5540_s28, %s6417_s28   ;;  %s5481_s27 = sphi %s5538_s27, %s6416_s27  }
   0x3   : > { %s22_s10 = ssub.s32 %s5489_s29, %s5555_s9  ;;  %s25_s11 = sadd.s32 1, %s5485_s28 }
   0x4   : > { %p23_p0 = scmp.eq.s32.totalorder %s22_s10, 0  ;;  %p32_p1 = scmp.ne.s32.totalorder %s5485_s28, %s5481_s27 }
   0x5   : > { %p33_p2 = scmp.eq.s32.totalorder %s5489_s29, 0  ;;  %p4185_p4 = scmp.ge.s32.totalorder %s5489_s29, 2 }
   0x6   : > { %s5564_s12 = scalar_select %p23_p0, %s5485_s28, %s25_s11  }
   0x7   : > { %p34_p3 = por %p33_p2, %p32_p1  ;;  %252 = sbr.rel (%p4185_p4) target bundleno = 32 (0x20), region = 44 }
   0xc   : > { %255 = sbr.rel (!%p34_p3) target bundleno = 32 (0x20), region = 48  ;;  %s257_s13 = sand.u32 (%p34_p3), 1, %s5485_s28  }
   0xd   : > { %s4597_s14 = sshll.u32 (%p34_p3), %s5489_s29, 6  ;;  %s4186_s15 = sshll.u32 (%p34_p3), %s257_s13, 8 }
   0xe   : > { %s5572_s18 = scalar_lea.vmem (%p34_p3), %s6399_s0, %s4597_s14  ;;  %s5577_s19 = scalar_lea.vmem (%p34_p3), [#allocation5], %s4186_s15 }
   0xf   : > { %v353_v0 = vld [vmem:[%s5572_s18] sm:$0xff] (%p34_p3)  ;;  %v355_v1 = vld [vmem:[%s5572_s18 + $0x8] sm:$0xff] (%p34_p3)  ;;  %v357_v2 = vld [vmem:[%s5572_s18 + $0x10] sm:$0xff] (%p34_p3) }
  0x10   : > { %354 = vst [vmem:[%s5577_s19] sm:$0xff] (%p34_p3), %v353_v0  ;;  %356 = vst [vmem:[%s5577_s19 + $0x8] sm:$0xff] (%p34_p3), %v355_v1  ;;  %v359_v3 = vld [vmem:[%s5572_s18 + $0x18] sm:$0xff] (%p34_p3)  ;;  %v361_v4 = vld [vmem:[%s5572_s18 + $0x20] sm:$0xff] (%p34_p3) }
  0x11   : > { %358 = vst [vmem:[%s5577_s19 + $0x10] sm:$0xff] %v357_v2  ;;  %v363_v5 = vld [vmem:[%s5572_s18 + $0x28] sm:$0xff]  ;;  %360 = vst [vmem:[%s5577_s19 + $0x18] sm:$0xff] %v359_v3  ;;  %v365_v6 = vld [vmem:[%s5572_s18 + $0x30] sm:$0xff] }
  0x12   : > { %362 = vst [vmem:[%s5577_s19 + $0x20] sm:$0xff] %v361_v4  ;;  %364 = vst [vmem:[%s5577_s19 + $0x28] sm:$0xff] %v363_v5  ;;  %v367_v7 = vld [vmem:[%s5572_s18 + $0x38] sm:$0xff]  ;;  %v369_v8 = vld [vmem:[%s5572_s18 + $0x80] sm:$0xff] }
  0x13   : > { %366 = vst [vmem:[%s5577_s19 + $0x30] sm:$0xff] %v365_v6  ;;  %368 = vst [vmem:[%s5577_s19 + $0x38] sm:$0xff] %v367_v7  ;;  %v371_v9 = vld [vmem:[%s5572_s18 + $0x88] sm:$0xff]  ;;  %v373_v10 = vld [vmem:[%s5572_s18 + $0x90] sm:$0xff] }
  0x14   : > { %370 = vst [vmem:[%s5577_s19 + $0x40] sm:$0xff] %v369_v8  ;;  %v375_v11 = vld [vmem:[%s5572_s18 + $0x98] sm:$0xff]  ;;  %372 = vst [vmem:[%s5577_s19 + $0x48] sm:$0xff] %v371_v9  ;;  %v377_v12 = vld [vmem:[%s5572_s18 + $0xa0] sm:$0xff] }
  0x15   : > { %374 = vst [vmem:[%s5577_s19 + $0x50] sm:$0xff] %v373_v10  ;;  %376 = vst [vmem:[%s5577_s19 + $0x58] sm:$0xff] %v375_v11  ;;  %v379_v13 = vld [vmem:[%s5572_s18 + $0xa8] sm:$0xff]  ;;  %v381_v14 = vld [vmem:[%s5572_s18 + $0xb0] sm:$0xff] }
  0x16   : > { %378 = vst [vmem:[%s5577_s19 + $0x60] sm:$0xff] %v377_v12  ;;  %380 = vst [vmem:[%s5577_s19 + $0x68] sm:$0xff] %v379_v13  ;;  %v383_v15 = vld [vmem:[%s5572_s18 + $0xb8] sm:$0xff]  ;;  %v385_v16 = vld [vmem:[%s5572_s18 + $0x100] sm:$0xff] }
  0x17   : > { %382 = vst [vmem:[%s5577_s19 + $0x70] sm:$0xff] %v381_v14  ;;  %v387_v17 = vld [vmem:[%s5572_s18 + $0x108] sm:$0xff]  ;;  %384 = vst [vmem:[%s5577_s19 + $0x78] sm:$0xff] %v383_v15  ;;  %v389_v18 = vld [vmem:[%s5572_s18 + $0x110] sm:$0xff] }
  0x18   : > { %386 = vst [vmem:[%s5577_s19 + $0x80] sm:$0xff] %v385_v16  ;;  %388 = vst [vmem:[%s5577_s19 + $0x88] sm:$0xff] %v387_v17  ;;  %v391_v19 = vld [vmem:[%s5572_s18 + $0x118] sm:$0xff]  ;;  %v393_v20 = vld [vmem:[%s5572_s18 + $0x120] sm:$0xff] }
  0x19   : > { %390 = vst [vmem:[%s5577_s19 + $0x90] sm:$0xff] %v389_v18  ;;  %392 = vst [vmem:[%s5577_s19 + $0x98] sm:$0xff] %v391_v19  ;;  %v395_v21 = vld [vmem:[%s5572_s18 + $0x128] sm:$0xff]  ;;  %v397_v22 = vld [vmem:[%s5572_s18 + $0x130] sm:$0xff] }
  0x1a   : > { %394 = vst [vmem:[%s5577_s19 + $0xa0] sm:$0xff] %v393_v20  ;;  %v399_v23 = vld [vmem:[%s5572_s18 + $0x138] sm:$0xff]  ;;  %396 = vst [vmem:[%s5577_s19 + $0xa8] sm:$0xff] %v395_v21  ;;  %v401_v24 = vld [vmem:[%s5572_s18 + $0x180] sm:$0xff] }
  0x1b   : > { %398 = vst [vmem:[%s5577_s19 + $0xb0] sm:$0xff] %v397_v22  ;;  %400 = vst [vmem:[%s5577_s19 + $0xb8] sm:$0xff] %v399_v23  ;;  %v403_v25 = vld [vmem:[%s5572_s18 + $0x188] sm:$0xff]  ;;  %v405_v26 = vld [vmem:[%s5572_s18 + $0x190] sm:$0xff] }
  0x1c   : > { %402 = vst [vmem:[%s5577_s19 + $0xc0] sm:$0xff] %v401_v24  ;;  %404 = vst [vmem:[%s5577_s19 + $0xc8] sm:$0xff] %v403_v25  ;;  %v407_v27 = vld [vmem:[%s5572_s18 + $0x198] sm:$0xff]  ;;  %v409_v28 = vld [vmem:[%s5572_s18 + $0x1a0] sm:$0xff] }
  0x1d   : > { %406 = vst [vmem:[%s5577_s19 + $0xd0] sm:$0xff] %v405_v26  ;;  %v411_v29 = vld [vmem:[%s5572_s18 + $0x1a8] sm:$0xff]  ;;  %408 = vst [vmem:[%s5577_s19 + $0xd8] sm:$0xff] %v407_v27  ;;  %v413_v30 = vld [vmem:[%s5572_s18 + $0x1b0] sm:$0xff] }
  0x1e   : > { %410 = vst [vmem:[%s5577_s19 + $0xe0] sm:$0xff] %v409_v28  ;;  %412 = vst [vmem:[%s5577_s19 + $0xe8] sm:$0xff] %v411_v29  ;;  %v415_v31 = vld [vmem:[%s5572_s18 + $0x1b8] sm:$0xff] }
  0x1f   : > { %414 = vst [vmem:[%s5577_s19 + $0xf0] sm:$0xff] %v413_v30  ;;  %416 = vst [vmem:[%s5577_s19 + $0xf8] sm:$0xff] %v415_v31 }
  0x20 PF: > { %p4189_p5 = scmp.ge.s32.totalorder %s5489_s29, 1  ;;  %p421_p6 = scmp.lt.s32.totalorder %s5489_s29, 3 }
  0x22   : > { %p422_p7 = pnand %p4189_p5, %p421_p6 }
  0x24   : > { %425 = sbr.rel (%p422_p7) target bundleno = 698 (0x2ba), region = 86 }
  0x29   : > { %v5212_v32 = vld [vmem:[%s6402_s3 + $0x78] sm:$0xff]   ;;  %v5216_v36 = vld [vmem:[%s6402_s3 + $0x70] sm:$0xff]   ;;  %v5491_v37 = vmov 0.0   ;;  %v5492_v40 = vmov 0.0|0.0   ;;  %v5220_v42 = vld [vmem:[%s6402_s3 + $0x68] sm:$0xff]   ;;  %s428_s22 = sand.u32 1, %s5481_s27  }
  0x2a   : > { %v5213_v33 = vld [vmem:[%s6402_s3 + $0xf8] sm:$0xff]   ;;  %4743 = vmatprep.subr.bf16.mxu0 %v5212_v32  ;;  %471 = vst [vmem:[#allocation2 + $0x1b0] sm:$0xff] %v5491_v37  ;;  %484 = vst [vmem:[#allocation2 + $0x1c0] sm:$0x1] %v5491_v37  ;;  %v5217_v38 = vld [vmem:[%s6402_s3 + $0xf0] sm:$0xff]   ;;  %s4190_s13 = sshll.u32 %s428_s22, 8 }
  0x2b   : > { %v5214_v34 = vld [vmem:[%s6402_s3 + $0x38] sm:$0xff]   ;;  %4783 = vmatprep.subr.bf16.mxu1 %v5213_v33  ;;  %492 = vst [vmem:[#allocation3] sm:$0xff] %v5491_v37  ;;  %493 = vst [vmem:[#allocation3 + $0x8] sm:$0xff] %v5491_v37  ;;  %v5218_v39 = vld [vmem:[%s6402_s3 + $0x30] sm:$0xff]   ;;  %s5739_s21 = scalar_lea.vmem [#allocation5], %s4190_s13  ;;  %p461_p8 = scmp.lt.s32.totalorder %s4182_s30, 1 }
  0x2c   : > { %v5215_v35 = vld [vmem:[%s6402_s3 + $0xb8] sm:$0xff]   ;;  %4744 = vmatpush3.bf16.msra.mxu0 %v5214_v34  ;;  %472 = vst [vmem:[#allocation2 + $0x1b8] sm:$0xff] %v5491_v37  ;;  %474 = vst [vmem:[#allocation2 + $0x90] sm:$0x1] %v5491_v37  ;;  %v5219_v41 = vld [vmem:[%s6402_s3 + $0xb0] sm:$0xff]  }
  0x2d   : > { %475 = vst [vmem:[#allocation2 + $0xa0] sm:$0x1] %v5491_v37  ;;  %476 = vst [vmem:[#allocation2 + $0xb0] sm:$0x1] %v5491_v37  ;;  %4784 = vmatpush3.bf16.msra.mxu1 %v5215_v35  ;;  %4745 = vmatprep.subr.bf16.mxu0 %v5216_v36  ;;  %v5221_v43 = vld [vmem:[%s6402_s3 + $0xe8] sm:$0xff]   ;;  %v5224_v46 = vld [vmem:[%s6402_s3 + $0x60] sm:$0xff]  }
  0x2e   : > { %477 = vst [vmem:[#allocation2 + $0xc0] sm:$0x1] %v5491_v37  ;;  %478 = vst [vmem:[#allocation2 + $0xd0] sm:$0x1] %v5491_v37  ;;  %4785 = vmatprep.subr.bf16.mxu1 %v5217_v38  ;;  %v5222_v44 = vld [vmem:[%s6402_s3 + $0x28] sm:$0xff]   ;;  %v5225_v47 = vld [vmem:[%s6402_s3 + $0xe0] sm:$0xff]  }
  0x2f   : > { %479 = vst [vmem:[#allocation2 + $0xe0] sm:$0x1] %v5491_v37  ;;  %480 = vst [vmem:[#allocation2 + $0xf0] sm:$0x1] %v5491_v37  ;;  %v5223_v45 = vld [vmem:[%s6402_s3 + $0xa8] sm:$0xff]   ;;  %v5226_v48 = vld [vmem:[%s6402_s3 + $0x20] sm:$0xff]  }
  0x30   : > { %481 = vst [vmem:[#allocation2 + $0x100] sm:$0x1] %v5491_v37  ;;  %485 = vst [vmem:[#allocation2 + $0x1d0] sm:$0x1] %v5491_v37  ;;  %4746 = vmatpush3.bf16.msra.mxu0 %v5218_v39  ;;  %v5227_v49 = vld [vmem:[%s6402_s3 + $0xa0] sm:$0xff]   ;;  %v5228_v50 = vld [vmem:[%s6402_s3 + $0x58] sm:$0xff]  }
  0x31   : > { %486 = vst [vmem:[#allocation2 + $0x1e0] sm:$0x1] %v5491_v37  ;;  %487 = vst [vmem:[#allocation2 + $0x1f0] sm:$0x1] %v5491_v37  ;;  %4786 = vmatpush3.bf16.msra.mxu1 %v5219_v41  ;;  %4747 = vmatprep.subr.bf16.mxu0 %v5220_v42  ;;  %v5229_v51 = vld [vmem:[%s6402_s3 + $0xd8] sm:$0xff]   ;;  %v5232_v54 = vld [vmem:[%s6402_s3 + $0x50] sm:$0xff]  }
  0x32   : > { %488 = vst [vmem:[#allocation2 + $0x200] sm:$0x1] %v5491_v37  ;;  %489 = vst [vmem:[#allocation2 + $0x210] sm:$0x1] %v5491_v37  ;;  %4787 = vmatprep.subr.bf16.mxu1 %v5221_v43  ;;  %v5230_v52 = vld [vmem:[%s6402_s3 + $0x18] sm:$0xff]   ;;  %v5233_v55 = vld [vmem:[%s6402_s3 + $0xd0] sm:$0xff]  }
  0x33   : > { %490 = vst [vmem:[#allocation2 + $0x220] sm:$0x1] %v5491_v37  ;;  %491 = vst [vmem:[#allocation2 + $0x230] sm:$0x1] %v5491_v37  ;;  %v5231_v53 = vld [vmem:[%s6402_s3 + $0x98] sm:$0xff]   ;;  %v5234_v56 = vld [vmem:[%s6402_s3 + $0x10] sm:$0xff]  }
  0x34   : > { %495 = vst [vmem:[#allocation3 + $0x90] sm:$0xff] %v5491_v37  ;;  %496 = vst [vmem:[#allocation3 + $0x98] sm:$0xff] %v5491_v37  ;;  %4748 = vmatpush3.bf16.msra.mxu0 %v5222_v44  ;;  %v5235_v57 = vld [vmem:[%s6402_s3 + $0x90] sm:$0xff]   ;;  %v5236_v58 = vld [vmem:[%s6402_s3 + $0x48] sm:$0xff]   ;;  %s6420_s30 = smov (!%p461_p8, %s4182_s30), 1 }
  0x35   : > { %498 = vst [vmem:[#allocation3 + $0x10] sm:$0x1] %v5491_v37  ;;  %499 = vst [vmem:[#allocation3 + $0x20] sm:$0x1] %v5491_v37  ;;  %4788 = vmatpush3.bf16.msra.mxu1 %v5223_v45  ;;  %4749 = vmatprep.subr.bf16.mxu0 %v5224_v46  ;;  %v5237_v59 = vld [vmem:[%s6402_s3 + $0xc8] sm:$0xff]   ;;  %v5240_v62 = vld [vmem:[%s6402_s3 + $0x40] sm:$0xff]  }
  0x36   : > { %500 = vst [vmem:[#allocation3 + $0x30] sm:$0x1] %v5491_v37  ;;  %501 = vst [vmem:[#allocation3 + $0x40] sm:$0x1] %v5491_v37  ;;  %4789 = vmatprep.subr.bf16.mxu1 %v5225_v47  ;;  %v5238_v60 = vld [vmem:[%s6402_s3 + $0x8] sm:$0xff]   ;;  %v5241_v63 = vld [vmem:[%s6402_s3 + $0xc0] sm:$0xff]  }
  0x37   : > { %502 = vst [vmem:[#allocation3 + $0x50] sm:$0x1] %v5491_v37  ;;  %503 = vst [vmem:[#allocation3 + $0x60] sm:$0x1] %v5491_v37  ;;  %v5239_v61 = vld [vmem:[%s6402_s3 + $0x88] sm:$0xff]   ;;  %v5242_v0 = vld [vmem:[%s6402_s3] sm:$0xff]  }
  0x38   : > { %504 = vst [vmem:[#allocation3 + $0x70] sm:$0x1] %v5491_v37  ;;  %505 = vst [vmem:[#allocation3 + $0x80] sm:$0x1] %v5491_v37  ;;  %4750 = vmatpush3.bf16.msra.mxu0 %v5226_v48  ;;  %v5243_v1 = vld [vmem:[%s6402_s3 + $0x80] sm:$0xff]   ;;  %v4196_v11 = vld [vmem:[%s5739_s21 + $0x48] sm:$0xff] }
  0x39   : > { %508 = vst [vmem:[#allocation3 + $0x19] sm:$0x1] %v5491_v37  ;;  %509 = vst [vmem:[#allocation3 + $0x29] sm:$0x1] %v5491_v37  ;;  %4790 = vmatpush3.bf16.msra.mxu1 %v5227_v49  ;;  %4751 = vmatprep.subr.bf16.mxu0 %v5228_v50  ;;  %v4205_v2 = vld [vmem:[%s5739_s21 + $0x80] sm:$0xff]  ;;  %v902_v15 = vld [vmem:[#allocation2 + $0x1b1] sm:$0xff] }
  0x3a   : > { %510 = vst [vmem:[#allocation3 + $0x39] sm:$0x1] %v5491_v37  ;;  %511 = vst [vmem:[#allocation3 + $0x49] sm:$0x1] %v5491_v37  ;;  %4791 = vmatprep.subr.bf16.mxu1 %v5229_v51  ;;  %v5745_v3 = vld [vmem:[%s6400_s1] ss:$0 sm:$0xff]  ;;  %v4615_v17 = vpack.c.bf16 %v902_v15, %v902_v15 }
  0x3b   : > { %512 = vst [vmem:[#allocation3 + $0x59] sm:$0x1] %v5491_v37  ;;  %513 = vst [vmem:[#allocation3 + $0x69] sm:$0x1] %v5491_v37  ;;  %v678_v4 = vmul.f32 %v5745_v3, %v4205_v2  ;;  %v5751_v5 = vld [vmem:[%s6401_s2] ss:$0 sm:$0xff]  ;;  %v608_v14 = vmul.f32 %v5745_v3, %v4196_v11 }
  0x3c   : > { %514 = vst [vmem:[#allocation3 + $0x79] sm:$0x1] %v5491_v37  ;;  %515 = vst [vmem:[#allocation3 + $0x89] sm:$0x1] %v5491_v37  ;;  %4752 = vmatpush3.bf16.msra.mxu0 %v5230_v52  ;;  %v4215_v6 = vld [vmem:[%s5739_s21 + $0xc0] sm:$0xff]  ;;  %v5248_v18 = vld [vmem:[%s6402_s3 + $0x178] sm:$0xff]  }
  0x3d   : > { %483 = vst [vmem:[#allocation2 + $0x1b0] sm:$0x1] %v5491_v37  ;;  %497 = vst [vmem:[#allocation3] sm:$0x1] %v5491_v37  ;;  %4792 = vmatpush3.bf16.msra.mxu1 %v5231_v53  ;;  %4753 = vmatprep.subr.bf16.mxu0 %v5232_v54  ;;  %v750_v8 = vmul.f32 %v4215_v6, %v5745_v3  ;;  %v4195_v10 = vld [vmem:[%s5739_s21 + $0x40] sm:$0xff]  ;;  %v693_v12 = vadd.f32 %v5751_v5, %v678_v4  ;;  %v5250_v23 = vld [vmem:[%s6402_s3 + $0x1f8] sm:$0xff]  }
  0x3e   : > { %507 = vst [vmem:[#allocation3 + $0x9] sm:$0x1] %v5491_v37  ;;  %506 = vst [vmem:[#allocation3 + $0x90] sm:$0x1] %v5491_v37  ;;  %4793 = vmatprep.subr.bf16.mxu1 %v5233_v55  ;;  %v607_v13 = vmul.f32 %v5745_v3, %v4195_v10  ;;  %v623_v21 = vadd.f32 %v5751_v5, %v608_v14  ;;  %v4206_v34 = vld [vmem:[%s5739_s21 + $0x88] sm:$0xff]  ;;  %v4207_v35 = vld [vmem:[%s5739_s21 + $0x90] sm:$0xff] }
  0x3f   : > { %516 = vst [vmem:[#allocation3 + $0x99] sm:$0x1] %v5491_v37  ;;  %894 = vst [vmem:[#allocation4 + $0x4] sm:$0xf] %v5492_v40  ;;  %v765_v16 = vadd.f32 %v5751_v5, %v750_v8  ;;  %vm701_vm0 = vcmp.ge.f32.partialorder %v693_v12, 0.0  ;;  %v679_v36 = vmul.f32 %v5745_v3, %v4206_v34  ;;  %v4216_v37 = vld [vmem:[%s5739_s21 + $0xc8] sm:$0xff]  ;;  %v680_v39 = vmul.f32 %v5745_v3, %v4207_v35 }
  0x40   : > { %4754 = vmatpush3.bf16.msra.mxu0 %v5234_v56  ;;  %v709_v19 = vmul.f32 0.1, %v693_v12  ;;  %v622_v20 = vadd.f32 %v5751_v5, %v607_v13  ;;  %942 = vst [vmem:[#allocation4 + $0x8] sm:$0xf] %v4615_v17  ;;  %vm631_vm3 = vcmp.ge.f32.partialorder %v623_v21, 0.0  ;;  %v4217_v38 = vld [vmem:[%s5739_s21 + $0xd0] sm:$0xff]  ;;  %v751_v40 = vmul.f32 %v4216_v37, %v5745_v3 }
  0x41   : > { %4794 = vmatpush3.bf16.msra.mxu1 %v5235_v57  ;;  %4755 = vmatprep.subr.bf16.mxu0 %v5236_v58  ;;  %vm773_vm1 = vcmp.ge.f32.partialorder %v765_v16, 0.0  ;;  %v781_v22 = vmul.f32 0.1, %v765_v16  ;;  %v639_v28 = vmul.f32 0.1, %v623_v21  ;;  %v752_v41 = vmul.f32 %v4217_v38, %v5745_v3  ;;  %v4197_v42 = vld [vmem:[%s5739_s21 + $0x50] sm:$0xff] }
  0x42   : > { %4795 = vmatprep.subr.bf16.mxu1 %v5237_v59  ;;  %v717_v24 = vsel %vm701_vm0, %v693_v12, %v709_v19  ;;  %vm630_vm2 = vcmp.ge.f32.partialorder %v622_v20, 0.0  ;;  %v638_v25 = vmul.f32 0.1, %v622_v20  ;;  %v4198_v43 = vld [vmem:[%s5739_s21 + $0x58] sm:$0xff]  ;;  %v694_v44 = vadd.f32 %v5751_v5, %v679_v36  ;;  %v2474_v59 = vld [vmem:[#allocation3 + $0x1] sm:$0xff]  ;;  %v5253_v36 = vld [vmem:[%s6402_s3 + $0x130] sm:$0xff]  }
  0x43   : > { %726 = vst [vmem:[#allocation2 + $0x130] sm:$0xff] %v717_v24  ;;  %v789_v26 = vsel %vm773_vm1, %v765_v16, %v781_v22  ;;  %v4608_v27 = vpack.c.bf16 %v717_v24, %v717_v24  ;;  %v647_v31 = vsel %vm631_vm3, %v623_v21, %v639_v28  ;;  %v609_v45 = vmul.f32 %v5745_v3, %v4197_v42  ;;  %v5249_v17 = vld [vmem:[%s6402_s3 + $0x138] sm:$0xff]   ;;  %v5252_v21 = vld [vmem:[%s6402_s3 + $0x170] sm:$0xff]   ;;  %s4598_s29 = sshll.u32 %s6420_s30, 6 }
  0x44   : > { %4756 = vmatpush3.bf16.msra.mxu0 %v5238_v60  ;;  %v806_v7 = vld [vmem:[#allocation2 + $0x1b0] sm:$0xff]  ;;  %798 = vst [vmem:[#allocation2 + $0x1c1] sm:$0xff] %v789_v26  ;;  %v646_v29 = vsel %vm630_vm2, %v622_v20, %v638_v25  ;;  %v4616_v30 = vpack.c.bf16 %v789_v26, %v789_v26  ;;  %655 = vst [vmem:[#allocation2 + $0xa1] sm:$0xff] %v647_v31  ;;  %v4640_v33 = vpack.c.bf16 %v647_v31, %v647_v31  ;;  %v2426_v55 = vld [vmem:[#allocation3] sm:$0xff]  ;;  %s6358_s25 = scalar_lea.vmem %s6407_s8, %s4598_s29 }
  0x45   : > { %4796 = vmatpush3.bf16.msra.mxu1 %v5239_v61  ;;  %4757 = vmatprep.subr.bf16.mxu0 %v5240_v62  ;;  %v4599_v9 = vpack.c.bf16 %v806_v7, %v806_v7  ;;  %895 = vst [vmem:[#allocation4 + $0x28] sm:$0xf] %v4608_v27  ;;  %654 = vst [vmem:[#allocation2 + $0x91] sm:$0xff] %v646_v29  ;;  %v4639_v32 = vpack.c.bf16 %v646_v29, %v646_v29  ;;  %vm702_vm4 = vcmp.ge.f32.partialorder %v694_v44, 0.0  ;;  %v2522_v8 = vld [vmem:[#allocation3 + $0x2] sm:$0xff]  ;;  %v4208_v22 = vld [vmem:[%s5739_s21 + $0x98] sm:$0xff] }
  0x46   : > { %4797 = vmatprep.subr.bf16.mxu1 %v5241_v63  ;;  %943 = vst [vmem:[#allocation4 + $0x2c] sm:$0xf] %v4616_v30  ;;  %1087 = vst [vmem:[#allocation4 + $0x38] sm:$0xf] %v4640_v33  ;;  %v695_v47 = vadd.f32 %v5751_v5, %v680_v39  ;;  %v766_v48 = vadd.f32 %v5751_v5, %v751_v40  ;;  %v767_v49 = vadd.f32 %v5751_v5, %v752_v41  ;;  %v5251_v26 = vld [vmem:[%s6402_s3 + $0x1b8] sm:$0xff]   ;;  %v4209_v27 = vld [vmem:[%s5739_s21 + $0xa0] sm:$0xff] }
  0x47   : > { %846 = vst [vmem:[#allocation4] sm:$0xf] %v4599_v9  ;;  %1086 = vst [vmem:[#allocation4 + $0x14] sm:$0xf] %v4639_v32  ;;  %v610_v50 = vmul.f32 %v5745_v3, %v4198_v43  ;;  %v710_v53 = vmul.f32 0.1, %v694_v44  ;;  %v624_v54 = vadd.f32 %v5751_v5, %v609_v45  ;;  %v4671_v12 = vpack.c.bf16 %v2426_v55, %v2426_v55 }
  0x48   : > { %4758 = vmatpush3.bf16.msra.mxu0 %v5242_v0  ;;  %vm703_vm5 = vcmp.ge.f32.partialorder %v695_v47, 0.0  ;;  %v711_v58 = vmul.f32 0.1, %v695_v47  ;;  %vm774_vm6 = vcmp.ge.f32.partialorder %v766_v48, 0.0  ;;  %vm775_vm7 = vcmp.ge.f32.partialorder %v767_v49, 0.0  ;;  %v4218_v32 = vld [vmem:[%s5739_s21 + $0xd8] sm:$0xff] }
  0x49   : > { %4798 = vmatpush3.bf16.msra.mxu1 %v5243_v1  ;;  %4823 = vmatprep.subr.bf16.mxu0 %v5248_v18  ;;  %v718_v61 = vsel %vm702_vm4, %v694_v44, %v710_v53  ;;  %v782_v62 = vmul.f32 0.1, %v766_v48  ;;  %v783_v0 = vmul.f32 0.1, %v767_v49  ;;  %v625_v2 = vadd.f32 %v5751_v5, %v610_v50  ;;  %v4219_v33 = vld [vmem:[%s5739_s21 + $0xe0] sm:$0xff]  ;;  %v5254_v42 = vld [vmem:[%s6402_s3 + $0x1f0] sm:$0xff]  }
  0x4a   : > { %4863 = vmatprep.subr.bf16.mxu1 %v5250_v23  ;;  %v719_v63 = vsel %vm703_vm5, %v695_v47, %v711_v58  ;;  %v4609_v1 = vpack.c.bf16 %v718_v61, %v718_v61  ;;  %vm632_vm8 = vcmp.ge.f32.partialorder %v624_v54, 0.0  ;;  %v640_v7 = vmul.f32 0.1, %v624_v54  ;;  %v4199_v40 = vld [vmem:[%s5739_s21 + $0x60] sm:$0xff]  ;;  %v5261_v53 = vld [vmem:[%s6402_s3 + $0x168] sm:$0xff]  }
  0x4b   : > { %v807_v46 = vld [vmem:[#allocation2 + $0x1c0] sm:$0xff]  ;;  %v790_v4 = vsel %vm774_vm6, %v766_v48, %v782_v62  ;;  %v4610_v6 = vpack.c.bf16 %v719_v63, %v719_v63  ;;  %v791_v9 = vsel %vm775_vm7, %v767_v49, %v783_v0  ;;  %vm633_vm9 = vcmp.ge.f32.partialorder %v625_v2, 0.0  ;;  %v5259_v48 = vld [vmem:[%s6402_s3 + $0x1b0] sm:$0xff]   ;;  %v5263_v63 = vld [vmem:[%s6402_s3 + $0x1e8] sm:$0xff]  }
  0x4c   : > { %v4600_v51 = vpack.c.bf16 %v807_v46, %v807_v46  ;;  %v950_v52 = vld [vmem:[#allocation2 + $0x90] sm:$0xff]  ;;  %v951_v56 = vld [vmem:[#allocation2 + $0xa0] sm:$0xff]  ;;  %799 = vst [vmem:[#allocation2 + $0x1d1] sm:$0xff] %v790_v4  ;;  %896 = vst [vmem:[#allocation4 + $0x4c] sm:$0xf] %v4609_v1  ;;  %v4617_v11 = vpack.c.bf16 %v790_v4, %v790_v4  ;;  %v4679_v13 = vpack.c.bf16 %v2474_v59, %v2474_v59 }
  0x4d   : > { %v4623_v57 = vpack.c.bf16 %v950_v52, %v950_v52  ;;  %v4624_v60 = vpack.c.bf16 %v951_v56, %v951_v56  ;;  %v641_v10 = vmul.f32 0.1, %v625_v2  ;;  %1183 = vst [vmem:[#allocation4 + $0x40] sm:$0xf] %v4609_v1  ;;  %800 = vst [vmem:[#allocation2 + $0x1e1] sm:$0xff] %v791_v9  ;;  %v648_v14 = vsel %vm632_vm8, %v624_v54, %v640_v7  ;;  %v4200_v56 = vld [vmem:[%s5739_s21 + $0x68] sm:$0xff] }
  0x4e   : > { %847 = vst [vmem:[#allocation4 + $0x24] sm:$0xf] %v4600_v51  ;;  %1134 = vst [vmem:[#allocation4 + $0x18] sm:$0xf] %v4600_v51  ;;  %v4618_v15 = vpack.c.bf16 %v791_v9, %v791_v9  ;;  %v1238_v16 = vld [vmem:[#allocation4] sm:$0xff]  ;;  %v4641_v19 = vpack.c.bf16 %v648_v14, %v648_v14  ;;  %v4687_v20 = vpack.c.bf16 %v2522_v8, %v2522_v8  ;;  %v5262_v59 = vld [vmem:[%s6402_s3 + $0x128] sm:$0xff]  }
  0x4f   : > { %990 = vst [vmem:[#allocation4 + $0xc] sm:$0xf] %v4623_v57  ;;  %991 = vst [vmem:[#allocation4 + $0x30] sm:$0xf] %v4624_v60  ;;  %v649_v18 = vsel %vm633_vm9, %v625_v2, %v641_v10  ;;  %v5244_v25 = vld [vmem:[#allocation4 + $0x4] ss:$36 sps:$4 sm:$0xff]   ;;  %v681_v28 = vmul.f32 %v5745_v3, %v4208_v22  ;;  %v682_v31 = vmul.f32 %v5745_v3, %v4209_v27 }
  0x50   : > { %897 = vst [vmem:[#allocation4 + $0x70] sm:$0xf] %v4610_v6  ;;  %1184 = vst [vmem:[#allocation4 + $0x64] sm:$0xf] %v4610_v6  ;;  %v4642_v23 = vpack.c.bf16 %v649_v18, %v649_v18  ;;  %2070 = vmatprep.mubr.bf16.mxu0 %v5244_v25  ;;  %v753_v38 = vmul.f32 %v4218_v32, %v5745_v3  ;;  %v754_v39 = vmul.f32 %v4219_v33, %v5745_v3  ;;  %v5264_v2 = vld [vmem:[%s6402_s3 + $0x1a8] sm:$0xff]   ;;  %v5265_v9 = vld [vmem:[%s6402_s3 + $0x160] sm:$0xff]  }
  0x51   : > { %656 = vst [vmem:[#allocation2 + $0xb1] sm:$0xff] %v648_v14  ;;  %944 = vst [vmem:[#allocation4 + $0x50] sm:$0xf] %v4617_v11  ;;  %v696_v37 = vadd.f32 %v5751_v5, %v681_v28  ;;  %v697_v44 = vadd.f32 %v5751_v5, %v682_v31  ;;  %v611_v45 = vmul.f32 %v5745_v3, %v4199_v40  ;;  %v5275_v27 = vld [vmem:[%s6402_s3 + $0x118] sm:$0xff]   ;;  %v4210_v31 = vld [vmem:[%s5739_s21 + $0xa8] sm:$0xff] }
  0x52   : > { %657 = vst [vmem:[#allocation2 + $0xc1] sm:$0xff] %v649_v18  ;;  %945 = vst [vmem:[#allocation4 + $0x74] sm:$0xf] %v4618_v15  ;;  %v768_v50 = vadd.f32 %v5751_v5, %v753_v38  ;;  %v769_v55 = vadd.f32 %v5751_v5, %v754_v39  ;;  %v612_v8 = vmul.f32 %v5745_v3, %v4200_v56  ;;  %v5280_v39 = vld [vmem:[%s6402_s3 + $0x1d0] sm:$0xff]  }
  0x53   : > { %1088 = vst [vmem:[#allocation4 + $0x5c] sm:$0xf] %v4641_v19  ;;  %2466 = vst [vmem:[#allocation4] sm:$0xf] %v4671_v12  ;;  %v808_v43 = vld [vmem:[#allocation2 + $0x1d0] sm:$0xff]  ;;  %vm704_vm10 = vcmp.ge.f32.partialorder %v696_v37, 0.0  ;;  %v626_v11 = vadd.f32 %v5751_v5, %v611_v45 }
  0x54   : > { %2514 = vst [vmem:[#allocation4 + $0x4] sm:$0xf] %v4679_v13  ;;  %1089 = vst [vmem:[#allocation4 + $0x80] sm:$0xf] %v4642_v23  ;;  %v809_v46 = vld [vmem:[#allocation2 + $0x1e0] sm:$0xff]  ;;  %v4601_v47 = vpack.c.bf16 %v808_v43, %v808_v43  ;;  %vm705_vm11 = vcmp.ge.f32.partialorder %v697_v44, 0.0  ;;  %v627_v14 = vadd.f32 %v5751_v5, %v612_v8 }
  0x55   : > { %v1243_v24 = vld [vmem:[#allocation4 + $0x24] sm:$0xff]  ;;  %v712_v49 = vmul.f32 0.1, %v696_v37  ;;  %v4602_v51 = vpack.c.bf16 %v809_v46, %v809_v46  ;;  %v713_v54 = vmul.f32 0.1, %v697_v44  ;;  %vm776_vm12 = vcmp.ge.f32.partialorder %v768_v50, 0.0 }
  0x56   : > { %v1239_v29 = vld [vmem:[#allocation4 + $0x8] sm:$0xff]  ;;  %v4297_v30 = vcombine.low %v1238_v16, %v1243_v24  ;;  %848 = vst [vmem:[#allocation4 + $0x48] sm:$0xf] %v4601_v47  ;;  %v784_v61 = vmul.f32 0.1, %v768_v50  ;;  %vm777_vm13 = vcmp.ge.f32.partialorder %v769_v55, 0.0 }
  0x57   : > { %v1244_v34 = vld [vmem:[#allocation4 + $0x2c] sm:$0xff]  ;;  %2562 = vst [vmem:[#allocation4 + $0x8] sm:$0xf] %v4687_v20  ;;  %v720_v60 = vsel %vm704_vm10, %v696_v37, %v712_v49  ;;  %1135 = vst [vmem:[#allocation4 + $0x3c] sm:$0xf] %v4601_v47  ;;  %v721_v0 = vsel %vm705_vm11, %v697_v44, %v713_v54  ;;  %v5266_v13 = vld [vmem:[%s6402_s3 + $0x120] sm:$0xff]  }
  0x58   : > { %v5246_v35 = vld [vmem:[#allocation4 + $0xc] ss:$36 sps:$4 sm:$0xff]   ;;  %2071 = vmatmul.mubr.bf16.vlgmr.msra.gmra.mxu0 %v4297_v30  ;;  %v4299_v41 = vcombine.low %v1239_v29, %v1244_v34  ;;  %849 = vst [vmem:[#allocation4 + $0x6c] sm:$0xf] %v4602_v51  ;;  %v785_v1 = vmul.f32 0.1, %v769_v55  ;;  %v792_v4 = vsel %vm776_vm12, %v768_v50, %v784_v61  ;;  %v4611_v6 = vpack.c.bf16 %v720_v60, %v720_v60 }
  0x59   : > { %2135 = vmatprep.mubr.bf16.mxu1 %v5246_v35  ;;  %4824 = vmatpush3.bf16.msra.mxu0 %v5249_v17  ;;  %v952_v52 = vld [vmem:[#allocation2 + $0xb0] sm:$0xff]  ;;  %v953_v57 = vld [vmem:[#allocation2 + $0xc0] sm:$0xff]  ;;  %1136 = vst [vmem:[#allocation4 + $0x60] sm:$0xf] %v4602_v51  ;;  %v4612_v7 = vpack.c.bf16 %v721_v0, %v721_v0  ;;  %801 = vst [vmem:[#allocation2 + $0x1f1] sm:$0xff] %v792_v4  ;;  %v4619_v12 = vpack.c.bf16 %v792_v4, %v792_v4  ;;  %vm634_vm14 = vcmp.ge.f32.partialorder %v626_v11, 0.0 }
  0x5a   : > { %2136 = vmatmul.mubr.bf16.vlgmr.msra.gmra.mxu1 %v4299_v41  ;;  %4825 = vmatprep.subr.bf16.mxu0 %v5252_v21  ;;  %v4625_v58 = vpack.c.bf16 %v952_v52, %v952_v52  ;;  %v4626_v62 = vpack.c.bf16 %v953_v57, %v953_v57  ;;  %v793_v10 = vsel %vm777_vm13, %v769_v55, %v785_v1  ;;  %v5267_v16 = vld [vmem:[%s6402_s3 + $0x1e0] sm:$0xff]   ;;  %v642_v17 = vmul.f32 0.1, %v626_v11  ;;  %v5274_v20 = vld [vmem:[%s6402_s3 + $0x158] sm:$0xff]   ;;  %v5255_v25 = vld [vmem:[#allocation4 + $0x4c] ss:$36 sps:$4 sm:$0xff]  }
  0x5b   : > { %4864 = vmatpush3.bf16.msra.mxu1 %v5251_v26  ;;  %802 = vst [vmem:[#allocation2 + $0x201] sm:$0xff] %v793_v10  ;;  %898 = vst [vmem:[#allocation4 + $0x94] sm:$0xf] %v4611_v6  ;;  %v4620_v15 = vpack.c.bf16 %v793_v10, %v793_v10  ;;  %vm635_vm15 = vcmp.ge.f32.partialorder %v627_v14, 0.0  ;;  %v643_v18 = vmul.f32 0.1, %v627_v14  ;;  %2078 = vmatprep.mubr.bf16.mxu0 %v5255_v25 }
  0x5c   : > { %4865 = vmatprep.subr.bf16.mxu1 %v5254_v42  ;;  %992 = vst [vmem:[#allocation4 + $0x54] sm:$0xf] %v4625_v58  ;;  %993 = vst [vmem:[#allocation4 + $0x78] sm:$0xf] %v4626_v62  ;;  %v5272_v19 = vld [vmem:[%s6402_s3 + $0x1a0] sm:$0xff]   ;;  %v650_v22 = vsel %vm634_vm14, %v626_v11, %v642_v17  ;;  %v5276_v23 = vld [vmem:[%s6402_s3 + $0x1d8] sm:$0xff]  }
  0x5d   : > { %4826 = vmatpush3.bf16.msra.mxu0 %v5253_v36  ;;  %899 = vst [vmem:[#allocation4 + $0xb8] sm:$0xf] %v4612_v7  ;;  %1185 = vst [vmem:[#allocation4 + $0x88] sm:$0xf] %v4611_v6  ;;  %v1248_v21 = vld [vmem:[#allocation4 + $0x48] sm:$0xff]  ;;  %v651_v26 = vsel %vm635_vm15, %v627_v14, %v643_v18  ;;  %v4643_v28 = vpack.c.bf16 %v650_v22, %v650_v22  ;;  %v5278_v30 = vld [vmem:[%s6402_s3 + $0x150] sm:$0xff]   ;;  %v683_v36 = vmul.f32 %v5745_v3, %v4210_v31 }
  0x5e   : > { %4827 = vmatprep.subr.bf16.mxu0 %v5261_v53  ;;  %1186 = vst [vmem:[#allocation4 + $0xac] sm:$0xf] %v4612_v7  ;;  %946 = vst [vmem:[#allocation4 + $0x98] sm:$0xf] %v4619_v12  ;;  %v4644_v32 = vpack.c.bf16 %v651_v26, %v651_v26  ;;  %v5260_v34 = vld [vmem:[#allocation4 + $0x50] ss:$36 sps:$4 sm:$0xff]  }
  0x5f   : > { %4866 = vmatpush3.bf16.msra.mxu1 %v5259_v48  ;;  %1233 = vst [vmem:[#allocation4 + $0x8c] sm:$0xf] %v4619_v12  ;;  %947 = vst [vmem:[#allocation4 + $0xbc] sm:$0xf] %v4620_v15  ;;  %v1253_v24 = vld [vmem:[#allocation4 + $0x6c] sm:$0xff]  ;;  %v5277_v35 = vld [vmem:[%s6402_s3 + $0x198] sm:$0xff]   ;;  %v698_v47 = vadd.f32 %v5751_v5, %v683_v36 }
  0x60   : > { %4867 = vmatprep.subr.bf16.mxu1 %v5263_v63  ;;  %1234 = vst [vmem:[#allocation4 + $0xb0] sm:$0xf] %v4620_v15  ;;  %658 = vst [vmem:[#allocation2 + $0xd1] sm:$0xff] %v650_v22  ;;  %v4306_v29 = vcombine.low %v1248_v21, %v1253_v24  ;;  %v810_v37 = vld [vmem:[#allocation2 + $0x1f0] sm:$0xff]  ;;  %v4220_v44 = vld [vmem:[%s5739_s21 + $0xe8] sm:$0xff] }
  0x61   : > { %4828 = vmatpush3.bf16.msra.mxu0 %v5262_v59  ;;  %659 = vst [vmem:[#allocation2 + $0xe1] sm:$0xff] %v651_v26  ;;  %1090 = vst [vmem:[#allocation4 + $0xa4] sm:$0xf] %v4643_v28  ;;  %v4211_v40 = vld [vmem:[%s5739_s21 + $0xb0] sm:$0xff]  ;;  %v4603_v41 = vpack.c.bf16 %v810_v37, %v810_v37  ;;  %v755_v48 = vmul.f32 %v4220_v44, %v5745_v3  ;;  %v4202_v50 = vld [vmem:[%s5739_s21 + $0x78] sm:$0xff]  ;;  %vm706_vm0 = vcmp.ge.f32.partialorder %v698_v47, 0.0 }
  0x62   : > { %4829 = vmatprep.subr.bf16.mxu0 %v5265_v9  ;;  %2079 = vmatmul.mubr.bf16.gmra.mxu0 %v4306_v29  ;;  %v811_v38 = vld [vmem:[#allocation2 + $0x200] sm:$0xff]  ;;  %1091 = vst [vmem:[#allocation4 + $0xc8] sm:$0xf] %v4644_v32  ;;  %v684_v43 = vmul.f32 %v5745_v3, %v4211_v40  ;;  %v4221_v45 = vld [vmem:[%s5739_s21 + $0xf0] sm:$0xff]  ;;  %v614_v54 = vmul.f32 %v5745_v3, %v4202_v50  ;;  %v714_v56 = vmul.f32 0.1, %v698_v47 }
  0x63   : > { %4868 = vmatpush3.bf16.msra.mxu1 %v5264_v2  ;;  %v5257_v33 = vld [vmem:[#allocation4 + $0x54] ss:$36 sps:$4 sm:$0xff]   ;;  %v4604_v42 = vpack.c.bf16 %v811_v38, %v811_v38  ;;  %v756_v49 = vmul.f32 %v4221_v45, %v5745_v3  ;;  %850 = vst [vmem:[#allocation4 + $0x90] sm:$0xf] %v4603_v41  ;;  %1137 = vst [vmem:[#allocation4 + $0x84] sm:$0xf] %v4603_v41  ;;  %v770_v57 = vadd.f32 %v5751_v5, %v755_v48 }
  0x64   : > { %4869 = vmatprep.subr.bf16.mxu1 %v5267_v16  ;;  %2143 = vmatprep.mubr.bf16.mxu1 %v5257_v33  ;;  %v4201_v46 = vld [vmem:[%s5739_s21 + $0x70] sm:$0xff]  ;;  %v699_v52 = vadd.f32 %v5751_v5, %v684_v43  ;;  %v5287_v60 = vld [vmem:[%s6402_s3 + $0x148] sm:$0xff]   ;;  %v722_v4 = vsel %vm706_vm0, %v698_v47, %v714_v56  ;;  %v629_v11 = vadd.f32 %v5751_v5, %v614_v54  ;;  %v5291_v25 = vld [vmem:[%s6402_s3 + $0x140] sm:$0xff]  }
  0x65   : > { %4830 = vmatpush3.bf16.msra.mxu0 %v5266_v13  ;;  %2144 = vmatmul.mubr.bf16.gmra.mxu1 %v5260_v34  ;;  %851 = vst [vmem:[#allocation4 + $0xb4] sm:$0xf] %v4604_v42  ;;  %v5279_v51 = vld [vmem:[%s6402_s3 + $0x110] sm:$0xff]   ;;  %v613_v53 = vmul.f32 %v5745_v3, %v4201_v46  ;;  %1138 = vst [vmem:[#allocation4 + $0xa8] sm:$0xf] %v4604_v42  ;;  %v771_v58 = vadd.f32 %v5751_v5, %v756_v49  ;;  %v5288_v1 = vld [vmem:[%s6402_s3 + $0x108] sm:$0xff]  }
  0x66   : > { %4831 = vmatprep.subr.bf16.mxu0 %v5274_v20  ;;  %v5285_v59 = vld [vmem:[%s6402_s3 + $0x190] sm:$0xff]   ;;  %vm707_vm1 = vcmp.ge.f32.partialorder %v699_v52, 0.0  ;;  %v715_v63 = vmul.f32 0.1, %v699_v52  ;;  %vm778_vm2 = vcmp.ge.f32.partialorder %v770_v57, 0.0  ;;  %v4613_v9 = vpack.c.bf16 %v722_v4, %v722_v4  ;;  %v5289_v13 = vld [vmem:[%s6402_s3 + $0x1c8] sm:$0xff]  }
  0x67   : > { %4870 = vmatpush3.bf16.msra.mxu1 %v5272_v19  ;;  %v954_v55 = vld [vmem:[#allocation2 + $0xd0] sm:$0xff]  ;;  %v628_v0 = vadd.f32 %v5751_v5, %v613_v53  ;;  %vm779_vm3 = vcmp.ge.f32.partialorder %v771_v58, 0.0  ;;  %v786_v7 = vmul.f32 0.1, %v770_v57  ;;  %v787_v8 = vmul.f32 0.1, %v771_v58 }
  0x68   : > { %4871 = vmatprep.subr.bf16.mxu1 %v5276_v23  ;;  %v955_v61 = vld [vmem:[#allocation2 + $0xe0] sm:$0xff]  ;;  %v4627_v62 = vpack.c.bf16 %v954_v55, %v954_v55  ;;  %v723_v6 = vsel %vm707_vm1, %v699_v52, %v715_v63  ;;  %900 = vst [vmem:[#allocation4 + $0xdc] sm:$0xf] %v4613_v9  ;;  %v5290_v16 = vld [vmem:[%s6402_s3 + $0x188] sm:$0xff]   ;;  %1187 = vst [vmem:[#allocation4 + $0xd0] sm:$0xf] %v4613_v9 }
  0x69   : > { %4832 = vmatpush3.bf16.msra.mxu0 %v5275_v27  ;;  %v4628_v2 = vpack.c.bf16 %v955_v61, %v955_v61  ;;  %v4614_v10 = vpack.c.bf16 %v723_v6, %v723_v6  ;;  %vm636_vm4 = vcmp.ge.f32.partialorder %v628_v0, 0.0  ;;  %v644_v12 = vmul.f32 0.1, %v628_v0  ;;  %v5268_v19 = vld [vmem:[#allocation4 + $0x94] ss:$36 sps:$4 sm:$0xff]   ;;  %v5292_v26 = vld [vmem:[%s6402_s3 + $0x100] sm:$0xff]  }
  0x6a   : > { %4833 = vmatprep.subr.bf16.mxu0 %v5278_v30  ;;  %994 = vst [vmem:[#allocation4 + $0x9c] sm:$0xf] %v4627_v62  ;;  %v794_v14 = vsel %vm778_vm2, %v770_v57, %v786_v7  ;;  %v795_v15 = vsel %vm779_vm3, %v771_v58, %v787_v8  ;;  %v1258_v17 = vld [vmem:[#allocation4 + $0x90] sm:$0xff]  ;;  %vm637_vm5 = vcmp.ge.f32.partialorder %v629_v11, 0.0  ;;  %v645_v24 = vmul.f32 0.1, %v629_v11  ;;  %2086 = vmatprep.mubr.bf16.mxu0 %v5268_v19 }
  0x6b   : > { %4872 = vmatpush3.bf16.msra.mxu1 %v5277_v35  ;;  %995 = vst [vmem:[#allocation4 + $0xc0] sm:$0xf] %v4628_v2  ;;  %803 = vst [vmem:[#allocation2 + $0x211] sm:$0xff] %v794_v14  ;;  %v652_v20 = vsel %vm636_vm4, %v628_v0, %v644_v12  ;;  %v4621_v21 = vpack.c.bf16 %v794_v14, %v794_v14  ;;  %v4622_v22 = vpack.c.bf16 %v795_v15, %v795_v15  ;;  %v5293_v29 = vld [vmem:[%s6402_s3 + $0x1c0] sm:$0xff]   ;;  %v518_v31 = vld [vmem:[%s5739_s21 + $0x8] sm:$0xff] }
  0x6c   : > { %4873 = vmatprep.subr.bf16.mxu1 %v5280_v39  ;;  %v1263_v18 = vld [vmem:[#allocation4 + $0xb4] sm:$0xff]  ;;  %804 = vst [vmem:[#allocation2 + $0x221] sm:$0xff] %v795_v15  ;;  %901 = vst [vmem:[#allocation4 + $0x100] sm:$0xf] %v4614_v10  ;;  %v4645_v27 = vpack.c.bf16 %v652_v20, %v652_v20  ;;  %v653_v28 = vsel %vm637_vm5, %v629_v11, %v645_v24  ;;  %v517_v30 = vld [vmem:[%s5739_s21] sm:$0xff]  ;;  %v533_v36 = vmul.f32 %v5745_v3, %v518_v31 }
  0x6d   : > { %4834 = vmatpush3.bf16.msra.mxu0 %v5279_v51  ;;  %1188 = vst [vmem:[#allocation4 + $0xf4] sm:$0xf] %v4614_v10  ;;  %v4315_v23 = vcombine.low %v1258_v17, %v1263_v18  ;;  %660 = vst [vmem:[#allocation2 + $0xf1] sm:$0xff] %v652_v20  ;;  %v532_v32 = vmul.f32 %v5745_v3, %v517_v30  ;;  %v4646_v33 = vpack.c.bf16 %v653_v28, %v653_v28  ;;  %v5273_v35 = vld [vmem:[#allocation4 + $0x98] ss:$36 sps:$4 sm:$0xff]   ;;  %v5296_v38 = vld [vmem:[%s6402_s3 + $0x180] sm:$0xff]  }
  0x6e   : > { %4835 = vmatprep.subr.bf16.mxu0 %v5287_v60  ;;  %948 = vst [vmem:[#allocation4 + $0xe0] sm:$0xf] %v4621_v21  ;;  %949 = vst [vmem:[#allocation4 + $0x104] sm:$0xf] %v4622_v22  ;;  %v548_v41 = vadd.f32 %v5751_v5, %v533_v36  ;;  %v5926_v46 = vld [vmem:[%s6402_s3 + $0x238] sm:$0xff]   ;;  %v1142_v47 = vld [vmem:[#allocation2 + $0x130] sm:$0xff] }
  0x6f   : > { %4874 = vmatpush3.bf16.msra.mxu1 %v5285_v59  ;;  %1235 = vst [vmem:[#allocation4 + $0xd4] sm:$0xf] %v4621_v21  ;;  %1236 = vst [vmem:[#allocation4 + $0xf8] sm:$0xf] %v4622_v22  ;;  %2087 = vmatmul.mubr.bf16.gmra.mxu0 %v4315_v23  ;;  %v547_v37 = vadd.f32 %v5751_v5, %v532_v32  ;;  %v4655_v50 = vpack.c.bf16 %v1142_v47, %v1142_v47  ;;  %v519_v52 = vld [vmem:[%s5739_s21 + $0x10] sm:$0xff]  ;;  %v520_v56 = vld [vmem:[%s5739_s21 + $0x18] sm:$0xff] }
  0x70   : > { %4875 = vmatprep.subr.bf16.mxu1 %v5289_v13  ;;  %1092 = vst [vmem:[#allocation4 + $0xec] sm:$0xf] %v4645_v27  ;;  %661 = vst [vmem:[#allocation2 + $0x101] sm:$0xff] %v653_v28  ;;  %vm556_vm7 = vcmp.ge.f32.partialorder %v548_v41, 0.0  ;;  %v564_v49 = vmul.f32 0.1, %v548_v41  ;;  %v534_v57 = vmul.f32 %v5745_v3, %v519_v52  ;;  %v535_v60 = vmul.f32 %v5745_v3, %v520_v56 }
  0x71   : > { %4836 = vmatpush3.bf16.msra.mxu0 %v5288_v1  ;;  %1093 = vst [vmem:[#allocation4 + $0x110] sm:$0xf] %v4646_v33  ;;  %vm555_vm6 = vcmp.ge.f32.partialorder %v547_v37, 0.0  ;;  %v563_v45 = vmul.f32 0.1, %v547_v37  ;;  %v521_v0 = vld [vmem:[%s5739_s21 + $0x20] sm:$0xff] }
  0x72   : > { %4837 = vmatprep.subr.bf16.mxu0 %v5291_v25  ;;  %v5270_v34 = vld [vmem:[#allocation4 + $0x9c] ss:$36 sps:$4 sm:$0xff]   ;;  %v812_v39 = vld [vmem:[#allocation2 + $0x210] sm:$0xff]  ;;  %v572_v54 = vsel %vm556_vm7, %v548_v41, %v564_v49  ;;  %1182 = vst [vmem:[#allocation4 + $0x1c] sm:$0xf] %v4655_v50  ;;  %v549_v61 = vadd.f32 %v5751_v5, %v534_v57  ;;  %v550_v62 = vadd.f32 %v5751_v5, %v535_v60  ;;  %v522_v1 = vld [vmem:[%s5739_s21 + $0x28] sm:$0xff] }
  0x73   : > { %4876 = vmatpush3.bf16.msra.mxu1 %v5290_v16  ;;  %2151 = vmatprep.mubr.bf16.mxu1 %v5270_v34  ;;  %v813_v40 = vld [vmem:[#allocation2 + $0x220] sm:$0xff]  ;;  %v4605_v42 = vpack.c.bf16 %v812_v39, %v812_v39  ;;  %v571_v51 = vsel %vm555_vm6, %v547_v37, %v563_v45  ;;  %580 = vst [vmem:[#allocation2 + $0x10] sm:$0xff] %v572_v54  ;;  %v5294_v20 = vld [vmem:[#allocation4 + $0x14] ss:$36 sps:$4 sm:$0xff]   ;;  %v5306_v47 = vld [vmem:[%s6402_s3 + $0x228] sm:$0xff]  }
  0x74   : > { %4877 = vmatprep.subr.bf16.mxu1 %v5293_v29  ;;  %2152 = vmatmul.mubr.bf16.gmra.mxu1 %v5273_v35  ;;  %v4606_v43 = vpack.c.bf16 %v813_v40, %v813_v40  ;;  %v956_v44 = vld [vmem:[#allocation2 + $0xf0] sm:$0xff]  ;;  %579 = vst [vmem:[#allocation2] sm:$0xff] %v571_v51  ;;  %v4631_v55 = vpack.c.bf16 %v571_v51, %v571_v51  ;;  %vm557_vm8 = vcmp.ge.f32.partialorder %v549_v61, 0.0  ;;  %v565_v63 = vmul.f32 0.1, %v549_v61  ;;  %v4212_v32 = vld [vmem:[%s5739_s21 + $0xb8] sm:$0xff] }
  0x75   : > { %4838 = vmatpush3.bf16.msra.mxu0 %v5292_v26  ;;  %v4629_v48 = vpack.c.bf16 %v956_v44, %v956_v44  ;;  %852 = vst [vmem:[#allocation4 + $0xd8] sm:$0xf] %v4605_v42  ;;  %1139 = vst [vmem:[#allocation4 + $0xcc] sm:$0xf] %v4605_v42  ;;  %v4632_v59 = vpack.c.bf16 %v572_v54, %v572_v54  ;;  %vm558_vm9 = vcmp.ge.f32.partialorder %v550_v62, 0.0  ;;  %v523_v24 = vld [vmem:[%s5739_s21 + $0x30] sm:$0xff] }
  0x76   : > { %853 = vst [vmem:[#allocation4 + $0xfc] sm:$0xf] %v4606_v43  ;;  %5099 = vmatprep.subr.bf16.mxu0 %v5926_v46  ;;  %1140 = vst [vmem:[#allocation4 + $0xf0] sm:$0xf] %v4606_v43  ;;  %v566_v2 = vmul.f32 0.1, %v550_v62  ;;  %v536_v4 = vmul.f32 %v5745_v3, %v521_v0  ;;  %v537_v6 = vmul.f32 %v5745_v3, %v522_v1 }
  0x77   : > { %4878 = vmatpush3.bf16.msra.mxu1 %v5296_v38  ;;  %v957_v53 = vld [vmem:[#allocation2 + $0x100] sm:$0xff]  ;;  %996 = vst [vmem:[#allocation4 + $0xe4] sm:$0xf] %v4629_v48  ;;  %1038 = vst [vmem:[#allocation4 + $0x10] sm:$0xf] %v4631_v55  ;;  %v573_v10 = vsel %vm557_vm8, %v549_v61, %v565_v63  ;;  %v524_v26 = vld [vmem:[%s5739_s21 + $0x38] sm:$0xff] }
  0x78   : > { %v4630_v58 = vpack.c.bf16 %v957_v53, %v957_v53  ;;  %1039 = vst [vmem:[#allocation4 + $0x34] sm:$0xf] %v4632_v59  ;;  %v5281_v9 = vld [vmem:[#allocation4 + $0xdc] ss:$36 sps:$4 sm:$0xff]   ;;  %v574_v12 = vsel %vm558_vm9, %v550_v62, %v566_v2  ;;  %581 = vst [vmem:[#allocation2 + $0x20] sm:$0xff] %v573_v10  ;;  %v4633_v13 = vpack.c.bf16 %v573_v10, %v573_v10  ;;  %v5302_v29 = vld [vmem:[%s6402_s3 + $0x230] sm:$0xff]  }
  0x79   : > { %v551_v14 = vadd.f32 %v5751_v5, %v536_v4  ;;  %2094 = vmatprep.mubr.bf16.mxu0 %v5281_v9  ;;  %582 = vst [vmem:[#allocation2 + $0x30] sm:$0xff] %v574_v12  ;;  %v4634_v15 = vpack.c.bf16 %v574_v12, %v574_v12  ;;  %v552_v16 = vadd.f32 %v5751_v5, %v537_v6  ;;  %v5299_v17 = vld [vmem:[#allocation4 + $0x1c] ss:$36 sps:$4 sm:$0xff]   ;;  %v5307_v34 = vld [vmem:[#allocation4 + $0x64] ss:$36 sps:$4 sm:$0xff]   ;;  %v1191_v52 = vld [vmem:[#allocation2 + $0x1d1] sm:$0xff] }
  0x7a   : > { %997 = vst [vmem:[#allocation4 + $0x108] sm:$0xf] %v4630_v58  ;;  %1040 = vst [vmem:[#allocation4 + $0x58] sm:$0xf] %v4633_v13  ;;  %v5286_v19 = vld [vmem:[#allocation4 + $0xe0] ss:$36 sps:$4 sm:$0xff]   ;;  %v4664_v59 = vpack.c.bf16 %v1191_v52, %v1191_v52 }
  0x7b   : > { %vm559_vm10 = vcmp.ge.f32.partialorder %v551_v14, 0.0  ;;  %v567_v3 = vmul.f32 0.1, %v551_v14  ;;  %1041 = vst [vmem:[#allocation4 + $0x7c] sm:$0xf] %v4634_v15  ;;  %vm560_vm11 = vcmp.ge.f32.partialorder %v552_v16, 0.0 }
  0x7c   : > { %v1268_v7 = vld [vmem:[#allocation4 + $0xd8] sm:$0xff]  ;;  %v568_v22 = vmul.f32 0.1, %v552_v16  ;;  %v5457_v27 = vld [vmem:[%s6400_s1] ss:$0 sm:$0xff]  ;;  %v1190_v51 = vld [vmem:[#allocation2 + $0x1c1] sm:$0xff] }
  0x7d   : > { %v1273_v8 = vld [vmem:[#allocation4 + $0xfc] sm:$0xff]  ;;  %v575_v21 = vsel %vm559_vm10, %v551_v14, %v567_v3  ;;  %v538_v28 = vmul.f32 %v5457_v27, %v523_v24  ;;  %v539_v31 = vmul.f32 %v5457_v27, %v524_v26  ;;  %v685_v37 = vmul.f32 %v5457_v27, %v4212_v32  ;;  %v5311_v1 = vld [vmem:[#allocation4 + $0xa4] ss:$36 sps:$4 sm:$0xff]   ;;  %v5315_v2 = vld [vmem:[#allocation4 + $0xac] ss:$36 sps:$4 sm:$0xff]  }
  0x7e   : > { %v4324_v11 = vcombine.low %v1268_v7, %v1273_v8  ;;  %583 = vst [vmem:[#allocation2 + $0x40] sm:$0xff] %v575_v21  ;;  %v4635_v23 = vpack.c.bf16 %v575_v21, %v575_v21  ;;  %v576_v25 = vsel %vm560_vm11, %v552_v16, %v568_v22  ;;  %v4222_v33 = vld [vmem:[%s5739_s21 + $0xf8] sm:$0xff]  ;;  %v5458_v35 = vld [vmem:[%s6401_s2] ss:$0 sm:$0xff]  ;;  %v4663_v55 = vpack.c.bf16 %v1190_v51, %v1190_v51  ;;  %v1192_v56 = vld [vmem:[#allocation2 + $0x1e1] sm:$0xff] }
  0x7f   : > { %v5297_v5 = vld [vmem:[#allocation4 + $0x10] ss:$36 sps:$4 sm:$0xff]   ;;  %584 = vst [vmem:[#allocation2 + $0x50] sm:$0xff] %v576_v25  ;;  %v4636_v30 = vpack.c.bf16 %v576_v25, %v576_v25  ;;  %v553_v36 = vadd.f32 %v5458_v35, %v538_v28  ;;  %v757_v38 = vmul.f32 %v5457_v27, %v4222_v33  ;;  %v5301_v39 = vld [vmem:[#allocation4 + $0x18] ss:$36 sps:$4 sm:$0xff]   ;;  %v554_v41 = vadd.f32 %v5458_v35, %v539_v31  ;;  %v5310_v61 = vld [vmem:[%s6402_s3 + $0x220] sm:$0xff]  }
  0x80   : > { %2095 = vmatmul.mubr.bf16.gmra.mxu0 %v4324_v11  ;;  %1042 = vst [vmem:[#allocation4 + $0xa0] sm:$0xf] %v4635_v23  ;;  %v5303_v40 = vld [vmem:[#allocation4 + $0x5c] ss:$36 sps:$4 sm:$0xff]   ;;  %v700_v43 = vadd.f32 %v5458_v35, %v685_v37  ;;  %1230 = vst [vmem:[#allocation4 + $0x20] sm:$0xf] %v4663_v55  ;;  %v4665_v0 = vpack.c.bf16 %v1192_v56, %v1192_v56 }
  0x81   : > { %v5283_v18 = vld [vmem:[#allocation4 + $0xe4] ss:$36 sps:$4 sm:$0xff]   ;;  %2200 = vmatprep.mubr.bf16.mxu0 %v5294_v20  ;;  %1043 = vst [vmem:[#allocation4 + $0xc4] sm:$0xf] %v4636_v30  ;;  %vm561_vm12 = vcmp.ge.f32.partialorder %v553_v36, 0.0  ;;  %v772_v44 = vadd.f32 %v5458_v35, %v757_v38  ;;  %vm562_vm13 = vcmp.ge.f32.partialorder %v554_v41, 0.0 }
  0x82   : > { %2159 = vmatprep.mubr.bf16.mxu1 %v5283_v18  ;;  %v569_v42 = vmul.f32 0.1, %v553_v36  ;;  %v5305_v45 = vld [vmem:[#allocation4 + $0x58] ss:$36 sps:$4 sm:$0xff]   ;;  %v570_v48 = vmul.f32 0.1, %v554_v41 }
  0x83   : > { %2160 = vmatmul.mubr.bf16.gmra.mxu1 %v5286_v19  ;;  %vm708_vm14 = vcmp.ge.f32.partialorder %v700_v43, 0.0  ;;  %v716_v50 = vmul.f32 0.1, %v700_v43  ;;  %vm780_vm15 = vcmp.ge.f32.partialorder %v772_v44, 0.0  ;;  %v788_v54 = vmul.f32 0.1, %v772_v44 }
  0x84   : > { %2265 = vmatprep.mubr.bf16.mxu1 %v5299_v17  ;;  %v577_v49 = vsel %vm561_vm12, %v553_v36, %v569_v42  ;;  %v5309_v60 = vld [vmem:[#allocation4 + $0x60] ss:$36 sps:$4 sm:$0xff]   ;;  %1231 = vst [vmem:[#allocation4 + $0x44] sm:$0xf] %v4664_v59  ;;  %v5314_v6 = vld [vmem:[%s6402_s3 + $0x218] sm:$0xff]   ;;  %v5318_v9 = vld [vmem:[%s6402_s3 + $0x210] sm:$0xff]  }
  0x85   : > { %585 = vst [vmem:[#allocation2 + $0x60] sm:$0xff] %v577_v49  ;;  %v4637_v53 = vpack.c.bf16 %v577_v49, %v577_v49  ;;  %v724_v58 = vsel %vm708_vm14, %v700_v43, %v716_v50  ;;  %v796_v62 = vsel %vm780_vm15, %v772_v44, %v788_v54  ;;  %1232 = vst [vmem:[#allocation4 + $0x68] sm:$0xf] %v4665_v0  ;;  %v2818_v7 = vld [vmem:[#allocation3 + $0x92] sm:$0xff]  ;;  %v5317_v12 = vld [vmem:[#allocation4 + $0xa8] ss:$36 sps:$4 sm:$0xff]  }
  0x86   : > { %v4662_v63 = vpack.c.bf16 %v724_v58, %v724_v58  ;;  %805 = vst [vmem:[#allocation2 + $0x231] sm:$0xff] %v796_v62  ;;  %v4670_v4 = vpack.c.bf16 %v796_v62, %v796_v62  ;;  %v5319_v10 = vld [vmem:[#allocation4 + $0xec] ss:$36 sps:$4 sm:$0xff]   ;;  %v4742_v11 = vpack.c.bf16 %v2818_v7, %v2818_v7  ;;  %v5325_v20 = vld [vmem:[%s6402_s3 + $0x200] sm:$0xff]   ;;  %v5330_v28 = vld [vmem:[%s6405_s6 + $0x78] sm:$0xff]  }
  0x87   : > { %1044 = vst [vmem:[#allocation4 + $0xe8] sm:$0xf] %v4637_v53  ;;  %v5322_v14 = vld [vmem:[%s6402_s3 + $0x208] sm:$0xff]   ;;  %v2722_v16 = vld [vmem:[#allocation3 + $0x90] sm:$0xff]  ;;  %4915 = vmatprep.subr.bf16.mxu1 %v5330_v28  ;;  %v5334_v32 = vld [vmem:[%s6405_s6 + $0xf8] sm:$0xff]  }
  0x88   : > { %2201 = vmatmul.mubr.bf16.vlgmr.msra.gmra.mxu0 %v5297_v5  ;;  %1189 = vst [vmem:[#allocation4 + $0x118] sm:$0xf] %v4662_v63  ;;  %1237 = vst [vmem:[#allocation4 + $0x11c] sm:$0xf] %v4670_v4  ;;  %v5313_v8 = vld [vmem:[#allocation4 + $0xa0] ss:$36 sps:$4 sm:$0xff]   ;;  %v4726_v22 = vpack.c.bf16 %v2722_v16, %v2722_v16 }
  0x89   : > { %5100 = vmatpush3.bf16.msra.mxu0 %v5926_v46  ;;  %2208 = vmatprep.mubr.bf16.mxu0 %v5303_v40  ;;  %v578_v46 = vsel %vm562_vm13, %v554_v41, %v570_v48  ;;  %v2770_v17 = vld [vmem:[#allocation3 + $0x91] sm:$0xff]  ;;  %v5337_v35 = vld [vmem:[%s6405_s6 + $0x28] sm:$0xff]   ;;  %v5340_v38 = vld [vmem:[%s6405_s6 + $0x60] sm:$0xff]  }
  0x8a   : > { %5101 = vmatprep.subr.bf16.mxu0 %v5302_v29  ;;  %586 = vst [vmem:[#allocation2 + $0x70] sm:$0xff] %v578_v46  ;;  %v4638_v57 = vpack.c.bf16 %v578_v46, %v578_v46  ;;  %v1271_v21 = vld [vmem:[#allocation4 + $0xf0] sm:$0xff]  ;;  %v4734_v23 = vpack.c.bf16 %v2770_v17, %v2770_v17  ;;  %v5335_v33 = vld [vmem:[%s6405_s6 + $0xb8] sm:$0xff]   ;;  %v5342_v40 = vld [vmem:[%s6405_s6 + $0xe8] sm:$0xff]  }
  0x8b   : > { %2266 = vmatmul.mubr.bf16.vlgmr.msra.gmra.mxu1 %v5301_v39  ;;  %v5326_v19 = vld [vmem:[#allocation4 + $0x20] ss:$36 sps:$4 sm:$0xff]   ;;  %v5328_v27 = vld [vmem:[#allocation4 + $0xb0] ss:$36 sps:$4 sm:$0xff]   ;;  %v5343_v41 = vld [vmem:[%s6405_s6 + $0xa8] sm:$0xff]  }
  0x8c   : > { %2273 = vmatprep.mubr.bf16.mxu1 %v5307_v34  ;;  %1045 = vst [vmem:[#allocation4 + $0x10c] sm:$0xf] %v4638_v57  ;;  %v5327_v26 = vld [vmem:[#allocation4 + $0x68] ss:$36 sps:$4 sm:$0xff]   ;;  %v5332_v30 = vld [vmem:[%s6405_s6 + $0x70] sm:$0xff]   ;;  %v5341_v39 = vld [vmem:[%s6405_s6 + $0x20] sm:$0xff]  }
  0x8d   : > { %5102 = vmatpush3.bf16.msra.mxu0 %v5302_v29  ;;  %v1101_v13 = vld [vmem:[#allocation2 + $0x230] sm:$0xff]  ;;  %v5331_v29 = vld [vmem:[%s6405_s6 + $0x38] sm:$0xff]   ;;  %v5336_v34 = vld [vmem:[%s6405_s6 + $0x68] sm:$0xff]  }
  0x8e   : > { %5103 = vmatprep.subr.bf16.mxu0 %v5306_v47  ;;  %v4654_v15 = vpack.c.bf16 %v1101_v13, %v1101_v13  ;;  %4916 = vmatpush3.bf16.msra.mxu1 %v5331_v29  ;;  %v5333_v31 = vld [vmem:[%s6405_s6 + $0x30] sm:$0xff]   ;;  %v5344_v42 = vld [vmem:[%s6405_s6 + $0x58] sm:$0xff]   ;;  %v5346_v44 = vld [vmem:[%s6405_s6 + $0xe0] sm:$0xff]  }
  0x8f   : > { %v5329_v3 = vld [vmem:[#allocation4 + $0xf8] ss:$36 sps:$4 sm:$0xff]   ;;  %4917 = vmatprep.subr.bf16.mxu1 %v5332_v30  ;;  %v5338_v36 = vld [vmem:[%s6405_s6 + $0xf0] sm:$0xff]   ;;  %v5352_v51 = vld [vmem:[%s6405_s6 + $0x48] sm:$0xff]  }
  0x90   : > { %2209 = vmatmul.mubr.bf16.gmra.mxu0 %v5305_v45  ;;  %1141 = vst [vmem:[#allocation4 + $0x114] sm:$0xf] %v4654_v15  ;;  %2858 = vst [vmem:[#allocation4 + $0x11c] sm:$0xf] %v4742_v11  ;;  %v5323_v24 = vld [vmem:[#allocation4 + $0xf4] ss:$36 sps:$4 sm:$0xff]  }
  0x91   : > { %5104 = vmatpush3.bf16.msra.mxu0 %v5306_v47  ;;  %2216 = vmatprep.mubr.bf16.mxu0 %v5311_v1  ;;  %v5339_v37 = vld [vmem:[%s6405_s6 + $0xb0] sm:$0xff]   ;;  %v5345_v43 = vld [vmem:[%s6405_s6 + $0x18] sm:$0xff]   ;;  %v5347_v45 = vld [vmem:[%s6405_s6 + $0xa0] sm:$0xff]  }
  0x92   : > { %5105 = vmatprep.subr.bf16.mxu0 %v5310_v61  ;;  %4918 = vmatpush3.bf16.msra.mxu1 %v5333_v31  ;;  %v5348_v47 = vld [vmem:[%s6405_s6 + $0x50] sm:$0xff]   ;;  %v5350_v49 = vld [vmem:[%s6405_s6 + $0xd8] sm:$0xff]   ;;  %v5353_v52 = vld [vmem:[%s6405_s6 + $0x8] sm:$0xff]  }
  0x93   : > { %2274 = vmatmul.mubr.bf16.gmra.mxu1 %v5309_v60  ;;  %v5321_v18 = vld [vmem:[#allocation4 + $0xe8] ss:$36 sps:$4 sm:$0xff]   ;;  %4919 = vmatprep.subr.bf16.mxu1 %v5336_v34  ;;  %v5349_v48 = vld [vmem:[%s6405_s6 + $0x10] sm:$0xff]   ;;  %v5351_v50 = vld [vmem:[%s6405_s6 + $0x98] sm:$0xff]  }
  0x94   : > { %2281 = vmatprep.mubr.bf16.mxu1 %v5315_v2  ;;  %v5354_v46 = vld [vmem:[%s6405_s6 + $0xd0] sm:$0xff]   ;;  %v5356_v54 = vld [vmem:[%s6405_s6 + $0x40] sm:$0xff]   ;;  %v5358_v56 = vld [vmem:[%s6405_s6 + $0xc8] sm:$0xff]  }
  0x95   : > { %5106 = vmatpush3.bf16.msra.mxu0 %v5310_v61  ;;  %v5355_v53 = vld [vmem:[%s6405_s6 + $0x90] sm:$0xff]   ;;  %v5357_v55 = vld [vmem:[%s6405_s6] sm:$0xff]   ;;  %v5359_v57 = vld [vmem:[%s6405_s6 + $0x88] sm:$0xff]  }
  0x96   : > { %5107 = vmatprep.subr.bf16.mxu0 %v5314_v6  ;;  %4920 = vmatpush3.bf16.msra.mxu1 %v5337_v35  ;;  %v5363_v58 = vld [vmem:[%s6405_s6 + $0x178] sm:$0xff]   ;;  %v5364_v59 = vld [vmem:[%s6405_s6 + $0xc0] sm:$0xff]  }
  0x97   : > { %v1276_v5 = vld [vmem:[#allocation4 + $0x114] sm:$0xff]  ;;  %4921 = vmatprep.subr.bf16.mxu1 %v5340_v38  ;;  %v5366_v60 = vld [vmem:[%s6405_s6 + $0x80] sm:$0xff]  }
  0x98   : > { %2217 = vmatmul.mubr.bf16.gmra.mxu0 %v5313_v8  ;;  %2762 = vst [vmem:[#allocation4 + $0x114] sm:$0xf] %v4726_v22  ;;  %2810 = vst [vmem:[#allocation4 + $0x118] sm:$0xf] %v4734_v23  ;;  %v4330_v25 = vcombine.low %v1271_v21, %v1276_v5  ;;  %v5374_v61 = vld [vmem:[%s6405_s6 + $0x1f8] sm:$0xff]  }
  0x99   : > { %5108 = vmatpush3.bf16.msra.mxu0 %v5314_v6  ;;  %2224 = vmatprep.mubr.bf16.mxu0 %v5319_v10 }
  0x9a   : > { %5109 = vmatprep.subr.bf16.mxu0 %v5318_v9  ;;  %4922 = vmatpush3.bf16.msra.mxu1 %v5341_v39 }
  0x9b   : > { %2282 = vmatmul.mubr.bf16.gmra.mxu1 %v5317_v12  ;;  %4923 = vmatprep.subr.bf16.mxu1 %v5344_v42 }
  0x9c   : > { %2289 = vmatprep.mubr.bf16.mxu1 %v5323_v24 }
  0x9d   : > { %5110 = vmatpush3.bf16.msra.mxu0 %v5318_v9 }
  0x9e   : > { %5111 = vmatprep.subr.bf16.mxu0 %v5322_v14  ;;  %4924 = vmatpush3.bf16.msra.mxu1 %v5345_v43 }
  0x9f   : > { %4925 = vmatprep.subr.bf16.mxu1 %v5348_v47 }
  0xa0   : > { %2225 = vmatmul.mubr.bf16.gmra.mxu0 %v5321_v18 }
  0xa1   : > { %5112 = vmatpush3.bf16.msra.mxu0 %v5322_v14  ;;  %5115 = vmatprep.mubr.bf16.mxu0 %v5326_v19 }
  0xa2   : > { %5113 = vmatprep.subr.bf16.mxu0 %v5325_v20  ;;  %4926 = vmatpush3.bf16.msra.mxu1 %v5349_v48 }
  0xa3   : > { %2290 = vmatmul.mubr.bf16.gmra.mxu1 %v4330_v25  ;;  %4927 = vmatprep.subr.bf16.mxu1 %v5352_v51 }
  0xa5   : > { %5114 = vmatpush3.bf16.msra.mxu0 %v5325_v20 }
  0xa6   : > { %4955 = vmatprep.subr.bf16.mxu0 %v5334_v32  ;;  %4928 = vmatpush3.bf16.msra.mxu1 %v5353_v52 }
  0xa7   : > { %4929 = vmatprep.subr.bf16.mxu1 %v5356_v54 }
  0xa8   : > { %5116 = vmatmul.mubr.bf16.vlgmr.msra.gmra.mxu0 %v5327_v26 }
  0xa9   : > { %5119 = vmatprep.mubr.bf16.mxu0 %v5328_v27  ;;  %4956 = vmatpush3.bf16.msra.mxu0 %v5335_v33 }
  0xaa   : > { %4957 = vmatprep.subr.bf16.mxu0 %v5338_v36  ;;  %4930 = vmatpush3.bf16.msra.mxu1 %v5357_v55 }
  0xab   : > { %4995 = vmatprep.subr.bf16.mxu1 %v5363_v58 }
  0xad   : > { %4958 = vmatpush3.bf16.msra.mxu0 %v5339_v37 }
  0xae   : > { %4959 = vmatprep.subr.bf16.mxu0 %v5342_v40 }
  0xb0   : > { %5120 = vmatmul.mubr.bf16.gmra.mxu0 %v5329_v3 }
  0xb1   : > { %4960 = vmatpush3.bf16.msra.mxu0 %v5343_v41 }
  0xb2   : > { %4961 = vmatprep.subr.bf16.mxu0 %v5346_v44 }
  0xb5   : > { %4962 = vmatpush3.bf16.msra.mxu0 %v5347_v45 }
  0xb6   : > { %4963 = vmatprep.subr.bf16.mxu0 %v5350_v49 }
  0xb9   : > { %4964 = vmatpush3.bf16.msra.mxu0 %v5351_v50 }
  0xba   : > { %4965 = vmatprep.subr.bf16.mxu0 %v5354_v46 }
  0xbd   : > { %4966 = vmatpush3.bf16.msra.mxu0 %v5355_v53 }
  0xbe   : > { %4967 = vmatprep.subr.bf16.mxu0 %v5358_v56 }
  0xc1   : > { %4968 = vmatpush3.bf16.msra.mxu0 %v5359_v57 }
  0xc2   : > { %4969 = vmatprep.subr.bf16.mxu0 %v5364_v59 }
  0xc5   : > { %4970 = vmatpush3.bf16.msra.mxu0 %v5366_v60 }
  0xc6   : > { %5035 = vmatprep.subr.bf16.mxu0 %v5374_v61 }
 0x118   : > { %v4759_v62 = vpop.f32.mrf.mxu0 }
 0x11a   : > { %v4799_v63 = vpop.f32.mrf.mxu1  ;;  %v4760_v0 = vpop.f32.mrf.mxu0 }
 0x11b   : > { %v4761_v46 = vadd.f32 %v4760_v0, %v4759_v62 }
 0x11c   : > { %v4800_v1 = vpop.f32.mrf.mxu1  ;;  %v4762_v2 = vpop.f32.mrf.mxu0 }
 0x11d   : > { %v4801_v53 = vadd.f32 %v4800_v1, %v4799_v63 }
 0x11e   : > { %v4802_v4 = vpop.f32.mrf.mxu1  ;;  %v4763_v6 = vpop.f32.mrf.mxu0 }
 0x120   : > { %v4803_v7 = vpop.f32.mrf.mxu1 }
 0x122   : > { %v4765_v8 = vpop.f32.mrf.mxu0 }
 0x124   : > { %v4766_v10 = vpop.f32.mrf.mxu0 }
 0x125   : > { %v4805_v9 = vpop.f32.mrf.mxu1  ;;  %v4767_v51 = vadd.f32 %v4766_v10, %v4765_v8  ;;  %v4804_v8 = vadd.f32 %v4803_v7, %v4802_v4 }
 0x126   : > { %v4768_v12 = vpop.f32.mrf.mxu0 }
 0x127   : > { %v4806_v11 = vpop.f32.mrf.mxu1 }
 0x128   : > { %v4769_v14 = vpop.f32.mrf.mxu0  ;;  %v4807_v52 = vadd.f32 %v4806_v11, %v4805_v9 }
 0x129   : > { %v4808_v13 = vpop.f32.mrf.mxu1  ;;  %v4770_v56 = vadd.f32 %v4769_v14, %v4768_v12 }
 0x12a   : > { %v2146_v61 = vadd.f32 %v4807_v52, %v4767_v51 }
 0x12b   : > { %v4809_v15 = vpop.f32.mrf.mxu1 }
 0x12c   : > { %v4810_v57 = vadd.f32 %v4809_v15, %v4808_v13 }
 0x12e   : > { %v2149_v11 = vadd.f32 %v4810_v57, %v4770_v56 }
 0x12f   : > { %v4771_v16 = vpop.f32.mrf.mxu0 }
 0x131   : > { %v4772_v3 = vpop.f32.mrf.mxu0 }
 0x132   : > { %v4773_v1 = vadd.f32 %v4772_v3, %v4771_v16 }
 0x133   : > { %v4774_v19 = vpop.f32.mrf.mxu0 }
 0x134   : > { %v4811_v17 = vpop.f32.mrf.mxu1 }
 0x135   : > { %v4775_v21 = vpop.f32.mrf.mxu0 }
 0x136   : > { %v4812_v18 = vpop.f32.mrf.mxu1  ;;  %v4776_v14 = vadd.f32 %v4775_v21, %v4774_v19  ;;  %v6090_v19 = vld [vmem:[%s6403_s4] ss:$0 sm:$0xff] }
 0x137   : > { %v4813_v12 = vadd.f32 %v4812_v18, %v4811_v17 }
 0x138   : > { %v4814_v20 = vpop.f32.mrf.mxu1 }
 0x13a   : > { %v4815_v22 = vpop.f32.mrf.mxu1 }
 0x13b   : > { %v4816_v13 = vadd.f32 %v4815_v22, %v4814_v20 }
 0x13d   : > { %v2157_v20 = vadd.f32 %v4816_v13, %v4776_v14 }
 0x140   : > { %v4777_v23 = vpop.f32.mrf.mxu0 }
 0x142   : > { %v4778_v5 = vpop.f32.mrf.mxu0 }
 0x143   : > { %v4817_v24 = vpop.f32.mrf.mxu1 }
 0x144   : > { %v4780_v25 = vpop.f32.mrf.mxu0 }
 0x145   : > { %v4818_v26 = vpop.f32.mrf.mxu1 }
 0x146   : > { %v4781_v27 = vpop.f32.mrf.mxu0 }
 0x147   : > { %v4820_v28 = vpop.f32.mrf.mxu1 }
 0x148   : > { %v4839_v29 = vpop.f32.mrf.mxu0 }
 0x149   : > { %v4821_v30 = vpop.f32.mrf.mxu1 }
 0x14a   : > { %v4840_v31 = vpop.f32.mrf.mxu0  ;;  %v4822_v7 = vadd.f32 %v4821_v30, %v4820_v28  ;;  %v6097_v30 = vld [vmem:[%s6404_s5] ss:$0 sm:$0xff] }
 0x14b   : > { %v4879_v32 = vpop.f32.mrf.mxu1 }
 0x14c   : > { %v4842_v33 = vpop.f32.mrf.mxu0 }
 0x14d   : > { %v4880_v34 = vpop.f32.mrf.mxu1 }
 0x14e   : > { %v4843_v35 = vpop.f32.mrf.mxu0 }
 0x14f   : > { %v6077_v36 = vpop.f32.mrf.mxu1 }
 0x150   : > { %6408 = vst [vmem:[#allocation6_spill] sm:$0xff] %v6077_v36  ;;  %v4845_v37 = vpop.f32.mrf.mxu0  ;;  %v2138_v36 = vadd.f32 %v4801_v53, %v4761_v46 }
 0x151   : > { %v6079_v38 = vpop.f32.mrf.mxu1 }
 0x152   : > { %6409 = vst [vmem:[#allocation7_spill] sm:$0xff] %v6079_v38  ;;  %v4846_v39 = vpop.f32.mrf.mxu0  ;;  %v4841_v38 = vadd.f32 %v4840_v31, %v4839_v29  ;;  %v4881_v29 = vadd.f32 %v4880_v34, %v4879_v32  ;;  %v4782_v31 = vadd.f32 %v4781_v27, %v4780_v25 }
 0x153   : > { %v4885_v40 = vpop.f32.mrf.mxu1  ;;  %v4847_v58 = vadd.f32 %v4846_v39, %v4845_v37  ;;  %v4779_v39 = vadd.f32 %v4778_v5, %v4777_v23 }
 0x154   : > { %v4848_v41 = vpop.f32.mrf.mxu0  ;;  %v2203_v51 = vadd.f32 %v4841_v38, %v2138_v36 }
 0x155   : > { %v4886_v42 = vpop.f32.mrf.mxu1  ;;  %v2211_v0 = vadd.f32 %v4847_v58, %v2146_v61 }
 0x156   : > { %v4849_v43 = vpop.f32.mrf.mxu0  ;;  %v4887_v62 = vadd.f32 %v4886_v42, %v4885_v40  ;;  %v2268_v23 = vadd.f32 %v4881_v29, %v2203_v51 }
 0x157   : > { %v4888_v44 = vpop.f32.mrf.mxu1  ;;  %v4850_v63 = vadd.f32 %v4849_v43, %v4848_v41  ;;  %v2154_v41 = vadd.f32 %v4813_v12, %v4773_v1 }
 0x158   : > { %v4851_v45 = vpop.f32.mrf.mxu0  ;;  %v2276_v53 = vadd.f32 %v4887_v62, %v2211_v0 }
 0x159   : > { %v4889_v47 = vpop.f32.mrf.mxu1  ;;  %v2214_v52 = vadd.f32 %v4850_v63, %v2149_v11  ;;  %v6413_v25 = vld [vmem:[#allocation7_spill] sm:$0xff] }
 0x15a   : > { %v4852_v48 = vpop.f32.mrf.mxu0  ;;  %v4890_v46 = vadd.f32 %v4889_v47, %v4888_v44 }
 0x15b   : > { %v6081_v49 = vpop.f32.mrf.mxu1  ;;  %v4853_v16 = vadd.f32 %v4852_v48, %v4851_v45 }
 0x15c   : > { %6410 = vst [vmem:[#allocation8_spill] sm:$0xff] %v6081_v49  ;;  %v4854_v50 = vpop.f32.mrf.mxu0  ;;  %v4764_v49 = vadd.f32 %v4763_v6, %v4762_v2  ;;  %v4844_v2 = vadd.f32 %v4843_v35, %v4842_v33  ;;  %v2165_v33 = vadd.f32 %v4822_v7, %v4782_v31  ;;  %v2279_v38 = vadd.f32 %v4890_v46, %v2214_v52 }
 0x15d   : > { %v4892_v54 = vpop.f32.mrf.mxu1  ;;  %v2219_v42 = vadd.f32 %v4853_v16, %v2154_v41 }
 0x15e   : > { %v4855_v55 = vpop.f32.mrf.mxu0  ;;  %v2141_v40 = vadd.f32 %v4804_v8, %v4764_v49 }
 0x15f   : > { %v6083_v59 = vpop.f32.mrf.mxu1  ;;  %v4856_v27 = vadd.f32 %v4855_v55, %v4854_v50 }
 0x160   : > { %6411 = vst [vmem:[#allocation9_spill] sm:$0xff] %v6083_v59  ;;  %v4857_v60 = vpop.f32.mrf.mxu0  ;;  %v4819_v59 = vadd.f32 %v4818_v26, %v4817_v24  ;;  %v2206_v5 = vadd.f32 %v4844_v2, %v2141_v40  ;;  %v6412_v24 = vld [vmem:[#allocation6_spill] sm:$0xff] }
 0x161   : > { %v6085_v10 = vpop.f32.mrf.mxu1  ;;  %v4884_v26 = vadd.f32 %v6413_v25, %v6412_v24  ;;  %v2222_v56 = vadd.f32 %v4856_v27, %v2157_v20 }
 0x162   : > { %v4858_v9 = vpop.f32.mrf.mxu0  ;;  %v2162_v21 = vadd.f32 %v4819_v59, %v4779_v39 }
 0x163   : > { %v4897_v15 = vpop.f32.mrf.mxu1  ;;  %v4859_v17 = vadd.f32 %v4858_v9, %v4857_v60  ;;  %v6414_v43 = vld [vmem:[#allocation8_spill] sm:$0xff]  ;;  %v2271_v59 = vadd.f32 %v4884_v26, %v2206_v5 }
 0x164   : > { %v4860_v37 = vpop.f32.mrf.mxu0  ;;  %v4893_v44 = vadd.f32 %v4892_v54, %v6414_v43 }
 0x165   : > { %v4898_v4 = vpop.f32.mrf.mxu1  ;;  %v2227_v45 = vadd.f32 %v4859_v17, %v2162_v21 }
 0x166   : > { %v4861_v6 = vpop.f32.mrf.mxu0  ;;  %v4899_v47 = vadd.f32 %v4898_v4, %v4897_v15  ;;  %v2284_v1 = vadd.f32 %v4893_v44, %v2219_v42 }
 0x167   : > { %v4900_v3 = vpop.f32.mrf.mxu1  ;;  %v4862_v28 = vadd.f32 %v4861_v6, %v4860_v37  ;;  %v6415_v54 = vld [vmem:[#allocation9_spill] sm:$0xff] }
 0x168   : > { %v5117_v18 = vpop.f32.mrf.mxu0  ;;  %v4896_v11 = vadd.f32 %v6085_v10, %v6415_v54  ;;  %v2292_v62 = vadd.f32 %v4899_v47, %v2227_v45 }
 0x169   : > { %v2341_v22 = vadd.f32 %v5117_v18, %v2276_v53  ;;  %v4901_v34 = vpop.f32.mrf.mxu1  ;;  %v2230_v57 = vadd.f32 %v4862_v28, %v2165_v33 }
 0x16a   : > { %v2332_v32 = vpop.f32.mrf.mxu0  ;;  %v4902_v58 = vadd.f32 %v4901_v34, %v4900_v3  ;;  %v2287_v41 = vadd.f32 %v4896_v11, %v2222_v56 }
 0x16b   : > { %v2372_v35 = vmul.f32 %v6090_v19, %v2341_v22  ;;  %v2333_v36 = vadd.f32 %v2332_v32, %v2268_v23 }
 0x16c   : > { %v5118_v48 = vpop.f32.mrf.mxu0  ;;  %v2295_v51 = vadd.f32 %v4902_v58, %v2230_v57 }
 0x16d   : > { %v2387_v49 = vadd.f32 %v6097_v30, %v2372_v35  ;;  %v2370_v50 = vmul.f32 %v6090_v19, %v2333_v36  ;;  %v2344_v55 = vadd.f32 %v5118_v48, %v2279_v38 }
 0x16e   : > { %v2335_v60 = vpop.f32.mrf.mxu0 }
 0x16f   : > { %vm2395_vm0 = vcmp.ge.f32.partialorder %v2387_v49, 0.0  ;;  %v2403_v61 = vmul.f32 0.1, %v2387_v49  ;;  %v2385_v8 = vadd.f32 %v6097_v30, %v2370_v50  ;;  %v2373_v9 = vmul.f32 %v6090_v19, %v2344_v55 }
 0x170   : > { %v2336_v0 = vadd.f32 %v2335_v60, %v2271_v59  ;;  %v5121_v63 = vpop.f32.mrf.mxu0 }
 0x171   : > { %v2411_v12 = vsel %vm2395_vm0, %v2387_v49, %v2403_v61  ;;  %vm2393_vm1 = vcmp.ge.f32.partialorder %v2385_v8, 0.0  ;;  %v2401_v14 = vmul.f32 0.1, %v2385_v8  ;;  %v2388_v13 = vadd.f32 %v6097_v30, %v2373_v9 }
 0x172   : > { %2420 = vst [vmem:[#allocation3 + $0x31] sm:$0xff] %v2411_v12  ;;  %v2371_v15 = vmul.f32 %v6090_v19, %v2336_v0  ;;  %v2357_v37 = vadd.f32 %v5121_v63, %v2292_v62  ;;  %v2348_v39 = vpop.f32.mrf.mxu0  ;;  %v4682_v29 = vpack.c.bf16 %v2411_v12, %v2411_v12 }
 0x173   : > { %v2409_v31 = vsel %vm2393_vm1, %v2385_v8, %v2401_v14  ;;  %vm2396_vm2 = vcmp.ge.f32.partialorder %v2388_v13, 0.0  ;;  %v2404_v2 = vmul.f32 0.1, %v2388_v13  ;;  %v2349_v10 = vadd.f32 %v2348_v39, %v2284_v1 }
 0x174   : > { %2418 = vst [vmem:[#allocation3 + $0x11] sm:$0xff] %v2409_v31  ;;  %v2386_v4 = vadd.f32 %v6097_v30, %v2371_v15  ;;  %v2376_v6 = vmul.f32 %v6090_v19, %v2357_v37  ;;  %v5122_v7 = vpop.f32.mrf.mxu0  ;;  %v4680_v52 = vpack.c.bf16 %v2409_v31, %v2409_v31  ;;  %2517 = vst [vmem:[#allocation4 + $0x70] sm:$0xf] %v4682_v29 }
 0x175   : > { %2804 = vst [vmem:[#allocation4 + $0x40] sm:$0xf] %v4682_v29  ;;  %2660 = vst [vmem:[#allocation4 + $0x58] sm:$0xf] %v4682_v29  ;;  %v2412_v46 = vsel %vm2396_vm2, %v2388_v13, %v2404_v2  ;;  %v2374_v53 = vmul.f32 %v6090_v19, %v2349_v10  ;;  %v2360_v40 = vadd.f32 %v5122_v7, %v2295_v51  ;;  %v5365_v13 = vld [vmem:[%s6405_s6 + $0x138] sm:$0xff]   ;;  %v5372_v51 = vld [vmem:[%s6405_s6 + $0x170] sm:$0xff]  }
 0x176   : > { %2421 = vst [vmem:[#allocation3 + $0x41] sm:$0xff] %v2412_v46  ;;  %vm2394_vm3 = vcmp.ge.f32.partialorder %v2386_v4, 0.0  ;;  %v2402_v16 = vmul.f32 0.1, %v2386_v4  ;;  %v2391_v17 = vadd.f32 %v6097_v30, %v2376_v6  ;;  %v2351_v3 = vpop.f32.mrf.mxu0  ;;  %2515 = vst [vmem:[#allocation4 + $0x28] sm:$0xf] %v4680_v52  ;;  %v4683_v18 = vpack.c.bf16 %v2412_v46, %v2412_v46 }
 0x177   : > { %2658 = vst [vmem:[#allocation4 + $0x10] sm:$0xf] %v4680_v52  ;;  %v2389_v20 = vadd.f32 %v6097_v30, %v2374_v53  ;;  %v2377_v21 = vmul.f32 %v6090_v19, %v2360_v40  ;;  %v2352_v22 = vadd.f32 %v2351_v3, %v2287_v41  ;;  %v5373_v46 = vld [vmem:[%s6405_s6 + $0x130] sm:$0xff]   ;;  %v5377_v40 = vld [vmem:[%s6405_s6 + $0x1b8] sm:$0xff]   ;;  %v5378_v3 = vld [vmem:[%s6405_s6 + $0x168] sm:$0xff]  }
 0x178   : > { %v2410_v23 = vsel %vm2394_vm3, %v2386_v4, %v2402_v16  ;;  %vm2399_vm4 = vcmp.ge.f32.partialorder %v2391_v17, 0.0  ;;  %v2407_v5 = vmul.f32 0.1, %v2391_v17  ;;  %2518 = vst [vmem:[#allocation4 + $0x94] sm:$0xf] %v4683_v18 }
 0x179   : > { %2661 = vst [vmem:[#allocation4 + $0x7c] sm:$0xf] %v4683_v18  ;;  %2805 = vst [vmem:[#allocation4 + $0x64] sm:$0xf] %v4683_v18  ;;  %v2429_v24 = vld [vmem:[#allocation3 + $0x30] sm:$0xff]  ;;  %vm2397_vm5 = vcmp.ge.f32.partialorder %v2389_v20, 0.0  ;;  %v2392_v27 = vadd.f32 %v6097_v30, %v2377_v21  ;;  %v2375_v28 = vmul.f32 %v6090_v19, %v2352_v22  ;;  %v4681_v34 = vpack.c.bf16 %v2410_v23, %v2410_v23 }
 0x17a   : > { %v2525_v25 = vld [vmem:[#allocation3 + $0x32] sm:$0xff]  ;;  %2419 = vst [vmem:[#allocation3 + $0x21] sm:$0xff] %v2410_v23  ;;  %v2405_v26 = vmul.f32 0.1, %v2389_v20  ;;  %v2415_v32 = vsel %vm2399_vm4, %v2391_v17, %v2407_v5  ;;  %v4674_v33 = vpack.c.bf16 %v2429_v24, %v2429_v24  ;;  %v5379_v21 = vld [vmem:[%s6405_s6 + $0x128] sm:$0xff]   ;;  %v5384_v24 = vld [vmem:[%s6405_s6 + $0x160] sm:$0xff]  }
 0x17b   : > { %v4690_v35 = vpack.c.bf16 %v2525_v25, %v2525_v25  ;;  %v2427_v36 = vld [vmem:[#allocation3 + $0x10] sm:$0xff]  ;;  %2424 = vst [vmem:[#allocation3 + $0x71] sm:$0xff] %v2415_v32  ;;  %vm2400_vm6 = vcmp.ge.f32.partialorder %v2392_v27, 0.0  ;;  %v2408_v43 = vmul.f32 0.1, %v2392_v27  ;;  %v2390_v44 = vadd.f32 %v6097_v30, %v2375_v28  ;;  %v5390_v28 = vld [vmem:[%s6405_s6 + $0x1a8] sm:$0xff]  }
 0x17c   : > { %v2523_v38 = vld [vmem:[#allocation3 + $0x12] sm:$0xff]  ;;  %v2413_v42 = vsel %vm2397_vm5, %v2389_v20, %v2405_v26  ;;  %v4672_v45 = vpack.c.bf16 %v2427_v36, %v2427_v36  ;;  %2469 = vst [vmem:[#allocation4 + $0x6c] sm:$0xf] %v4674_v33  ;;  %2516 = vst [vmem:[#allocation4 + $0x4c] sm:$0xf] %v4681_v34  ;;  %v4686_v48 = vpack.c.bf16 %v2415_v32, %v2415_v32  ;;  %v5387_v26 = vld [vmem:[%s6405_s6 + $0x1e8] sm:$0xff]  }
 0x17d   : > { %2422 = vst [vmem:[#allocation3 + $0x51] sm:$0xff] %v2413_v42  ;;  %v4688_v47 = vpack.c.bf16 %v2523_v38, %v2523_v38  ;;  %2565 = vst [vmem:[#allocation4 + $0x74] sm:$0xf] %v4690_v35  ;;  %v4684_v19 = vpack.c.bf16 %v2413_v42, %v2413_v42  ;;  %v2430_v49 = vld [vmem:[#allocation3 + $0x40] sm:$0xff]  ;;  %v2416_v55 = vsel %vm2400_vm6, %v2392_v27, %v2408_v43  ;;  %vm2398_vm7 = vcmp.ge.f32.partialorder %v2390_v44, 0.0  ;;  %v5380_v18 = vld [vmem:[%s6405_s6 + $0x1f0] sm:$0xff]  }
 0x17e   : > { %2612 = vst [vmem:[#allocation4 + $0x54] sm:$0xf] %v4674_v33  ;;  %2659 = vst [vmem:[#allocation4 + $0x34] sm:$0xf] %v4681_v34  ;;  %v2526_v50 = vld [vmem:[#allocation3 + $0x42] sm:$0xff]  ;;  %v4698_v57 = vpack.c.bf16 %v2430_v49, %v2430_v49  ;;  %v4710_v58 = vpack.c.bf16 %v2416_v55, %v2416_v55  ;;  %v5383_v23 = vld [vmem:[%s6405_s6 + $0x1b0] sm:$0xff]  }
 0x17f   : > { %2756 = vst [vmem:[#allocation4 + $0x3c] sm:$0xf] %v4674_v33  ;;  %2803 = vst [vmem:[#allocation4 + $0x1c] sm:$0xf] %v4681_v34  ;;  %v2406_v30 = vmul.f32 0.1, %v2390_v44  ;;  %v4737_v56 = vpack.c.bf16 %v2526_v50, %v2526_v50 }
 0x180   : > { %2708 = vst [vmem:[#allocation4 + $0x5c] sm:$0xf] %v4690_v35  ;;  %2852 = vst [vmem:[#allocation4 + $0x44] sm:$0xf] %v4690_v35  ;;  %v5362_v31 = vld [vmem:[#allocation4 + $0x4] ss:$36 sps:$4 sm:$0xff]  }
 0x181   : > { %2425 = vst [vmem:[#allocation3 + $0x81] sm:$0xff] %v2416_v55  ;;  %2467 = vst [vmem:[#allocation4 + $0x24] sm:$0xf] %v4672_v45  ;;  %v2414_v59 = vsel %vm2398_vm7, %v2390_v44, %v2406_v30  ;;  %v2428_v60 = vld [vmem:[#allocation3 + $0x20] sm:$0xff]  ;;  %3707 = vmatprep.mubr.bf16.mxu1 %v5362_v31  ;;  %v5391_v32 = vld [vmem:[%s6405_s6 + $0x158] sm:$0xff]  }
 0x182   : > { %2563 = vst [vmem:[#allocation4 + $0x2c] sm:$0xf] %v4688_v47  ;;  %2610 = vst [vmem:[#allocation4 + $0xc] sm:$0xf] %v4672_v45  ;;  %v2524_v61 = vld [vmem:[#allocation3 + $0x22] sm:$0xff]  ;;  %v4685_v8 = vpack.c.bf16 %v2414_v59, %v2414_v59  ;;  %v4673_v9 = vpack.c.bf16 %v2428_v60, %v2428_v60  ;;  %v2433_v11 = vld [vmem:[#allocation3 + $0x70] sm:$0xff] }
 0x183   : > { %2519 = vst [vmem:[#allocation4 + $0xb8] sm:$0xf] %v4684_v19  ;;  %2521 = vst [vmem:[#allocation4 + $0x100] sm:$0xf] %v4686_v48  ;;  %v4689_v54 = vpack.c.bf16 %v2524_v61, %v2524_v61  ;;  %v2529_v0 = vld [vmem:[#allocation3 + $0x72] sm:$0xff]  ;;  %v4678_v1 = vpack.c.bf16 %v2433_v11, %v2433_v11  ;;  %v5386_v27 = vld [vmem:[%s6405_s6 + $0x120] sm:$0xff]  }
 0x184   : > { %2706 = vst [vmem:[#allocation4 + $0x14] sm:$0xf] %v4688_v47  ;;  %2806 = vst [vmem:[#allocation4 + $0x88] sm:$0xf] %v4684_v19  ;;  %v2431_v62 = vld [vmem:[#allocation3 + $0x50] sm:$0xff]  ;;  %v4694_v12 = vpack.c.bf16 %v2529_v0, %v2529_v0  ;;  %v5392_v35 = vld [vmem:[%s6405_s6 + $0x118] sm:$0xff]  }
 0x185   : > { %2662 = vst [vmem:[#allocation4 + $0xa0] sm:$0xf] %v4684_v19  ;;  %2808 = vst [vmem:[#allocation4 + $0xd0] sm:$0xf] %v4686_v48  ;;  %v2527_v63 = vld [vmem:[#allocation3 + $0x52] sm:$0xff]  ;;  %v4676_v15 = vpack.c.bf16 %v2431_v62, %v2431_v62  ;;  %v5393_v36 = vld [vmem:[%s6405_s6 + $0x1e0] sm:$0xff]  }
 0x186   : > { %2664 = vst [vmem:[#allocation4 + $0xe8] sm:$0xf] %v4686_v48  ;;  %2853 = vst [vmem:[#allocation4 + $0x68] sm:$0xf] %v4737_v56  ;;  %v4738_v14 = vpack.c.bf16 %v2527_v63, %v2527_v63  ;;  %v5367_v53 = vld [vmem:[#allocation4 + $0x4c] ss:$36 sps:$4 sm:$0xff]  }
 0x187   : > { %2423 = vst [vmem:[#allocation3 + $0x61] sm:$0xff] %v2414_v59  ;;  %2613 = vst [vmem:[#allocation4 + $0x78] sm:$0xf] %v4698_v57  ;;  %v2890_v22 = vld [vmem:[#allocation4 + $0x6c] sm:$0xff]  ;;  %v5396_v44 = vld [vmem:[%s6405_s6 + $0x1a0] sm:$0xff]  }
 0x188   : > { %2470 = vst [vmem:[#allocation4 + $0x90] sm:$0xf] %v4698_v57  ;;  %2566 = vst [vmem:[#allocation4 + $0x98] sm:$0xf] %v4737_v56  ;;  %v2577_v37 = vld [vmem:[#allocation3 + $0x80] sm:$0xff]  ;;  %v5397_v45 = vld [vmem:[%s6405_s6 + $0x150] sm:$0xff]  }
 0x189   : > { %2709 = vst [vmem:[#allocation4 + $0x80] sm:$0xf] %v4737_v56  ;;  %2757 = vst [vmem:[#allocation4 + $0x60] sm:$0xf] %v4698_v57  ;;  %v2673_v39 = vld [vmem:[#allocation3 + $0x82] sm:$0xff]  ;;  %v4702_v2 = vpack.c.bf16 %v2577_v37, %v2577_v37  ;;  %v5400_v19 = vld [vmem:[%s6405_s6 + $0x1d8] sm:$0xff]  }
 0x18a   : > { %2665 = vst [vmem:[#allocation4 + $0x10c] sm:$0xf] %v4710_v58  ;;  %2809 = vst [vmem:[#allocation4 + $0xf4] sm:$0xf] %v4710_v58  ;;  %v5360_v29 = vld [vmem:[#allocation4] ss:$36 sps:$4 sm:$0xff]   ;;  %v4718_v10 = vpack.c.bf16 %v2673_v39, %v2673_v39 }
 0x18b   : > { %2520 = vst [vmem:[#allocation4 + $0xdc] sm:$0xf] %v4685_v8  ;;  %2663 = vst [vmem:[#allocation4 + $0xc4] sm:$0xf] %v4685_v8  ;;  %3708 = vmatmul.mubr.bf16.vlgmr.msra.gmra.mxu1 %v5360_v29  ;;  %v5369_v41 = vld [vmem:[#allocation4 + $0x8] ss:$36 sps:$4 sm:$0xff]  }
 0x18c   : > { %2807 = vst [vmem:[#allocation4 + $0xac] sm:$0xf] %v4685_v8  ;;  %2468 = vst [vmem:[#allocation4 + $0x48] sm:$0xf] %v4673_v9  ;;  %4996 = vmatpush3.bf16.msra.mxu1 %v5365_v13  ;;  %3715 = vmatprep.mubr.bf16.mxu1 %v5367_v53  ;;  %v5381_v25 = vld [vmem:[#allocation4 + $0x94] ss:$36 sps:$4 sm:$0xff]  }
 0x18d   : > { %2611 = vst [vmem:[#allocation4 + $0x30] sm:$0xf] %v4673_v9  ;;  %2564 = vst [vmem:[#allocation4 + $0x50] sm:$0xf] %v4689_v54  ;;  %4997 = vmatprep.subr.bf16.mxu1 %v5372_v51  ;;  %v5399_v48 = vld [vmem:[%s6405_s6 + $0x110] sm:$0xff]   ;;  %v5403_v49 = vld [vmem:[%s6405_s6 + $0x198] sm:$0xff]  }
 0x18e   : > { %2707 = vst [vmem:[#allocation4 + $0x38] sm:$0xf] %v4689_v54  ;;  %2755 = vst [vmem:[#allocation4 + $0x18] sm:$0xf] %v4673_v9  ;;  %v2432_v4 = vld [vmem:[#allocation3 + $0x60] sm:$0xff]  ;;  %v5404_v50 = vld [vmem:[%s6405_s6 + $0x148] sm:$0xff]  }
 0x18f   : > { %2851 = vst [vmem:[#allocation4 + $0x20] sm:$0xf] %v4689_v54  ;;  %2473 = vst [vmem:[#allocation4 + $0xfc] sm:$0xf] %v4678_v1  ;;  %v2528_v6 = vld [vmem:[#allocation3 + $0x62] sm:$0xff]  ;;  %v4700_v7 = vpack.c.bf16 %v2432_v4, %v2432_v4  ;;  %v2895_v42 = vld [vmem:[#allocation4 + $0x90] sm:$0xff] }
 0x190   : > { %2569 = vst [vmem:[#allocation4 + $0x104] sm:$0xf] %v4694_v12  ;;  %2616 = vst [vmem:[#allocation4 + $0xe4] sm:$0xf] %v4678_v1  ;;  %v4693_v52 = vpack.c.bf16 %v2528_v6, %v2528_v6  ;;  %v5375_v20 = vld [vmem:[#allocation4 + $0x54] ss:$36 sps:$4 sm:$0xff]   ;;  %4998 = vmatpush3.bf16.msra.mxu1 %v5373_v46 }
 0x191   : > { %2760 = vst [vmem:[#allocation4 + $0xcc] sm:$0xf] %v4678_v1  ;;  %2712 = vst [vmem:[#allocation4 + $0xec] sm:$0xf] %v4694_v12  ;;  %4999 = vmatprep.subr.bf16.mxu1 %v5378_v3  ;;  %v5406_v56 = vld [vmem:[%s6405_s6 + $0x1d0] sm:$0xff]   ;;  %v5405_v59 = vld [vmem:[%s6405_s6 + $0x108] sm:$0xff]  }
 0x192   : > { %2856 = vst [vmem:[#allocation4 + $0xd4] sm:$0xf] %v4694_v12  ;;  %2854 = vst [vmem:[#allocation4 + $0x8c] sm:$0xf] %v4738_v14  ;;  %v5394_v47 = vld [vmem:[#allocation4 + $0xdc] ss:$36 sps:$4 sm:$0xff]  }
 0x193   : > { %2471 = vst [vmem:[#allocation4 + $0xb4] sm:$0xf] %v4676_v15  ;;  %2567 = vst [vmem:[#allocation4 + $0xbc] sm:$0xf] %v4738_v14  ;;  %v2885_v17 = vld [vmem:[#allocation4 + $0x48] sm:$0xff]  ;;  %v5410_v61 = vld [vmem:[%s6405_s6 + $0x190] sm:$0xff]  }
 0x194   : > { %2614 = vst [vmem:[#allocation4 + $0x9c] sm:$0xf] %v4676_v15  ;;  %2758 = vst [vmem:[#allocation4 + $0x84] sm:$0xf] %v4676_v15  ;;  %v5371_v16 = vld [vmem:[#allocation4 + $0xc] ss:$36 sps:$4 sm:$0xff]   ;;  %v4488_v5 = vcombine.low %v2885_v17, %v2890_v22  ;;  %5000 = vmatpush3.bf16.msra.mxu1 %v5379_v21 }
 0x195   : > { %2710 = vst [vmem:[#allocation4 + $0xa4] sm:$0xf] %v4738_v14  ;;  %2617 = vst [vmem:[#allocation4 + $0x108] sm:$0xf] %v4702_v2  ;;  %3772 = vmatprep.mubr.bf16.mxu0 %v5371_v16  ;;  %5001 = vmatprep.subr.bf16.mxu1 %v5384_v24  ;;  %v5385_v34 = vld [vmem:[#allocation4 + $0x50] ss:$36 sps:$4 sm:$0xff]  }
 0x196   : > { %2713 = vst [vmem:[#allocation4 + $0x110] sm:$0xf] %v4718_v10  ;;  %2761 = vst [vmem:[#allocation4 + $0xf0] sm:$0xf] %v4702_v2  ;;  %3773 = vmatmul.mubr.bf16.vlgmr.msra.gmra.mxu0 %v5369_v41  ;;  %3716 = vmatmul.mubr.bf16.gmra.mxu1 %v4488_v5  ;;  %v2910_v58 = vld [vmem:[#allocation4 + $0xfc] sm:$0xff]  ;;  %v5414_v54 = vld [vmem:[%s6405_s6 + $0x1c8] sm:$0xff]  }
 0x197   : > { %2857 = vst [vmem:[#allocation4 + $0xf8] sm:$0xf] %v4718_v10  ;;  %2615 = vst [vmem:[#allocation4 + $0xc0] sm:$0xf] %v4700_v7  ;;  %3780 = vmatprep.mubr.bf16.mxu0 %v5375_v20  ;;  %5036 = vmatpush3.bf16.msra.mxu0 %v5377_v40  ;;  %v5411_v8 = vld [vmem:[%s6405_s6 + $0x140] sm:$0xff]   ;;  %v5415_v0 = vld [vmem:[%s6405_s6 + $0x188] sm:$0xff]  }
 0x198   : > { %2472 = vst [vmem:[#allocation4 + $0xd8] sm:$0xf] %v4700_v7  ;;  %2568 = vst [vmem:[#allocation4 + $0xe0] sm:$0xf] %v4693_v52  ;;  %5037 = vmatprep.subr.bf16.mxu0 %v5380_v18  ;;  %3723 = vmatprep.mubr.bf16.mxu1 %v5381_v25  ;;  %v5409_v9 = vld [vmem:[#allocation4 + $0x14] ss:$36 sps:$4 sm:$0xff]  }
 0x199   : > { %2711 = vst [vmem:[#allocation4 + $0xc8] sm:$0xf] %v4693_v52  ;;  %2759 = vst [vmem:[#allocation4 + $0xa8] sm:$0xf] %v4700_v7  ;;  %5002 = vmatpush3.bf16.msra.mxu1 %v5386_v27  ;;  %v5413_v11 = vld [vmem:[%s6405_s6 + $0x100] sm:$0xff]   ;;  %v5419_v63 = vld [vmem:[%s6405_s6 + $0x238] sm:$0xff]  }
 0x19a   : > { %2855 = vst [vmem:[#allocation4 + $0xb0] sm:$0xf] %v4693_v52  ;;  %v2900_v33 = vld [vmem:[#allocation4 + $0xb4] sm:$0xff]  ;;  %5003 = vmatprep.subr.bf16.mxu1 %v5391_v32  ;;  %v5420_v1 = vld [vmem:[%s6405_s6 + $0x1c0] sm:$0xff]   ;;  %v5428_v51 = vld [vmem:[%s6405_s6 + $0x228] sm:$0xff]  }
 0x19b   : > { %5038 = vmatpush3.bf16.msra.mxu0 %v5383_v23  ;;  %v4497_v43 = vcombine.low %v2895_v42, %v2900_v33  ;;  %v5398_v30 = vld [vmem:[#allocation4 + $0x98] ss:$36 sps:$4 sm:$0xff]   ;;  %v5407_v14 = vld [vmem:[#allocation4 + $0x10] ss:$36 sps:$4 sm:$0xff]   ;;  %v5423_v13 = vld [vmem:[%s6405_s6 + $0x180] sm:$0xff]  }
 0x19c   : > { %5039 = vmatprep.subr.bf16.mxu0 %v5387_v26  ;;  %v5401_v57 = vld [vmem:[#allocation4 + $0xe4] ss:$36 sps:$4 sm:$0xff]   ;;  %v5418_v12 = vld [vmem:[#allocation4 + $0x1c] ss:$36 sps:$4 sm:$0xff]   ;;  %v5424_v15 = vld [vmem:[%s6405_s6 + $0x230] sm:$0xff]  }
 0x19d   : > { %5004 = vmatpush3.bf16.msra.mxu1 %v5392_v35  ;;  %v5421_v37 = vld [vmem:[#allocation4 + $0x5c] ss:$36 sps:$4 sm:$0xff]   ;;  %v6228_v2 = vld [vmem:[%s6406_s7 + $0x30] sm:$0xff]   ;;  %v5426_v10 = vld [vmem:[#allocation4 + $0x64] ss:$36 sps:$4 sm:$0xff]  }
 0x19e   : > { %v5388_v38 = vld [vmem:[#allocation4 + $0x9c] ss:$36 sps:$4 sm:$0xff]   ;;  %3781 = vmatmul.mubr.bf16.gmra.mxu0 %v5385_v34  ;;  %3724 = vmatmul.mubr.bf16.gmra.mxu1 %v4497_v43  ;;  %v6238_v46 = vld [vmem:[%s6406_s7 + $0x28] sm:$0xff]   ;;  %v5441_v20 = vld [vmem:[%s6405_s6 + $0x210] sm:$0xff]  }
 0x19f   : > { %3788 = vmatprep.mubr.bf16.mxu0 %v5388_v38  ;;  %5040 = vmatpush3.bf16.msra.mxu0 %v5390_v28  ;;  %v2905_v55 = vld [vmem:[#allocation4 + $0xd8] sm:$0xff]  ;;  %v5412_v62 = vld [vmem:[#allocation4 + $0xe0] ss:$36 sps:$4 sm:$0xff]   ;;  %v5435_v17 = vld [vmem:[#allocation4 + $0xac] ss:$36 sps:$4 sm:$0xff]  }
 0x1a0   : > { %5041 = vmatprep.subr.bf16.mxu0 %v5393_v36  ;;  %3731 = vmatprep.mubr.bf16.mxu1 %v5394_v47  ;;  %v4506_v60 = vcombine.low %v2905_v55, %v2910_v58  ;;  %v6219_v39 = vld [vmem:[%s6406_s7 + $0x38] sm:$0xff]   ;;  %v5432_v7 = vld [vmem:[%s6405_s6 + $0x220] sm:$0xff]   ;;  %v5439_v21 = vld [vmem:[#allocation4 + $0xec] ss:$36 sps:$4 sm:$0xff]  }
 0x1a1   : > { %5005 = vmatprep.subr.bf16.mxu1 %v5397_v45  ;;  %v5416_v29 = vld [vmem:[#allocation4 + $0x18] ss:$36 sps:$4 sm:$0xff]   ;;  %v5430_v52 = vld [vmem:[#allocation4 + $0xa4] ss:$36 sps:$4 sm:$0xff]   ;;  %v5448_v24 = vld [vmem:[%s6406_s7 + $0x10] sm:$0xff]  }
 0x1a2   : > { %5006 = vmatpush3.bf16.msra.mxu1 %v5399_v48  ;;  %v2892_v31 = vld [vmem:[#allocation4 + $0x7c] sm:$0xff]  ;;  %v2902_v40 = vld [vmem:[#allocation4 + $0xc4] sm:$0xff]  ;;  %v5444_v25 = vld [vmem:[#allocation4 + $0xf4] ss:$36 sps:$4 sm:$0xff]  }
 0x1a3   : > { %5042 = vmatpush3.bf16.msra.mxu0 %v5396_v44  ;;  %5007 = vmatprep.subr.bf16.mxu1 %v5404_v50  ;;  %v2887_v4 = vld [vmem:[#allocation4 + $0x58] sm:$0xff]  ;;  %v5433_v41 = vld [vmem:[#allocation4 + $0x60] ss:$36 sps:$4 sm:$0xff]   ;;  %v5442_v23 = vld [vmem:[#allocation4 + $0xa8] ss:$36 sps:$4 sm:$0xff]  }
 0x1a4   : > { %5043 = vmatprep.subr.bf16.mxu0 %v5400_v19  ;;  %v4492_v6 = vcombine.low %v2887_v4, %v2892_v31  ;;  %v5437_v53 = vld [vmem:[%s6405_s6 + $0x218] sm:$0xff]   ;;  %v6248_v16 = vld [vmem:[%s6406_s7 + $0x20] sm:$0xff]   ;;  %v5446_v5 = vld [vmem:[%s6405_s6 + $0x208] sm:$0xff]  }
 0x1a5   : > { %v2897_v3 = vld [vmem:[#allocation4 + $0xa0] sm:$0xff]  ;;  %v5443_v22 = vld [vmem:[%s6406_s7 + $0x18] sm:$0xff]   ;;  %v5447_v26 = vld [vmem:[#allocation4 + $0xe8] ss:$36 sps:$4 sm:$0xff]  }
 0x1a6   : > { %3789 = vmatmul.mubr.bf16.gmra.mxu0 %v5398_v30  ;;  %3732 = vmatmul.mubr.bf16.gmra.mxu1 %v4506_v60  ;;  %v4501_v18 = vcombine.low %v2897_v3, %v2902_v40  ;;  %v5450_v27 = vld [vmem:[%s6405_s6 + $0x200] sm:$0xff]   ;;  %v5452_v32 = vld [vmem:[%s6406_s7 + $0x8] sm:$0xff]   ;;  %v5451_v33 = vld [vmem:[#allocation4 + $0xf0] ss:$36 sps:$4 sm:$0xff]  }
 0x1a7   : > { %3796 = vmatprep.mubr.bf16.mxu0 %v5401_v57  ;;  %5044 = vmatpush3.bf16.msra.mxu0 %v5403_v49  ;;  %v5449_v28 = vld [vmem:[#allocation4 + $0x20] ss:$36 sps:$4 sm:$0xff]   ;;  %v5460_v36 = vld [vmem:[#allocation2 + $0x10] sm:$0xff]  ;;  %v5453_v42 = vld [vmem:[#allocation4 + $0x68] ss:$36 sps:$4 sm:$0xff]  }
 0x1a8   : > { %5045 = vmatprep.subr.bf16.mxu0 %v5406_v56  ;;  %5008 = vmatpush3.bf16.msra.mxu1 %v5405_v59  ;;  %v5454_v34 = vld [vmem:[%s6406_s7] sm:$0xff]   ;;  %v5455_v43 = vld [vmem:[#allocation4 + $0xb0] ss:$36 sps:$4 sm:$0xff]   ;;  %v5456_v50 = vld [vmem:[#allocation4 + $0xf8] ss:$36 sps:$4 sm:$0xff]  }
 0x1a9   : > { %3837 = vmatprep.mubr.bf16.mxu1 %v5409_v9  ;;  %5009 = vmatprep.subr.bf16.mxu1 %v5411_v8  ;;  %v5459_v35 = vld [vmem:[#allocation2] sm:$0xff]  ;;  %v5462_v45 = vld [vmem:[#allocation2 + $0x30] sm:$0xff] }
 0x1aa   : > { %v587_v38 = vpack.c.bf16 %v5460_v36, %v5459_v35  ;;  %v5461_v44 = vld [vmem:[#allocation2 + $0x20] sm:$0xff]  ;;  %v5464_v48 = vld [vmem:[#allocation2 + $0x50] sm:$0xff] }
 0x1ab   : > { %5046 = vmatpush3.bf16.msra.mxu0 %v5410_v61  ;;  %v588_v47 = vpack.c.bf16 %v5462_v45, %v5461_v44  ;;  %v5463_v19 = vld [vmem:[#allocation2 + $0x40] sm:$0xff]  ;;  %v5466_v30 = vld [vmem:[#allocation2 + $0x70] sm:$0xff] }
 0x1ac   : > { %5047 = vmatprep.subr.bf16.mxu0 %v5414_v54  ;;  %5010 = vmatpush3.bf16.msra.mxu1 %v5413_v11  ;;  %v589_v49 = vpack.c.bf16 %v5464_v48, %v5463_v19  ;;  %v5465_v55 = vld [vmem:[#allocation2 + $0x60] sm:$0xff] }
 0x1ad   : > { %5123 = vmatprep.subr.bf16.mxu1 %v5419_v63  ;;  %v590_v56 = vpack.c.bf16 %v5466_v30, %v5465_v55 }
 0x1ae   : > { %3797 = vmatmul.mubr.bf16.gmra.mxu0 %v5412_v62 }
 0x1af   : > { %5048 = vmatpush3.bf16.msra.mxu0 %v5415_v0  ;;  %3902 = vmatprep.mubr.bf16.mxu0 %v5418_v12 }
 0x1b0   : > { %5049 = vmatprep.subr.bf16.mxu0 %v5420_v1  ;;  %3838 = vmatmul.mubr.bf16.vlgmr.msra.gmra.mxu1 %v5407_v14 }
 0x1b1   : > { %5124 = vmatpush3.bf16.msra.mxu1 %v5419_v63  ;;  %3845 = vmatprep.mubr.bf16.mxu1 %v5421_v37 }
 0x1b2   : > { %5125 = vmatprep.subr.bf16.mxu1 %v5424_v15 }
 0x1b3   : > { %5050 = vmatpush3.bf16.msra.mxu0 %v5423_v13 }
 0x1b4   : > { %5147 = vmatprep.subr.bf16.mxu0 %v6219_v39 }
 0x1b5   : > { %5126 = vmatpush3.bf16.msra.mxu1 %v5424_v15 }
 0x1b6   : > { %3903 = vmatmul.mubr.bf16.vlgmr.msra.gmra.mxu0 %v5416_v29  ;;  %5127 = vmatprep.subr.bf16.mxu1 %v5428_v51 }
 0x1b7   : > { %3910 = vmatprep.mubr.bf16.mxu0 %v5426_v10  ;;  %5148 = vmatpush3.bf16.msra.mxu0 %v6219_v39 }
 0x1b8   : > { %5149 = vmatprep.subr.bf16.mxu0 %v6228_v2  ;;  %3846 = vmatmul.mubr.bf16.gmra.mxu1 %v4492_v6 }
 0x1b9   : > { %5128 = vmatpush3.bf16.msra.mxu1 %v5428_v51  ;;  %3853 = vmatprep.mubr.bf16.mxu1 %v5430_v52 }
 0x1ba   : > { %5129 = vmatprep.subr.bf16.mxu1 %v5432_v7 }
 0x1bb   : > { %5150 = vmatpush3.bf16.msra.mxu0 %v6228_v2 }
 0x1bc   : > { %5151 = vmatprep.subr.bf16.mxu0 %v6238_v46 }
 0x1bd   : > { %5130 = vmatpush3.bf16.msra.mxu1 %v5432_v7 }
 0x1be   : > { %3911 = vmatmul.mubr.bf16.gmra.mxu0 %v5433_v41  ;;  %5131 = vmatprep.subr.bf16.mxu1 %v5437_v53 }
 0x1bf   : > { %3918 = vmatprep.mubr.bf16.mxu0 %v5435_v17  ;;  %5152 = vmatpush3.bf16.msra.mxu0 %v6238_v46 }
 0x1c0   : > { %5153 = vmatprep.subr.bf16.mxu0 %v6248_v16  ;;  %3854 = vmatmul.mubr.bf16.gmra.mxu1 %v4501_v18 }
 0x1c1   : > { %5132 = vmatpush3.bf16.msra.mxu1 %v5437_v53  ;;  %3861 = vmatprep.mubr.bf16.mxu1 %v5439_v21 }
 0x1c2   : > { %5133 = vmatprep.subr.bf16.mxu1 %v5441_v20 }
 0x1c3   : > { %5154 = vmatpush3.bf16.msra.mxu0 %v6248_v16 }
 0x1c4   : > { %5155 = vmatprep.subr.bf16.mxu0 %v5443_v22 }
 0x1c5   : > { %5134 = vmatpush3.bf16.msra.mxu1 %v5441_v20 }
 0x1c6   : > { %3919 = vmatmul.mubr.bf16.gmra.mxu0 %v5442_v23  ;;  %5135 = vmatprep.subr.bf16.mxu1 %v5446_v5 }
 0x1c7   : > { %3926 = vmatprep.mubr.bf16.mxu0 %v5444_v25  ;;  %5156 = vmatpush3.bf16.msra.mxu0 %v5443_v22 }
 0x1c8   : > { %5157 = vmatprep.subr.bf16.mxu0 %v5448_v24  ;;  %3862 = vmatmul.mubr.bf16.gmra.mxu1 %v5447_v26 }
 0x1c9   : > { %5136 = vmatpush3.bf16.msra.mxu1 %v5446_v5  ;;  %5139 = vmatprep.mubr.bf16.mxu1 %v5449_v28 }
 0x1ca   : > { %5137 = vmatprep.subr.bf16.mxu1 %v5450_v27 }
 0x1cb   : > { %5158 = vmatpush3.bf16.msra.mxu0 %v5448_v24 }
 0x1cc   : > { %5159 = vmatprep.subr.bf16.mxu0 %v5452_v32 }
 0x1cd   : > { %5138 = vmatpush3.bf16.msra.mxu1 %v5450_v27 }
 0x1ce   : > { %3927 = vmatmul.mubr.bf16.gmra.mxu0 %v5451_v33  ;;  %5171 = vmatprep.subr.bf16.mxu1 %v6219_v39 }
 0x1cf   : > { %5160 = vmatpush3.bf16.msra.mxu0 %v5452_v32  ;;  %5163 = vmatprep.mubr.bf16.mxu0 %v587_v38 }
 0x1d0   : > { %5161 = vmatprep.subr.bf16.mxu0 %v5454_v34  ;;  %5140 = vmatmul.mubr.bf16.vlgmr.msra.gmra.mxu1 %v5453_v42 }
 0x1d1   : > { %5179 = vmatpush3.bf16.msra.mxu1 %v6219_v39  ;;  %5143 = vmatprep.mubr.bf16.mxu1 %v5455_v43 }
 0x1d2   : > { %5172 = vmatprep.subr.bf16.mxu1 %v6228_v2 }
 0x1d3   : > { %5162 = vmatpush3.bf16.msra.mxu0 %v5454_v34 }
 0x1d5   : > { %5180 = vmatpush3.bf16.msra.mxu1 %v6228_v2 }
 0x1d6   : > { %5164 = vmatmul.mubr.bf16.vlgmr.msra.gmra.mxu0 %v588_v47  ;;  %5173 = vmatprep.subr.bf16.mxu1 %v6238_v46 }
 0x1d8   : > { %5144 = vmatmul.mubr.bf16.gmra.mxu1 %v5456_v50 }
 0x1d9   : > { %5181 = vmatpush3.bf16.msra.mxu1 %v6238_v46  ;;  %5167 = vmatprep.mubr.bf16.mxu1 %v589_v49 }
 0x1da   : > { %5174 = vmatprep.subr.bf16.mxu1 %v6248_v16 }
 0x1dd   : > { %5182 = vmatpush3.bf16.msra.mxu1 %v6248_v16 }
 0x1de   : > { %5175 = vmatprep.subr.bf16.mxu1 %v5443_v22 }
 0x1e1   : > { %5183 = vmatpush3.bf16.msra.mxu1 %v5443_v22 }
 0x1e2   : > { %5176 = vmatprep.subr.bf16.mxu1 %v5448_v24 }
 0x1e5   : > { %5184 = vmatpush3.bf16.msra.mxu1 %v5448_v24 }
 0x1e6   : > { %5177 = vmatprep.subr.bf16.mxu1 %v5452_v32 }
 0x1e9   : > { %5185 = vmatpush3.bf16.msra.mxu1 %v5452_v32 }
 0x1ea   : > { %5178 = vmatprep.subr.bf16.mxu1 %v5454_v34 }
 0x1ed   : > { %5186 = vmatpush3.bf16.msra.mxu1 %v5454_v34 }
 0x1f0   : > { %5168 = vmatmul.mubr.bf16.vlgmr.msra.gmra.mxu1 %v590_v56 }
 0x24b   : > { %v6282_v57 = vpop.f32.mrf.mxu1 }
 0x24d   : > { %v6284_v58 = vpop.f32.mrf.mxu1 }
 0x24f   : > { %v6286_v59 = vpop.f32.mrf.mxu1 }
 0x251   : > { %v6290_v61 = vpop.f32.mrf.mxu1 }
 0x256   : > { %v6288_v60 = vpop.f32.mrf.mxu0  ;;  %v4937_v9 = vpop.f32.mrf.mxu1 }
 0x258   : > { %v4972_v8 = vpop.f32.mrf.mxu0  ;;  %v4938_v11 = vpop.f32.mrf.mxu1 }
 0x25a   : > { %v6292_v54 = vpop.f32.mrf.mxu0  ;;  %v6296_v62 = vpop.f32.mrf.mxu1 }
 0x25c   : > { %v6294_v0 = vpop.f32.mrf.mxu0  ;;  %v6298_v1 = vpop.f32.mrf.mxu1 }
 0x25e   : > { %v4977_v63 = vpop.f32.mrf.mxu0  ;;  %v4943_v14 = vpop.f32.mrf.mxu1 }
 0x260   : > { %v4978_v12 = vpop.f32.mrf.mxu0  ;;  %v4944_v15 = vpop.f32.mrf.mxu1 }
 0x261   : > { %v4945_v37 = vadd.f32 %v4944_v15, %v4943_v14  ;;  %v4979_v30 = vadd.f32 %v4978_v12, %v4977_v63  ;;  %v4973_v15 = vadd.f32 %v4972_v8, %v6288_v60  ;;  %v4942_v60 = vadd.f32 %v6298_v1, %v6296_v62 }
 0x262   : > { %v4980_v13 = vpop.f32.mrf.mxu0  ;;  %v4946_v51 = vpop.f32.mrf.mxu1 }
 0x264   : > { %v4981_v39 = vpop.f32.mrf.mxu0  ;;  %v4947_v31 = vpop.f32.mrf.mxu1 }
 0x265   : > { %v4948_v2 = vadd.f32 %v4947_v31, %v4946_v51  ;;  %v4982_v31 = vadd.f32 %v4981_v39, %v4980_v13 }
 0x266   : > { %v4983_v29 = vpop.f32.mrf.mxu0  ;;  %v6300_v6 = vpop.f32.mrf.mxu1 }
 0x268   : > { %v4984_v10 = vpop.f32.mrf.mxu0  ;;  %v6304_v46 = vpop.f32.mrf.mxu1 }
 0x269   : > { %v4985_v4 = vadd.f32 %v4984_v10, %v4983_v29  ;;  %v4933_v10 = vadd.f32 %v6284_v58, %v6282_v57  ;;  %v4936_v57 = vadd.f32 %v6290_v61, %v6286_v59  ;;  %v3786_v58 = vadd.f32 %v4982_v31, %v4942_v60 }
 0x26a   : > { %v4986_v7 = vpop.f32.mrf.mxu0  ;;  %v6306_v41 = vpop.f32.mrf.mxu1 }
 0x26b   : > { %v6302_v52 = vadd.f32 %v4985_v4, %v4945_v37  ;;  %v4939_v37 = vadd.f32 %v4938_v11, %v4937_v9  ;;  %v3775_v9 = vadd.f32 %v4973_v15, %v4933_v10 }
 0x26c   : > { %v4987_v53 = vpop.f32.mrf.mxu0  ;;  %v6312_v3 = vpop.f32.mrf.mxu1 }
 0x26d   : > { %v4988_v40 = vadd.f32 %v4987_v53, %v4986_v7  ;;  %v3783_v4 = vadd.f32 %v4979_v30, %v4939_v37  ;;  %v4976_v53 = vadd.f32 %v6294_v0, %v6292_v54 }
 0x26e   : > { %v6308_v16 = vpop.f32.mrf.mxu0 }
 0x26f   : > { %v6310_v17 = vadd.f32 %v4988_v40, %v4948_v2  ;;  %v3778_v54 = vadd.f32 %v4976_v53, %v4936_v57  ;;  %v4951_v53 = vadd.f32 %v6304_v46, %v6300_v6 }
 0x270   : > { %v6314_v18 = vpop.f32.mrf.mxu0  ;;  %v5011_v20 = vpop.f32.mrf.mxu1 }
 0x272   : > { %v6316_v21 = vpop.f32.mrf.mxu0  ;;  %v5012_v22 = vpop.f32.mrf.mxu1 }
 0x273   : > { %v5013_v7 = vadd.f32 %v5012_v22, %v5011_v20 }
 0x274   : > { %v6318_v23 = vpop.f32.mrf.mxu0  ;;  %v5014_v5 = vpop.f32.mrf.mxu1 }
 0x275   : > { %v3840_v22 = vadd.f32 %v5013_v7, %v3775_v9  ;;  %v4991_v7 = vadd.f32 %v6314_v18, %v6308_v16  ;;  %v4994_v9 = vadd.f32 %v6318_v23, %v6316_v21 }
 0x276   : > { %v5051_v24 = vpop.f32.mrf.mxu0  ;;  %v5015_v25 = vpop.f32.mrf.mxu1 }
 0x278   : > { %v5052_v26 = vpop.f32.mrf.mxu0  ;;  %v5017_v27 = vpop.f32.mrf.mxu1 }
 0x279   : > { %v5053_v11 = vadd.f32 %v5052_v26, %v5051_v24 }
 0x27a   : > { %v5054_v28 = vpop.f32.mrf.mxu0  ;;  %v5018_v32 = vpop.f32.mrf.mxu1 }
 0x27b   : > { %v5019_v51 = vadd.f32 %v5018_v32, %v5017_v27  ;;  %v5016_v27 = vadd.f32 %v5015_v25, %v5014_v5  ;;  %v3905_v24 = vadd.f32 %v5053_v11, %v3840_v22  ;;  %v3799_v11 = vadd.f32 %v4991_v7, %v4951_v53 }
 0x27c   : > { %v5055_v33 = vpop.f32.mrf.mxu0  ;;  %v5020_v34 = vpop.f32.mrf.mxu1 }
 0x27d   : > { %v3848_v13 = vadd.f32 %v5019_v51, %v3783_v4  ;;  %v5056_v62 = vadd.f32 %v5055_v33, %v5054_v28  ;;  %v3843_v61 = vadd.f32 %v5016_v27, %v3778_v54 }
 0x27e   : > { %v5057_v35 = vpop.f32.mrf.mxu0  ;;  %v5021_v36 = vpop.f32.mrf.mxu1 }
 0x27f   : > { %v5022_v39 = vadd.f32 %v5021_v36, %v5020_v34 }
 0x280   : > { %v5058_v38 = vpop.f32.mrf.mxu0  ;;  %v6320_v42 = vpop.f32.mrf.mxu1 }
 0x281   : > { %v5059_v63 = vadd.f32 %v5058_v38, %v5057_v35  ;;  %v3851_v1 = vadd.f32 %v5022_v39, %v3786_v58 }
 0x282   : > { %v5060_v43 = vpop.f32.mrf.mxu0  ;;  %v6322_v44 = vpop.f32.mrf.mxu1 }
 0x283   : > { %v3913_v35 = vadd.f32 %v5059_v63, %v3848_v13  ;;  %v5025_v13 = vadd.f32 %v6322_v44, %v6320_v42 }
 0x284   : > { %v5061_v45 = vpop.f32.mrf.mxu0  ;;  %v6324_v47 = vpop.f32.mrf.mxu1 }
 0x285   : > { %v5062_v32 = vadd.f32 %v5061_v45, %v5060_v43  ;;  %v3908_v43 = vadd.f32 %v5056_v62, %v3843_v61 }
 0x286   : > { %v6326_v19 = vpop.f32.mrf.mxu0  ;;  %v6328_v48 = vpop.f32.mrf.mxu1 }
 0x287   : > { %v3916_v25 = vadd.f32 %v5062_v32, %v3851_v1  ;;  %v5028_v21 = vadd.f32 %v6328_v48, %v6324_v47 }
 0x288   : > { %v6330_v49 = vpop.f32.mrf.mxu0  ;;  %v6332_v50 = vpop.f32.mrf.mxu1 }
 0x289   : > { %v5065_v16 = vadd.f32 %v6330_v49, %v6326_v19 }
 0x28a   : > { %v6334_v55 = vpop.f32.mrf.mxu0  ;;  %v6336_v56 = vpop.f32.mrf.mxu1 }
 0x28b   : > { %v5031_v60 = vadd.f32 %v6336_v56, %v6332_v50  ;;  %v3856_v50 = vadd.f32 %v5025_v13, %v6302_v52 }
 0x28c   : > { %v6340_v14 = vpop.f32.mrf.mxu0  ;;  %v6343_v29 = vpop.f32.mrf.mxu1 }
 0x28d   : > { %v3864_v18 = vadd.f32 %v5031_v60, %v3799_v11  ;;  %v3921_v19 = vadd.f32 %v5065_v16, %v3856_v50 }
 0x28e   : > { %v5069_v2 = vpop.f32.mrf.mxu0  ;;  %v5033_v12 = vpop.f32.mrf.mxu1 }
 0x28f   : > { %v5034_v6 = vadd.f32 %v5033_v12, %v6343_v29  ;;  %v3859_v29 = vadd.f32 %v5028_v21, %v6310_v17 }
 0x290   : > { %v5070_v8 = vpop.f32.mrf.mxu0  ;;  %v5141_v40 = vpop.f32.mrf.mxu1 }
 0x291   : > { %v3978_v30 = vadd.f32 %v5141_v40, %v3913_v35  ;;  %v5071_v39 = vadd.f32 %v5070_v8, %v5069_v2  ;;  %v4954_v40 = vadd.f32 %v6312_v3, %v6306_v41  ;;  %v5068_v41 = vadd.f32 %v6340_v14, %v6334_v55 }
 0x292   : > { %v5072_v20 = vpop.f32.mrf.mxu0  ;;  %v3969_v38 = vpop.f32.mrf.mxu1 }
 0x293   : > { %v3970_v5 = vadd.f32 %v3969_v38, %v3905_v24  ;;  %v3802_v46 = vadd.f32 %v4994_v9, %v4954_v40  ;;  %v3929_v42 = vadd.f32 %v5071_v39, %v3864_v18  ;;  %v3924_v8 = vadd.f32 %v5068_v41, %v3859_v29 }
 0x294   : > { %v5073_v0 = vpop.f32.mrf.mxu0  ;;  %v5142_v26 = vpop.f32.mrf.mxu1 }
 0x295   : > { %v3981_v33 = vadd.f32 %v5142_v26, %v3916_v25  ;;  %v5074_v23 = vadd.f32 %v5073_v0, %v5072_v20  ;;  %v3867_v3 = vadd.f32 %v5034_v6, %v3802_v46 }
 0x296   : > { %v5165_v59 = vpop.f32.mrf.mxu0  ;;  %v3972_v36 = vpop.f32.mrf.mxu1 }
 0x297   : > { %v4091_v34 = vadd.f32 %v5165_v59, %v3978_v30  ;;  %v3973_v37 = vadd.f32 %v3972_v36, %v3908_v43  ;;  %v3932_v2 = vadd.f32 %v5074_v23, %v3867_v3 }
 0x298   : > { %v4082_v28 = vpop.f32.mrf.mxu0  ;;  %v5145_v4 = vpop.f32.mrf.mxu1 }
 0x299   : > { %4115 = vst [vmem:[%s6358_s25 + $0x10] sm:$0xff] %v4091_v34  ;;  %v4083_v45 = vadd.f32 %v4082_v28, %v3970_v5  ;;  %v3994_v56 = vadd.f32 %v5145_v4, %v3929_v42 }
 0x29a   : > { %v5166_v15 = vpop.f32.mrf.mxu0  ;;  %v3985_v63 = vpop.f32.mrf.mxu1 }
 0x29b   : > { %4113 = vst [vmem:[%s6358_s25] sm:$0xff] %v4083_v45  ;;  %v4094_v51 = vadd.f32 %v5166_v15, %v3981_v33  ;;  %v3986_v52 = vadd.f32 %v3985_v63, %v3921_v19 }
 0x29c   : > { %v4085_v31 = vpop.f32.mrf.mxu0  ;;  %v5146_v57 = vpop.f32.mrf.mxu1 }
 0x29d   : > { %4116 = vst [vmem:[%s6358_s25 + $0x18] sm:$0xff] %v4094_v51  ;;  %v4086_v10 = vadd.f32 %v4085_v31, %v3973_v37  ;;  %v3997_v48 = vadd.f32 %v5146_v57, %v3932_v2 }
 0x29e   : > { %v3988_v44 = vpop.f32.mrf.mxu1 }
 0x29f   : > { %4114 = vst [vmem:[%s6358_s25 + $0x8] sm:$0xff] %v4086_v10  ;;  %v3989_v22 = vadd.f32 %v3988_v44, %v3924_v8 }
 0x2b0   : > { %v5169_v49 = vpop.f32.mrf.mxu1 }
 0x2b1   : > { %v4107_v12 = vadd.f32 %v5169_v49, %v3994_v56 }
 0x2b2   : > { %v4098_v47 = vpop.f32.mrf.mxu1 }
 0x2b3   : > { %4119 = vst [vmem:[%s6358_s25 + $0x30] sm:$0xff] %v4107_v12  ;;  %v4099_v58 = vadd.f32 %v4098_v47, %v3986_v52 }
 0x2b4   : > { %v5170_v20 = vpop.f32.mrf.mxu1 }
 0x2b5   : > { %4117 = vst [vmem:[%s6358_s25 + $0x20] sm:$0xff] %v4099_v58  ;;  %v4110_v55 = vadd.f32 %v5170_v20, %v3997_v48 }
 0x2b6   : > { %v4101_v14 = vpop.f32.mrf.mxu1 }
 0x2b7   : > { %4120 = vst [vmem:[%s6358_s25 + $0x38] sm:$0xff] %v4110_v55  ;;  %v4102_v27 = vadd.f32 %v4101_v14, %v3989_v22 }
 0x2b9   : > { %4118 = vst [vmem:[%s6358_s25 + $0x28] sm:$0xff] %v4102_v27 }
 0x2ba PF: > { %p15_p9 = scmp.ge.s32.totalorder %s5555_s9, 4   ;;  %s6416_s27 = smov %s5485_s28 }
 0x2bb   : > { %s6417_s28 = smov %s5564_s12  ;;  %s6418_s29 = smov %s5555_s9 }
 0x2bc   :  { %17 = sbr.rel (!%p15_p9) target bundleno = 2 (0x2), region = 136 }

</bundles_post_ra>
